<compile_context>
chip_gen: v7x
topology: tpu7x:2x2x1
jax: 0.10.0
libtpu: 0.0.40
codegen_flags: <defaults>
</compile_context>

<pallas_src>
import functools

import jax
import jax.numpy as jnp
from jax import lax
from jax.experimental import pallas as pl
from jax.experimental.pallas import tpu as pltpu

BN_EPS = 1e-5
C = 64  # channel width of every conv layer in AudioNTT2020


def _round_up(x, m):
    return (x + m - 1) // m * m


# ------------------------------------------------------------------------------------------
# Stage 1: conv tower (Conv3x3 + BN + ReLU + MaxPool2x2) x 3, one batch element per grid step
# ------------------------------------------------------------------------------------------
def _conv_tower_kernel(x_ref, w1c_ref, w2c_ref, w3c_ref, scale_ref, shift_ref,
                       feat_ref, xbc_scr, pool_scr, pad2_scr, pad3_scr, *, H, W, Wp1):
    f32 = jnp.float32
    H2, W2, Wp2 = H // 2, W // 2, Wp1 // 2
    H3, W3, Wp3 = H // 4, W // 4, Wp2 // 2
    F3, T3, Wp4 = H // 8, W // 8, Wp3 // 2
    Npad1 = (H + 3) * Wp1
    zrow = jnp.zeros((1, C), f32)

    def bn_relu(acc, layer):
        # folded inference BatchNorm (+conv bias) followed by ReLU
        return jnp.maximum(acc * scale_ref[layer] + shift_ref[layer], 0.0)

    def pool2x2(y, Hl, Wp):
        # y: (Hl*Wp, C) conv output, row stride Wp (cols >= real width carry junk).
        # Frequency (row-pair) max = whole-plane max of two aligned slices; time-pair max
        # goes through pool_scr + two stride-2 sublane reads (known-good lowering).
        # TODO(synk): replace the pool_scr round trip with an in-register roll/strided-select
        # once that lowering is validated on all target chips (review item).
        Ho = Hl // 2
        y3 = y.reshape(Ho, 2 * Wp, C)
        yf = jnp.maximum(y3[:, 0:Wp, :], y3[:, Wp:2 * Wp, :])
        pool_scr[0:Ho * Wp, :] = yf.reshape(Ho * Wp, C)
        half = Ho * Wp // 2
        ev = pool_scr[pl.ds(0, half, stride=2), :]
        od = pool_scr[pl.ds(1, half, stride=2), :]
        return jnp.maximum(ev, od)                       # (Ho * Wp//2, C)

    def zero_borders(pad_ref, Hl, Wp):
        # Only the zero-padding regions actually read by real outputs are cleared; the
        # interior (junk columns included) is fully rewritten every step.  Not gated on
        # program_id so it stays correct under megacore "parallel" sharding.
        pad_ref[0:Wp + 1, :] = jnp.zeros((Wp + 1, C), f32)
        lo = (Hl + 1) * Wp + 1
        hi = (Hl + 3) * Wp
        pad_ref[lo:hi, :] = jnp.zeros((hi - lo, C), f32)

    def mask_junk_cols(pad_ref, Hl, Wl, Wp):
        # Narrow junk-column masking: pooled col Wl becomes the right zero-pad tap of every
        # real row; pooled col Wp-1 wraps into the next padded row's left zero-pad column.
        # All other junk columns only ever feed junk outputs and are never read back.
        for r in range(1, Hl + 1):
            i = r * Wp + Wl + 1
            pad_ref[i:i + 1, :] = zrow
        for r in range(2, Hl + 2):
            i = r * Wp
            pad_ref[i:i + 1, :] = zrow

    zero_borders(pad2_scr, H2, Wp2)
    zero_borders(pad3_scr, H3, Wp3)

    # --------------------- layer 1: Conv(1 -> 64) --------------------------------------
    # Broadcast the 1-channel padded plane to C lanes ONCE; the 9 taps are then plain
    # sublane-offset slices times a (1, C) weight row (no per-tap lane broadcasts).
    L1 = H * Wp1
    xbc_scr[...] = x_ref[0, :, :] * jnp.ones((1, C), f32)
    acc = None
    for kh in range(3):
        for kw in range(3):
            s = kh * Wp1 + kw
            t = xbc_scr[s:s + L1, :] * w1c_ref[kh * 3 + kw]
            acc = t if acc is None else acc + t
    p1 = pool2x2(bn_relu(acc, 0), H, Wp1)                        # (H2*Wp2, C)
    pad2_scr[Wp2 + 1:Wp2 + 1 + H2 * Wp2, :] = p1                 # one contiguous store
    mask_junk_cols(pad2_scr, H2, W2, Wp2)

    # --------------------- layers 2/3: Conv(64 -> 64), 9 accumulated K=64 MXU dots -----
    def conv64(pad_ref, w_ref, Hl, Wp):
        Lw = Hl * Wp
        a = None
        for kh in range(3):
            for kw in range(3):
                s = kh * Wp + kw
                dk = jnp.dot(pad_ref[s:s + Lw, :], w_ref[kh * 3 + kw],
                             preferred_element_type=f32)
                a = dk if a is None else a + dk
        return a

    p2 = pool2x2(bn_relu(conv64(pad2_scr, w2c_ref, H2, Wp2), 1), H2, Wp2)
    pad3_scr[Wp3 + 1:Wp3 + 1 + H3 * Wp3, :] = p2
    mask_junk_cols(pad3_scr, H3, W3, Wp3)

    p3 = pool2x2(bn_relu(conv64(pad3_scr, w3c_ref, H3, Wp3), 2), H3, Wp3)
    # p3: (F3*Wp4, C); real time steps are cols [0, T3) of each frequency row.

    # --------------------- emit fc-input features (torch permute(0,3,2,1)+reshape) ------
    # feature[t, f*C + c] = h[f, t, c]; one lane-dense (T3, F3*C) store.
    feat_ref[0] = jnp.concatenate(
        [p3[f * Wp4:f * Wp4 + T3, :] for f in range(F3)], axis=1)


# ------------------------------------------------------------------------------------------
# Stage 2: fc head (Linear+ReLU+[Dropout=id]+Linear+ReLU) + temporal max+mean, batch-tiled
# ------------------------------------------------------------------------------------------
def _fc_head_kernel(x_ref, w1_ref, b1_ref, w2_ref, b2_ref, out_ref, *, T3, bt):
    f32 = jnp.float32
    x = x_ref[...].astype(w1_ref.dtype)
    z1 = jnp.maximum(
        jnp.dot(x, w1_ref[...], preferred_element_type=f32) + b1_ref[...], 0.0)
    # TODO(synk): nn.Dropout(p=0.3) is identity in eval mode; training-mode dropout not modeled.
    z2 = jnp.maximum(
        jnp.dot(z1.astype(w2_ref.dtype), w2_ref[...], preferred_element_type=f32)
        + b2_ref[...], 0.0)
    inv_t = 1.0 / T3
    for i in range(bt):
        zi = z2[i * T3:(i + 1) * T3, :]
        out_ref[i:i + 1, :] = (jnp.max(zi, axis=0, keepdims=True)
                               + jnp.sum(zi, axis=0, keepdims=True) * inv_t)


def _pick_batch_tile(B, T3, max_rows=512):
    """Largest batch tile with bt*T3 <= max_rows, keeping blocks sublane-aligned."""
    if B * T3 <= max_rows:
        return B
    for cand in range(B - 1, 0, -1):
        if B % cand == 0 and cand * T3 <= max_rows and cand % 8 == 0:
            return cand
    return B  # fall back to the whole batch in one step (always block-legal)


# ------------------------------------------------------------------------------------------
# Wrapper: parameter folding / layout prep + the two pallas_calls
# ------------------------------------------------------------------------------------------
def audio_ntt_forward(x_nchw, params, *, fc_weight_dtype=jnp.bfloat16):
    """x_nchw: (B, 1, n_mels, T) float32 -> (B, d) float32 (eval-mode AudioNTT2020)."""
    B, cin, H, W = x_nchw.shape
    assert cin == 1
    assert H % 8 == 0 and W % 8 == 0, "n_mels and n_frames must be multiples of 8"
    w1fc, b1fc, w2fc, b2fc = params["fc"]
    d = w1fc.shape[-1]
    F3, T3 = H // 8, W // 8
    K = F3 * C
    Wp1 = _round_up(W + 8, 32)             # aligned flattened row stride for layer 1
    Wp2, Wp3 = Wp1 // 2, Wp1 // 4
    H2, H3 = H // 2, H // 4
    Npad1 = (H + 3) * Wp1

    # Layer-1 padded input flattened to the aligned freq-major/time-minor layout.
    # TODO(synk): the (Npad1, 1) block is lane-padded in VMEM; a layout with a wide minor dim
    # would cut that waste but needs an in-kernel lane->sublane relayout.
    xp = jnp.pad(x_nchw[:, 0], ((0, 0), (1, 2), (1, Wp1 - W - 1)))
    xp = xp.reshape(B, Npad1, 1).astype(jnp.float32)

    # Fold conv bias + BatchNorm(running stats) into per-channel scale/shift.
    scales, shifts = [], []
    for (_, bias, gamma, beta, mean, var) in params["conv"]:
        s = gamma / jnp.sqrt(var + BN_EPS)
        scales.append(s)
        shifts.append(beta + (bias - mean) * s)
    bn_scale = jnp.stack(scales).reshape(3, 1, C).astype(jnp.float32)
    bn_shift = jnp.stack(shifts).reshape(3, 1, C).astype(jnp.float32)

    w1c = params["conv"][0][0].reshape(9, 1, C).astype(jnp.float32)   # (kh*3+kw, 1, Cout)
    w2c = params["conv"][1][0].reshape(9, C, C).astype(jnp.float32)   # (kh*3+kw, Cin, Cout)
    w3c = params["conv"][2][0].reshape(9, C, C).astype(jnp.float32)

    const = dict(pipeline_mode=pl.Buffered(1))   # constant-index blocks: single buffer

    conv_kernel = functools.partial(_conv_tower_kernel, H=H, W=W, Wp1=Wp1)
    feats = pl.pallas_call(
        conv_kernel,
        out_shape=jax.ShapeDtypeStruct((B, T3, K), jnp.float32),
        grid_spec=pltpu.PrefetchScalarGridSpec(
            num_scalar_prefetch=0,
            grid=(B,),
            in_specs=[
                pl.BlockSpec((1, Npad1, 1), lambda b: (b, 0, 0)),          # padded input
                pl.BlockSpec((9, 1, C), lambda b: (0, 0, 0), **const),     # conv1 weights
                pl.BlockSpec((9, C, C), lambda b: (0, 0, 0), **const),     # conv2 weights
                pl.BlockSpec((9, C, C), lambda b: (0, 0, 0), **const),     # conv3 weights
                pl.BlockSpec((3, 1, C), lambda b: (0, 0, 0), **const),     # folded BN scale
                pl.BlockSpec((3, 1, C), lambda b: (0, 0, 0), **const),     # folded BN shift
            ],
            out_specs=pl.BlockSpec((1, T3, K), lambda b: (b, 0, 0)),
            scratch_shapes=[
                pltpu.VMEM((Npad1, C), jnp.float32),              # layer-1 broadcast plane
                pltpu.VMEM((H2 * Wp1, C), jnp.float32),           # pooling staging (reused)
                pltpu.VMEM(((H2 + 3) * Wp2, C), jnp.float32),     # layer-2 padded input
                pltpu.VMEM(((H3 + 3) * Wp3, C), jnp.float32),     # layer-3 padded input
            ],
        ),
        compiler_params=pltpu.CompilerParams(
            dimension_semantics=("parallel",),
            # production (64 mels x ~96 frames): ~9 MiB double-buffered input block +
            # ~4 MiB scratches + conv temporaries; 40 MiB leaves headroom on v7x (64 MiB/TC).
            vmem_limit_bytes=40 * 1024 * 1024,
        ),
    )(xp, w1c, w2c, w3c, bn_scale, bn_shift)

    # -------------------- stage 2: fc head batched over the whole batch --------------------
    x2 = feats.reshape(B * T3, K)
    w1f = w1fc.reshape(K, d).astype(fc_weight_dtype)
    w2f = w2fc.astype(fc_weight_dtype)
    b1f = b1fc.reshape(1, d).astype(jnp.float32)
    b2f = b2fc.reshape(1, d).astype(jnp.float32)
    bt = _pick_batch_tile(B, T3)

    fc_kernel = functools.partial(_fc_head_kernel, T3=T3, bt=bt)
    out = pl.pallas_call(
        fc_kernel,
        out_shape=jax.ShapeDtypeStruct((B, d), jnp.float32),
        grid_spec=pltpu.PrefetchScalarGridSpec(
            num_scalar_prefetch=0,
            grid=(B // bt,),
            in_specs=[
                pl.BlockSpec((bt * T3, K), lambda i: (i, 0)),              # features
                pl.BlockSpec((K, d), lambda i: (0, 0), **const),           # fc1 weight
                pl.BlockSpec((1, d), lambda i: (0, 0), **const),           # fc1 bias
                pl.BlockSpec((d, d), lambda i: (0, 0), **const),           # fc2 weight
                pl.BlockSpec((1, d), lambda i: (0, 0), **const),           # fc2 bias
            ],
            out_specs=pl.BlockSpec((bt, d), lambda i: (i, 0)),
        ),
        compiler_params=pltpu.CompilerParams(
            dimension_semantics=("parallel",),
            # at d=3072: bf16 fc2 (18 MiB) + bf16 fc1 (3 MiB), single-buffered, plus
            # activations -> well under v7x's 64 MiB/TC.  TODO(synk): stream fc2 over
            # d-column tiles (memory_space=pl.ANY + emit_pipeline) for even larger d.
            vmem_limit_bytes=48 * 1024 * 1024,
        ),
    )(x2, w1f, b1f, w2f, b2f)
    return out


# ------------------------------------------------------------------------------------------
# Pure-JAX reference (mirrors the PyTorch module in eval mode)
# ------------------------------------------------------------------------------------------
def ref_forward(x_nchw, params):
    hp = lax.Precision.HIGHEST
    h = jnp.transpose(x_nchw, (0, 2, 3, 1))
    for (w, bias, gamma, beta, mean, var) in params["conv"]:
        h = lax.conv_general_dilated(h, w, window_strides=(1, 1),
                                     padding=((1, 1), (1, 1)),
                                     dimension_numbers=("NHWC", "HWIO", "NHWC"),
                                     precision=hp) + bias
        h = gamma * (h - mean) / jnp.sqrt(var + BN_EPS) + beta
        h = jnp.maximum(h, 0.0)
        h = lax.reduce_window(h, -jnp.inf, lax.max, (1, 2, 2, 1), (1, 2, 2, 1), "VALID")
    B, F3, T3, Cc = h.shape
    z = h.transpose(0, 2, 1, 3).reshape(B, T3, F3 * Cc)
    w1, b1, w2, b2 = params["fc"]
    z = jnp.maximum(jnp.matmul(z, w1, precision=hp) + b1, 0.0)
    z = jnp.maximum(jnp.matmul(z, w2, precision=hp) + b2, 0.0)
    return jnp.max(z, axis=1) + jnp.mean(z, axis=1)


# ------------------------------------------------------------------------------------------
def make_params(key, n_mels, d):
    """Deterministic synthetic parameters matching AudioNTT2020(n_mels, d) shapes."""
    conv_params = []
    cin = 1
    for _ in range(3):
        key, k1, k2, k3, k4, k5, k6 = jax.random.split(key, 7)
        w = 0.1 * jax.random.normal(k1, (3, 3, cin, 64), jnp.float32)     # HWIO
        bias = 0.1 * jax.random.normal(k2, (64,), jnp.float32)
        gamma = 1.0 + 0.1 * jax.random.normal(k3, (64,), jnp.float32)
        beta = 0.1 * jax.random.normal(k4, (64,), jnp.float32)
        mean = 0.1 * jax.random.normal(k5, (64,), jnp.float32)
        var = jax.random.uniform(k6, (64,), jnp.float32, 0.5, 1.5)
        conv_params.append((w, bias, gamma, beta, mean, var))
        cin = 64
    in_feat = 64 * (n_mels // 8)
    key, k1, k2, k3, k4 = jax.random.split(key, 5)
    w1 = 0.05 * jax.random.normal(k1, (in_feat, d), jnp.float32)
    b1 = 0.05 * jax.random.normal(k2, (1, d), jnp.float32)
    w2 = 0.05 * jax.random.normal(k3, (d, d), jnp.float32)
    b2 = 0.05 * jax.random.normal(k4, (1, d), jnp.float32)
    return {"conv": conv_params, "fc": (w1, b1, w2, b2)}


if __name__ == "__main__":
    B, n_mels, T, d = 2, 16, 16, 32          # small, 8-divisible spectrogram dims
    key = jax.random.PRNGKey(0)
    key, kx = jax.random.split(key)
    x = jax.random.normal(kx, (B, 1, n_mels, T), jnp.float32)   # PyTorch NCHW input
    params = make_params(key, n_mels, d)

    ref = jax.block_until_ready(ref_forward(x, params))

    # f32 fc weights: tight parity with the f32 PyTorch-equivalent reference
    out_f32 = jax.block_until_ready(
        audio_ntt_forward(x, params, fc_weight_dtype=jnp.float32))
    assert out_f32.shape == (B, d) and out_f32.ndim == 2
    err = float(jnp.max(jnp.abs(out_f32 - ref)))
    assert err < 5e-3, f"f32 mismatch vs reference: max abs err {err}"

    # bf16 fc weights (production / v7x-friendly config): looser tolerance
    out_bf16 = jax.block_until_ready(
        audio_ntt_forward(x, params, fc_weight_dtype=jnp.bfloat16))
    err_bf = float(jnp.max(jnp.abs(out_bf16 - ref)))
    assert err_bf < 3e-2, f"bf16 mismatch vs reference: max abs err {err_bf}"

    print("KERNEL_OK")
</pallas_src>

<mosaic_0001>
module attributes {stable_mosaic.version = 11 : i64} {
  func.func @_conv_tower_kernel(%arg0: i32, %arg1: memref<1x608x1xf32, #tpu.memory_space<vmem>>, %arg2: memref<9x1x64xf32, #tpu.memory_space<vmem>>, %arg3: memref<9x64x64xf32, #tpu.memory_space<vmem>>, %arg4: memref<9x64x64xf32, #tpu.memory_space<vmem>>, %arg5: memref<3x1x64xf32, #tpu.memory_space<vmem>>, %arg6: memref<3x1x64xf32, #tpu.memory_space<vmem>>, %arg7: memref<1x2x128xf32, #tpu.memory_space<vmem>>, %arg8: memref<608x64xf32, #tpu.memory_space<vmem>>, %arg9: memref<256x64xf32, #tpu.memory_space<vmem>>, %arg10: memref<176x64xf32, #tpu.memory_space<vmem>>, %arg11: memref<56x64xf32, #tpu.memory_space<vmem>>) attributes {dimension_semantics = [#tpu.dimension_semantics<parallel>], iteration_bounds = array<i64: 2>, scalar_prefetch = 0 : i64, scratch_operands = 4 : i64, tpu.core_type = #tpu.core_type<tc>, window_params = [{transform_indices = @transform_0, window_bounds = array<i64: 1, 608, 1>}, {pipeline_mode = #tpu.pipeline_mode<synchronous>, transform_indices = @transform_1, window_bounds = array<i64: 9, 1, 64>}, {pipeline_mode = #tpu.pipeline_mode<synchronous>, transform_indices = @transform_2, window_bounds = array<i64: 9, 64, 64>}, {pipeline_mode = #tpu.pipeline_mode<synchronous>, transform_indices = @transform_3, window_bounds = array<i64: 9, 64, 64>}, {pipeline_mode = #tpu.pipeline_mode<synchronous>, transform_indices = @transform_4, window_bounds = array<i64: 3, 1, 64>}, {pipeline_mode = #tpu.pipeline_mode<synchronous>, transform_indices = @transform_5, window_bounds = array<i64: 3, 1, 64>}, {transform_indices = @transform_6, window_bounds = array<i64: 1, 2, 128>}]} {
    %cst = arith.constant 0.000000e+00 : f32
    %0 = vector.broadcast %cst : f32 to vector<1x64xf32>
    %cst_0 = arith.constant 0.000000e+00 : f32
    %1 = vector.broadcast %cst_0 : f32 to vector<17x64xf32>
    %c0 = arith.constant 0 : index
    %c0_1 = arith.constant 0 : index
    %2 = vector.load %arg10[%c0, %c0_1] : memref<176x64xf32, #tpu.memory_space<vmem>>, vector<17x64xf32>
    tpu.vector_store %arg10[%c0, %c0_1], %1 {strides = array<i32>} : memref<176x64xf32, #tpu.memory_space<vmem>>, vector<17x64xf32>,
    %cst_2 = arith.constant 0.000000e+00 : f32
    %3 = vector.broadcast %cst_2 : f32 to vector<31x64xf32>
    %c145 = arith.constant 145 : index
    %c0_3 = arith.constant 0 : index
    %4 = vector.load %arg10[%c145, %c0_3] : memref<176x64xf32, #tpu.memory_space<vmem>>, vector<31x64xf32>
    tpu.vector_store %arg10[%c145, %c0_3], %3 {strides = array<i32>} : memref<176x64xf32, #tpu.memory_space<vmem>>, vector<31x64xf32>,
    %cst_4 = arith.constant 0.000000e+00 : f32
    %5 = vector.broadcast %cst_4 : f32 to vector<9x64xf32>
    %c0_5 = arith.constant 0 : index
    %c0_6 = arith.constant 0 : index
    %6 = vector.load %arg11[%c0_5, %c0_6] : memref<56x64xf32, #tpu.memory_space<vmem>>, vector<9x64xf32>
    tpu.vector_store %arg11[%c0_5, %c0_6], %5 {strides = array<i32>} : memref<56x64xf32, #tpu.memory_space<vmem>>, vector<9x64xf32>,
    %cst_7 = arith.constant 0.000000e+00 : f32
    %7 = vector.broadcast %cst_7 : f32 to vector<15x64xf32>
    %c41 = arith.constant 41 : index
    %c0_8 = arith.constant 0 : index
    %8 = vector.load %arg11[%c41, %c0_8] : memref<56x64xf32, #tpu.memory_space<vmem>>, vector<15x64xf32>
    tpu.vector_store %arg11[%c41, %c0_8], %7 {strides = array<i32>} : memref<56x64xf32, #tpu.memory_space<vmem>>, vector<15x64xf32>,
    %c0_9 = arith.constant 0 : index
    %c0_10 = arith.constant 0 : index
    %c0_11 = arith.constant 0 : index
    %9 = vector.load %arg1[%c0_9, %c0_10, %c0_11] : memref<1x608x1xf32, #tpu.memory_space<vmem>>, vector<1x608x1xf32>
    %10 = vector.shape_cast %9 : vector<1x608x1xf32> to vector<608x1xf32>
    %cst_12 = arith.constant 1.000000e+00 : f32
    %11 = vector.broadcast %cst_12 : f32 to vector<1x64xf32>
    %12 = vector.broadcast %10 : vector<608x1xf32> to vector<608x64xf32>
    %13 = vector.broadcast %11 : vector<1x64xf32> to vector<608x64xf32>
    %14 = arith.mulf %12, %13 : vector<608x64xf32>
    %c0_13 = arith.constant 0 : index
    %c0_14 = arith.constant 0 : index
    %15 = vector.load %arg8[%c0_13, %c0_14] : memref<608x64xf32, #tpu.memory_space<vmem>>, vector<608x64xf32>
    tpu.vector_store %arg8[%c0_13, %c0_14], %14 {strides = array<i32>} : memref<608x64xf32, #tpu.memory_space<vmem>>, vector<608x64xf32>,
    %c0_15 = arith.constant 0 : index
    %c0_16 = arith.constant 0 : index
    %16 = vector.load %arg8[%c0_15, %c0_16] : memref<608x64xf32, #tpu.memory_space<vmem>>, vector<512x64xf32>
    %c0_17 = arith.constant 0 : index
    %c0_18 = arith.constant 0 : index
    %c0_19 = arith.constant 0 : index
    %17 = vector.load %arg2[%c0_17, %c0_18, %c0_19] : memref<9x1x64xf32, #tpu.memory_space<vmem>>, vector<1x1x64xf32>
    %18 = vector.shape_cast %17 : vector<1x1x64xf32> to vector<1x64xf32>
    %19 = vector.broadcast %18 : vector<1x64xf32> to vector<512x64xf32>
    %20 = arith.mulf %16, %19 : vector<512x64xf32>
    %c1 = arith.constant 1 : index
    %c0_20 = arith.constant 0 : index
    %21 = vector.load %arg8[%c1, %c0_20] : memref<608x64xf32, #tpu.memory_space<vmem>>, vector<512x64xf32>
    %c1_21 = arith.constant 1 : index
    %c0_22 = arith.constant 0 : index
    %c0_23 = arith.constant 0 : index
    %22 = vector.load %arg2[%c1_21, %c0_22, %c0_23] : memref<9x1x64xf32, #tpu.memory_space<vmem>>, vector<1x1x64xf32>
    %23 = vector.shape_cast %22 : vector<1x1x64xf32> to vector<1x64xf32>
    %24 = vector.broadcast %23 : vector<1x64xf32> to vector<512x64xf32>
    %25 = arith.mulf %21, %24 : vector<512x64xf32>
    %26 = arith.addf %20, %25 : vector<512x64xf32>
    %c2 = arith.constant 2 : index
    %c0_24 = arith.constant 0 : index
    %27 = vector.load %arg8[%c2, %c0_24] : memref<608x64xf32, #tpu.memory_space<vmem>>, vector<512x64xf32>
    %c2_25 = arith.constant 2 : index
    %c0_26 = arith.constant 0 : index
    %c0_27 = arith.constant 0 : index
    %28 = vector.load %arg2[%c2_25, %c0_26, %c0_27] : memref<9x1x64xf32, #tpu.memory_space<vmem>>, vector<1x1x64xf32>
    %29 = vector.shape_cast %28 : vector<1x1x64xf32> to vector<1x64xf32>
    %30 = vector.broadcast %29 : vector<1x64xf32> to vector<512x64xf32>
    %31 = arith.mulf %27, %30 : vector<512x64xf32>
    %32 = arith.addf %26, %31 : vector<512x64xf32>
    %c32 = arith.constant 32 : index
    %c0_28 = arith.constant 0 : index
    %33 = vector.load %arg8[%c32, %c0_28] : memref<608x64xf32, #tpu.memory_space<vmem>>, vector<512x64xf32>
    %c3 = arith.constant 3 : index
    %c0_29 = arith.constant 0 : index
    %c0_30 = arith.constant 0 : index
    %34 = vector.load %arg2[%c3, %c0_29, %c0_30] : memref<9x1x64xf32, #tpu.memory_space<vmem>>, vector<1x1x64xf32>
    %35 = vector.shape_cast %34 : vector<1x1x64xf32> to vector<1x64xf32>
    %36 = vector.broadcast %35 : vector<1x64xf32> to vector<512x64xf32>
    %37 = arith.mulf %33, %36 : vector<512x64xf32>
    %38 = arith.addf %32, %37 : vector<512x64xf32>
    %c33 = arith.constant 33 : index
    %c0_31 = arith.constant 0 : index
    %39 = vector.load %arg8[%c33, %c0_31] : memref<608x64xf32, #tpu.memory_space<vmem>>, vector<512x64xf32>
    %c4 = arith.constant 4 : index
    %c0_32 = arith.constant 0 : index
    %c0_33 = arith.constant 0 : index
    %40 = vector.load %arg2[%c4, %c0_32, %c0_33] : memref<9x1x64xf32, #tpu.memory_space<vmem>>, vector<1x1x64xf32>
    %41 = vector.shape_cast %40 : vector<1x1x64xf32> to vector<1x64xf32>
    %42 = vector.broadcast %41 : vector<1x64xf32> to vector<512x64xf32>
    %43 = arith.mulf %39, %42 : vector<512x64xf32>
    %44 = arith.addf %38, %43 : vector<512x64xf32>
    %c34 = arith.constant 34 : index
    %c0_34 = arith.constant 0 : index
    %45 = vector.load %arg8[%c34, %c0_34] : memref<608x64xf32, #tpu.memory_space<vmem>>, vector<512x64xf32>
    %c5 = arith.constant 5 : index
    %c0_35 = arith.constant 0 : index
    %c0_36 = arith.constant 0 : index
    %46 = vector.load %arg2[%c5, %c0_35, %c0_36] : memref<9x1x64xf32, #tpu.memory_space<vmem>>, vector<1x1x64xf32>
    %47 = vector.shape_cast %46 : vector<1x1x64xf32> to vector<1x64xf32>
    %48 = vector.broadcast %47 : vector<1x64xf32> to vector<512x64xf32>
    %49 = arith.mulf %45, %48 : vector<512x64xf32>
    %50 = arith.addf %44, %49 : vector<512x64xf32>
    %c64 = arith.constant 64 : index
    %c0_37 = arith.constant 0 : index
    %51 = vector.load %arg8[%c64, %c0_37] : memref<608x64xf32, #tpu.memory_space<vmem>>, vector<512x64xf32>
    %c6 = arith.constant 6 : index
    %c0_38 = arith.constant 0 : index
    %c0_39 = arith.constant 0 : index
    %52 = vector.load %arg2[%c6, %c0_38, %c0_39] : memref<9x1x64xf32, #tpu.memory_space<vmem>>, vector<1x1x64xf32>
    %53 = vector.shape_cast %52 : vector<1x1x64xf32> to vector<1x64xf32>
    %54 = vector.broadcast %53 : vector<1x64xf32> to vector<512x64xf32>
    %55 = arith.mulf %51, %54 : vector<512x64xf32>
    %56 = arith.addf %50, %55 : vector<512x64xf32>
    %c65 = arith.constant 65 : index
    %c0_40 = arith.constant 0 : index
    %57 = vector.load %arg8[%c65, %c0_40] : memref<608x64xf32, #tpu.memory_space<vmem>>, vector<512x64xf32>
    %c7 = arith.constant 7 : index
    %c0_41 = arith.constant 0 : index
    %c0_42 = arith.constant 0 : index
    %58 = vector.load %arg2[%c7, %c0_41, %c0_42] : memref<9x1x64xf32, #tpu.memory_space<vmem>>, vector<1x1x64xf32>
    %59 = vector.shape_cast %58 : vector<1x1x64xf32> to vector<1x64xf32>
    %60 = vector.broadcast %59 : vector<1x64xf32> to vector<512x64xf32>
    %61 = arith.mulf %57, %60 : vector<512x64xf32>
    %62 = arith.addf %56, %61 : vector<512x64xf32>
    %c66 = arith.constant 66 : index
    %c0_43 = arith.constant 0 : index
    %63 = vector.load %arg8[%c66, %c0_43] : memref<608x64xf32, #tpu.memory_space<vmem>>, vector<512x64xf32>
    %c8 = arith.constant 8 : index
    %c0_44 = arith.constant 0 : index
    %c0_45 = arith.constant 0 : index
    %64 = vector.load %arg2[%c8, %c0_44, %c0_45] : memref<9x1x64xf32, #tpu.memory_space<vmem>>, vector<1x1x64xf32>
    %65 = vector.shape_cast %64 : vector<1x1x64xf32> to vector<1x64xf32>
    %66 = vector.broadcast %65 : vector<1x64xf32> to vector<512x64xf32>
    %67 = arith.mulf %63, %66 : vector<512x64xf32>
    %68 = arith.addf %62, %67 : vector<512x64xf32>
    %c0_46 = arith.constant 0 : index
    %c0_47 = arith.constant 0 : index
    %c0_48 = arith.constant 0 : index
    %69 = vector.load %arg5[%c0_46, %c0_47, %c0_48] : memref<3x1x64xf32, #tpu.memory_space<vmem>>, vector<1x1x64xf32>
    %70 = vector.shape_cast %69 : vector<1x1x64xf32> to vector<1x64xf32>
    %71 = vector.broadcast %70 : vector<1x64xf32> to vector<512x64xf32>
    %72 = arith.mulf %68, %71 : vector<512x64xf32>
    %c0_49 = arith.constant 0 : index
    %c0_50 = arith.constant 0 : index
    %c0_51 = arith.constant 0 : index
    %73 = vector.load %arg6[%c0_49, %c0_50, %c0_51] : memref<3x1x64xf32, #tpu.memory_space<vmem>>, vector<1x1x64xf32>
    %74 = vector.shape_cast %73 : vector<1x1x64xf32> to vector<1x64xf32>
    %75 = vector.broadcast %74 : vector<1x64xf32> to vector<512x64xf32>
    %76 = arith.addf %72, %75 : vector<512x64xf32>
    %cst_52 = arith.constant 0.000000e+00 : f32
    %77 = vector.broadcast %cst_52 : f32 to vector<512x64xf32>
    %78 = arith.maximumf %76, %77 : vector<512x64xf32>
    %79 = vector.shape_cast %78 : vector<512x64xf32> to vector<8x64x64xf32>
    %80 = vector.extract_strided_slice %79 {offsets = [0, 0, 0], sizes = [8, 32, 64], strides = [1, 1, 1]} : vector<8x64x64xf32> to vector<8x32x64xf32>
    %81 = vector.extract_strided_slice %79 {offsets = [0, 32, 0], sizes = [8, 32, 64], strides = [1, 1, 1]} : vector<8x64x64xf32> to vector<8x32x64xf32>
    %82 = arith.maximumf %80, %81 : vector<8x32x64xf32>
    %83 = vector.shape_cast %82 : vector<8x32x64xf32> to vector<256x64xf32>
    %c0_53 = arith.constant 0 : index
    %c0_54 = arith.constant 0 : index
    %84 = vector.load %arg9[%c0_53, %c0_54] : memref<256x64xf32, #tpu.memory_space<vmem>>, vector<256x64xf32>
    tpu.vector_store %arg9[%c0_53, %c0_54], %83 {strides = array<i32>} : memref<256x64xf32, #tpu.memory_space<vmem>>, vector<256x64xf32>,
    %c0_55 = arith.constant 0 : index
    %c0_56 = arith.constant 0 : index
    %85 = tpu.strided_load %arg9[%c0_55, %c0_56] {strides = array<i32: 2, 1>} : memref<256x64xf32, #tpu.memory_space<vmem>>, vector<128x64xf32>
    %c1_57 = arith.constant 1 : index
    %c0_58 = arith.constant 0 : index
    %86 = tpu.strided_load %arg9[%c1_57, %c0_58] {strides = array<i32: 2, 1>} : memref<256x64xf32, #tpu.memory_space<vmem>>, vector<128x64xf32>
    %87 = arith.maximumf %85, %86 : vector<128x64xf32>
    %c17 = arith.constant 17 : index
    %c0_59 = arith.constant 0 : index
    %88 = vector.load %arg10[%c17, %c0_59] : memref<176x64xf32, #tpu.memory_space<vmem>>, vector<128x64xf32>
    tpu.vector_store %arg10[%c17, %c0_59], %87 {strides = array<i32>} : memref<176x64xf32, #tpu.memory_space<vmem>>, vector<128x64xf32>,
    %c25 = arith.constant 25 : index
    %c0_60 = arith.constant 0 : index
    %89 = vector.load %arg10[%c25, %c0_60] : memref<176x64xf32, #tpu.memory_space<vmem>>, vector<1x64xf32>
    tpu.vector_store %arg10[%c25, %c0_60], %0 {strides = array<i32>} : memref<176x64xf32, #tpu.memory_space<vmem>>, vector<1x64xf32>,
    %c41_61 = arith.constant 41 : index
    %c0_62 = arith.constant 0 : index
    %90 = vector.load %arg10[%c41_61, %c0_62] : memref<176x64xf32, #tpu.memory_space<vmem>>, vector<1x64xf32>
    tpu.vector_store %arg10[%c41_61, %c0_62], %0 {strides = array<i32>} : memref<176x64xf32, #tpu.memory_space<vmem>>, vector<1x64xf32>,
    %c57 = arith.constant 57 : index
    %c0_63 = arith.constant 0 : index
    %91 = vector.load %arg10[%c57, %c0_63] : memref<176x64xf32, #tpu.memory_space<vmem>>, vector<1x64xf32>
    tpu.vector_store %arg10[%c57, %c0_63], %0 {strides = array<i32>} : memref<176x64xf32, #tpu.memory_space<vmem>>, vector<1x64xf32>,
    %c73 = arith.constant 73 : index
    %c0_64 = arith.constant 0 : index
    %92 = vector.load %arg10[%c73, %c0_64] : memref<176x64xf32, #tpu.memory_space<vmem>>, vector<1x64xf32>
    tpu.vector_store %arg10[%c73, %c0_64], %0 {strides = array<i32>} : memref<176x64xf32, #tpu.memory_space<vmem>>, vector<1x64xf32>,
    %c89 = arith.constant 89 : index
    %c0_65 = arith.constant 0 : index
    %93 = vector.load %arg10[%c89, %c0_65] : memref<176x64xf32, #tpu.memory_space<vmem>>, vector<1x64xf32>
    tpu.vector_store %arg10[%c89, %c0_65], %0 {strides = array<i32>} : memref<176x64xf32, #tpu.memory_space<vmem>>, vector<1x64xf32>,
    %c105 = arith.constant 105 : index
    %c0_66 = arith.constant 0 : index
    %94 = vector.load %arg10[%c105, %c0_66] : memref<176x64xf32, #tpu.memory_space<vmem>>, vector<1x64xf32>
    tpu.vector_store %arg10[%c105, %c0_66], %0 {strides = array<i32>} : memref<176x64xf32, #tpu.memory_space<vmem>>, vector<1x64xf32>,
    %c121 = arith.constant 121 : index
    %c0_67 = arith.constant 0 : index
    %95 = vector.load %arg10[%c121, %c0_67] : memref<176x64xf32, #tpu.memory_space<vmem>>, vector<1x64xf32>
    tpu.vector_store %arg10[%c121, %c0_67], %0 {strides = array<i32>} : memref<176x64xf32, #tpu.memory_space<vmem>>, vector<1x64xf32>,
    %c137 = arith.constant 137 : index
    %c0_68 = arith.constant 0 : index
    %96 = vector.load %arg10[%c137, %c0_68] : memref<176x64xf32, #tpu.memory_space<vmem>>, vector<1x64xf32>
    tpu.vector_store %arg10[%c137, %c0_68], %0 {strides = array<i32>} : memref<176x64xf32, #tpu.memory_space<vmem>>, vector<1x64xf32>,
    %c32_69 = arith.constant 32 : index
    %c0_70 = arith.constant 0 : index
    %97 = vector.load %arg10[%c32_69, %c0_70] : memref<176x64xf32, #tpu.memory_space<vmem>>, vector<1x64xf32>
    tpu.vector_store %arg10[%c32_69, %c0_70], %0 {strides = array<i32>} : memref<176x64xf32, #tpu.memory_space<vmem>>, vector<1x64xf32>,
    %c48 = arith.constant 48 : index
    %c0_71 = arith.constant 0 : index
    %98 = vector.load %arg10[%c48, %c0_71] : memref<176x64xf32, #tpu.memory_space<vmem>>, vector<1x64xf32>
    tpu.vector_store %arg10[%c48, %c0_71], %0 {strides = array<i32>} : memref<176x64xf32, #tpu.memory_space<vmem>>, vector<1x64xf32>,
    %c64_72 = arith.constant 64 : index
    %c0_73 = arith.constant 0 : index
    %99 = vector.load %arg10[%c64_72, %c0_73] : memref<176x64xf32, #tpu.memory_space<vmem>>, vector<1x64xf32>
    tpu.vector_store %arg10[%c64_72, %c0_73], %0 {strides = array<i32>} : memref<176x64xf32, #tpu.memory_space<vmem>>, vector<1x64xf32>,
    %c80 = arith.constant 80 : index
    %c0_74 = arith.constant 0 : index
    %100 = vector.load %arg10[%c80, %c0_74] : memref<176x64xf32, #tpu.memory_space<vmem>>, vector<1x64xf32>
    tpu.vector_store %arg10[%c80, %c0_74], %0 {strides = array<i32>} : memref<176x64xf32, #tpu.memory_space<vmem>>, vector<1x64xf32>,
    %c96 = arith.constant 96 : index
    %c0_75 = arith.constant 0 : index
    %101 = vector.load %arg10[%c96, %c0_75] : memref<176x64xf32, #tpu.memory_space<vmem>>, vector<1x64xf32>
    tpu.vector_store %arg10[%c96, %c0_75], %0 {strides = array<i32>} : memref<176x64xf32, #tpu.memory_space<vmem>>, vector<1x64xf32>,
    %c112 = arith.constant 112 : index
    %c0_76 = arith.constant 0 : index
    %102 = vector.load %arg10[%c112, %c0_76] : memref<176x64xf32, #tpu.memory_space<vmem>>, vector<1x64xf32>
    tpu.vector_store %arg10[%c112, %c0_76], %0 {strides = array<i32>} : memref<176x64xf32, #tpu.memory_space<vmem>>, vector<1x64xf32>,
    %c128 = arith.constant 128 : index
    %c0_77 = arith.constant 0 : index
    %103 = vector.load %arg10[%c128, %c0_77] : memref<176x64xf32, #tpu.memory_space<vmem>>, vector<1x64xf32>
    tpu.vector_store %arg10[%c128, %c0_77], %0 {strides = array<i32>} : memref<176x64xf32, #tpu.memory_space<vmem>>, vector<1x64xf32>,
    %c144 = arith.constant 144 : index
    %c0_78 = arith.constant 0 : index
    %104 = vector.load %arg10[%c144, %c0_78] : memref<176x64xf32, #tpu.memory_space<vmem>>, vector<1x64xf32>
    tpu.vector_store %arg10[%c144, %c0_78], %0 {strides = array<i32>} : memref<176x64xf32, #tpu.memory_space<vmem>>, vector<1x64xf32>,
    %c0_79 = arith.constant 0 : index
    %c0_80 = arith.constant 0 : index
    %105 = vector.load %arg10[%c0_79, %c0_80] : memref<176x64xf32, #tpu.memory_space<vmem>>, vector<128x64xf32>
    %c0_81 = arith.constant 0 : index
    %c0_82 = arith.constant 0 : index
    %c0_83 = arith.constant 0 : index
    %106 = vector.load %arg3[%c0_81, %c0_82, %c0_83] : memref<9x64x64xf32, #tpu.memory_space<vmem>>, vector<1x64x64xf32>
    %107 = vector.shape_cast %106 : vector<1x64x64xf32> to vector<64x64xf32>
    %cst_84 = arith.constant dense<0.000000e+00> : vector<128x64xf32>
    %108 = tpu.matmul %105, %107, %cst_84 {dimension_numbers = #tpu.dot_dimension_numbers<[1], [0], [0], [1], [0, 0, 1, 1], [], []>} : vector<128x64xf32>, vector<64x64xf32>, vector<128x64xf32> -> vector<128x64xf32>
    %c1_85 = arith.constant 1 : index
    %c0_86 = arith.constant 0 : index
    %109 = vector.load %arg10[%c1_85, %c0_86] : memref<176x64xf32, #tpu.memory_space<vmem>>, vector<128x64xf32>
    %c1_87 = arith.constant 1 : index
    %c0_88 = arith.constant 0 : index
    %c0_89 = arith.constant 0 : index
    %110 = vector.load %arg3[%c1_87, %c0_88, %c0_89] : memref<9x64x64xf32, #tpu.memory_space<vmem>>, vector<1x64x64xf32>
    %111 = vector.shape_cast %110 : vector<1x64x64xf32> to vector<64x64xf32>
    %cst_90 = arith.constant dense<0.000000e+00> : vector<128x64xf32>
    %112 = tpu.matmul %109, %111, %cst_90 {dimension_numbers = #tpu.dot_dimension_numbers<[1], [0], [0], [1], [0, 0, 1, 1], [], []>} : vector<128x64xf32>, vector<64x64xf32>, vector<128x64xf32> -> vector<128x64xf32>
    %113 = arith.addf %108, %112 : vector<128x64xf32>
    %c2_91 = arith.constant 2 : index
    %c0_92 = arith.constant 0 : index
    %114 = vector.load %arg10[%c2_91, %c0_92] : memref<176x64xf32, #tpu.memory_space<vmem>>, vector<128x64xf32>
    %c2_93 = arith.constant 2 : index
    %c0_94 = arith.constant 0 : index
    %c0_95 = arith.constant 0 : index
    %115 = vector.load %arg3[%c2_93, %c0_94, %c0_95] : memref<9x64x64xf32, #tpu.memory_space<vmem>>, vector<1x64x64xf32>
    %116 = vector.shape_cast %115 : vector<1x64x64xf32> to vector<64x64xf32>
    %cst_96 = arith.constant dense<0.000000e+00> : vector<128x64xf32>
    %117 = tpu.matmul %114, %116, %cst_96 {dimension_numbers = #tpu.dot_dimension_numbers<[1], [0], [0], [1], [0, 0, 1, 1], [], []>} : vector<128x64xf32>, vector<64x64xf32>, vector<128x64xf32> -> vector<128x64xf32>
    %118 = arith.addf %113, %117 : vector<128x64xf32>
    %c16 = arith.constant 16 : index
    %c0_97 = arith.constant 0 : index
    %119 = vector.load %arg10[%c16, %c0_97] : memref<176x64xf32, #tpu.memory_space<vmem>>, vector<128x64xf32>
    %c3_98 = arith.constant 3 : index
    %c0_99 = arith.constant 0 : index
    %c0_100 = arith.constant 0 : index
    %120 = vector.load %arg3[%c3_98, %c0_99, %c0_100] : memref<9x64x64xf32, #tpu.memory_space<vmem>>, vector<1x64x64xf32>
    %121 = vector.shape_cast %120 : vector<1x64x64xf32> to vector<64x64xf32>
    %cst_101 = arith.constant dense<0.000000e+00> : vector<128x64xf32>
    %122 = tpu.matmul %119, %121, %cst_101 {dimension_numbers = #tpu.dot_dimension_numbers<[1], [0], [0], [1], [0, 0, 1, 1], [], []>} : vector<128x64xf32>, vector<64x64xf32>, vector<128x64xf32> -> vector<128x64xf32>
    %123 = arith.addf %118, %122 : vector<128x64xf32>
    %c17_102 = arith.constant 17 : index
    %c0_103 = arith.constant 0 : index
    %124 = vector.load %arg10[%c17_102, %c0_103] : memref<176x64xf32, #tpu.memory_space<vmem>>, vector<128x64xf32>
    %c4_104 = arith.constant 4 : index
    %c0_105 = arith.constant 0 : index
    %c0_106 = arith.constant 0 : index
    %125 = vector.load %arg3[%c4_104, %c0_105, %c0_106] : memref<9x64x64xf32, #tpu.memory_space<vmem>>, vector<1x64x64xf32>
    %126 = vector.shape_cast %125 : vector<1x64x64xf32> to vector<64x64xf32>
    %cst_107 = arith.constant dense<0.000000e+00> : vector<128x64xf32>
    %127 = tpu.matmul %124, %126, %cst_107 {dimension_numbers = #tpu.dot_dimension_numbers<[1], [0], [0], [1], [0, 0, 1, 1], [], []>} : vector<128x64xf32>, vector<64x64xf32>, vector<128x64xf32> -> vector<128x64xf32>
    %128 = arith.addf %123, %127 : vector<128x64xf32>
    %c18 = arith.constant 18 : index
    %c0_108 = arith.constant 0 : index
    %129 = vector.load %arg10[%c18, %c0_108] : memref<176x64xf32, #tpu.memory_space<vmem>>, vector<128x64xf32>
    %c5_109 = arith.constant 5 : index
    %c0_110 = arith.constant 0 : index
    %c0_111 = arith.constant 0 : index
    %130 = vector.load %arg3[%c5_109, %c0_110, %c0_111] : memref<9x64x64xf32, #tpu.memory_space<vmem>>, vector<1x64x64xf32>
    %131 = vector.shape_cast %130 : vector<1x64x64xf32> to vector<64x64xf32>
    %cst_112 = arith.constant dense<0.000000e+00> : vector<128x64xf32>
    %132 = tpu.matmul %129, %131, %cst_112 {dimension_numbers = #tpu.dot_dimension_numbers<[1], [0], [0], [1], [0, 0, 1, 1], [], []>} : vector<128x64xf32>, vector<64x64xf32>, vector<128x64xf32> -> vector<128x64xf32>
    %133 = arith.addf %128, %132 : vector<128x64xf32>
    %c32_113 = arith.constant 32 : index
    %c0_114 = arith.constant 0 : index
    %134 = vector.load %arg10[%c32_113, %c0_114] : memref<176x64xf32, #tpu.memory_space<vmem>>, vector<128x64xf32>
    %c6_115 = arith.constant 6 : index
    %c0_116 = arith.constant 0 : index
    %c0_117 = arith.constant 0 : index
    %135 = vector.load %arg3[%c6_115, %c0_116, %c0_117] : memref<9x64x64xf32, #tpu.memory_space<vmem>>, vector<1x64x64xf32>
    %136 = vector.shape_cast %135 : vector<1x64x64xf32> to vector<64x64xf32>
    %cst_118 = arith.constant dense<0.000000e+00> : vector<128x64xf32>
    %137 = tpu.matmul %134, %136, %cst_118 {dimension_numbers = #tpu.dot_dimension_numbers<[1], [0], [0], [1], [0, 0, 1, 1], [], []>} : vector<128x64xf32>, vector<64x64xf32>, vector<128x64xf32> -> vector<128x64xf32>
    %138 = arith.addf %133, %137 : vector<128x64xf32>
    %c33_119 = arith.constant 33 : index
    %c0_120 = arith.constant 0 : index
    %139 = vector.load %arg10[%c33_119, %c0_120] : memref<176x64xf32, #tpu.memory_space<vmem>>, vector<128x64xf32>
    %c7_121 = arith.constant 7 : index
    %c0_122 = arith.constant 0 : index
    %c0_123 = arith.constant 0 : index
    %140 = vector.load %arg3[%c7_121, %c0_122, %c0_123] : memref<9x64x64xf32, #tpu.memory_space<vmem>>, vector<1x64x64xf32>
    %141 = vector.shape_cast %140 : vector<1x64x64xf32> to vector<64x64xf32>
    %cst_124 = arith.constant dense<0.000000e+00> : vector<128x64xf32>
    %142 = tpu.matmul %139, %141, %cst_124 {dimension_numbers = #tpu.dot_dimension_numbers<[1], [0], [0], [1], [0, 0, 1, 1], [], []>} : vector<128x64xf32>, vector<64x64xf32>, vector<128x64xf32> -> vector<128x64xf32>
    %143 = arith.addf %138, %142 : vector<128x64xf32>
    %c34_125 = arith.constant 34 : index
    %c0_126 = arith.constant 0 : index
    %144 = vector.load %arg10[%c34_125, %c0_126] : memref<176x64xf32, #tpu.memory_space<vmem>>, vector<128x64xf32>
    %c8_127 = arith.constant 8 : index
    %c0_128 = arith.constant 0 : index
    %c0_129 = arith.constant 0 : index
    %145 = vector.load %arg3[%c8_127, %c0_128, %c0_129] : memref<9x64x64xf32, #tpu.memory_space<vmem>>, vector<1x64x64xf32>
    %146 = vector.shape_cast %145 : vector<1x64x64xf32> to vector<64x64xf32>
    %cst_130 = arith.constant dense<0.000000e+00> : vector<128x64xf32>
    %147 = tpu.matmul %144, %146, %cst_130 {dimension_numbers = #tpu.dot_dimension_numbers<[1], [0], [0], [1], [0, 0, 1, 1], [], []>} : vector<128x64xf32>, vector<64x64xf32>, vector<128x64xf32> -> vector<128x64xf32>
    %148 = arith.addf %143, %147 : vector<128x64xf32>
    %c1_131 = arith.constant 1 : index
    %c0_132 = arith.constant 0 : index
    %c0_133 = arith.constant 0 : index
    %149 = vector.load %arg5[%c1_131, %c0_132, %c0_133] : memref<3x1x64xf32, #tpu.memory_space<vmem>>, vector<1x1x64xf32>
    %150 = vector.shape_cast %149 : vector<1x1x64xf32> to vector<1x64xf32>
    %151 = vector.broadcast %150 : vector<1x64xf32> to vector<128x64xf32>
    %152 = arith.mulf %148, %151 : vector<128x64xf32>
    %c1_134 = arith.constant 1 : index
    %c0_135 = arith.constant 0 : index
    %c0_136 = arith.constant 0 : index
    %153 = vector.load %arg6[%c1_134, %c0_135, %c0_136] : memref<3x1x64xf32, #tpu.memory_space<vmem>>, vector<1x1x64xf32>
    %154 = vector.shape_cast %153 : vector<1x1x64xf32> to vector<1x64xf32>
    %155 = vector.broadcast %154 : vector<1x64xf32> to vector<128x64xf32>
    %156 = arith.addf %152, %155 : vector<128x64xf32>
    %cst_137 = arith.constant 0.000000e+00 : f32
    %157 = vector.broadcast %cst_137 : f32 to vector<128x64xf32>
    %158 = arith.maximumf %156, %157 : vector<128x64xf32>
    %159 = vector.shape_cast %158 : vector<128x64xf32> to vector<4x32x64xf32>
    %160 = vector.extract_strided_slice %159 {offsets = [0, 0, 0], sizes = [4, 16, 64], strides = [1, 1, 1]} : vector<4x32x64xf32> to vector<4x16x64xf32>
    %161 = vector.extract_strided_slice %159 {offsets = [0, 16, 0], sizes = [4, 16, 64], strides = [1, 1, 1]} : vector<4x32x64xf32> to vector<4x16x64xf32>
    %162 = arith.maximumf %160, %161 : vector<4x16x64xf32>
    %163 = vector.shape_cast %162 : vector<4x16x64xf32> to vector<64x64xf32>
    %c0_138 = arith.constant 0 : index
    %c0_139 = arith.constant 0 : index
    %164 = vector.load %arg9[%c0_138, %c0_139] : memref<256x64xf32, #tpu.memory_space<vmem>>, vector<64x64xf32>
    tpu.vector_store %arg9[%c0_138, %c0_139], %163 {strides = array<i32>} : memref<256x64xf32, #tpu.memory_space<vmem>>, vector<64x64xf32>,
    %c0_140 = arith.constant 0 : index
    %c0_141 = arith.constant 0 : index
    %165 = tpu.strided_load %arg9[%c0_140, %c0_141] {strides = array<i32: 2, 1>} : memref<256x64xf32, #tpu.memory_space<vmem>>, vector<32x64xf32>
    %c1_142 = arith.constant 1 : index
    %c0_143 = arith.constant 0 : index
    %166 = tpu.strided_load %arg9[%c1_142, %c0_143] {strides = array<i32: 2, 1>} : memref<256x64xf32, #tpu.memory_space<vmem>>, vector<32x64xf32>
    %167 = arith.maximumf %165, %166 : vector<32x64xf32>
    %c9 = arith.constant 9 : index
    %c0_144 = arith.constant 0 : index
    %168 = vector.load %arg11[%c9, %c0_144] : memref<56x64xf32, #tpu.memory_space<vmem>>, vector<32x64xf32>
    tpu.vector_store %arg11[%c9, %c0_144], %167 {strides = array<i32>} : memref<56x64xf32, #tpu.memory_space<vmem>>, vector<32x64xf32>,
    %c13 = arith.constant 13 : index
    %c0_145 = arith.constant 0 : index
    %169 = vector.load %arg11[%c13, %c0_145] : memref<56x64xf32, #tpu.memory_space<vmem>>, vector<1x64xf32>
    tpu.vector_store %arg11[%c13, %c0_145], %0 {strides = array<i32>} : memref<56x64xf32, #tpu.memory_space<vmem>>, vector<1x64xf32>,
    %c21 = arith.constant 21 : index
    %c0_146 = arith.constant 0 : index
    %170 = vector.load %arg11[%c21, %c0_146] : memref<56x64xf32, #tpu.memory_space<vmem>>, vector<1x64xf32>
    tpu.vector_store %arg11[%c21, %c0_146], %0 {strides = array<i32>} : memref<56x64xf32, #tpu.memory_space<vmem>>, vector<1x64xf32>,
    %c29 = arith.constant 29 : index
    %c0_147 = arith.constant 0 : index
    %171 = vector.load %arg11[%c29, %c0_147] : memref<56x64xf32, #tpu.memory_space<vmem>>, vector<1x64xf32>
    tpu.vector_store %arg11[%c29, %c0_147], %0 {strides = array<i32>} : memref<56x64xf32, #tpu.memory_space<vmem>>, vector<1x64xf32>,
    %c37 = arith.constant 37 : index
    %c0_148 = arith.constant 0 : index
    %172 = vector.load %arg11[%c37, %c0_148] : memref<56x64xf32, #tpu.memory_space<vmem>>, vector<1x64xf32>
    tpu.vector_store %arg11[%c37, %c0_148], %0 {strides = array<i32>} : memref<56x64xf32, #tpu.memory_space<vmem>>, vector<1x64xf32>,
    %c16_149 = arith.constant 16 : index
    %c0_150 = arith.constant 0 : index
    %173 = vector.load %arg11[%c16_149, %c0_150] : memref<56x64xf32, #tpu.memory_space<vmem>>, vector<1x64xf32>
    tpu.vector_store %arg11[%c16_149, %c0_150], %0 {strides = array<i32>} : memref<56x64xf32, #tpu.memory_space<vmem>>, vector<1x64xf32>,
    %c24 = arith.constant 24 : index
    %c0_151 = arith.constant 0 : index
    %174 = vector.load %arg11[%c24, %c0_151] : memref<56x64xf32, #tpu.memory_space<vmem>>, vector<1x64xf32>
    tpu.vector_store %arg11[%c24, %c0_151], %0 {strides = array<i32>} : memref<56x64xf32, #tpu.memory_space<vmem>>, vector<1x64xf32>,
    %c32_152 = arith.constant 32 : index
    %c0_153 = arith.constant 0 : index
    %175 = vector.load %arg11[%c32_152, %c0_153] : memref<56x64xf32, #tpu.memory_space<vmem>>, vector<1x64xf32>
    tpu.vector_store %arg11[%c32_152, %c0_153], %0 {strides = array<i32>} : memref<56x64xf32, #tpu.memory_space<vmem>>, vector<1x64xf32>,
    %c40 = arith.constant 40 : index
    %c0_154 = arith.constant 0 : index
    %176 = vector.load %arg11[%c40, %c0_154] : memref<56x64xf32, #tpu.memory_space<vmem>>, vector<1x64xf32>
    tpu.vector_store %arg11[%c40, %c0_154], %0 {strides = array<i32>} : memref<56x64xf32, #tpu.memory_space<vmem>>, vector<1x64xf32>,
    %c0_155 = arith.constant 0 : index
    %c0_156 = arith.constant 0 : index
    %177 = vector.load %arg11[%c0_155, %c0_156] : memref<56x64xf32, #tpu.memory_space<vmem>>, vector<32x64xf32>
    %c0_157 = arith.constant 0 : index
    %c0_158 = arith.constant 0 : index
    %c0_159 = arith.constant 0 : index
    %178 = vector.load %arg4[%c0_157, %c0_158, %c0_159] : memref<9x64x64xf32, #tpu.memory_space<vmem>>, vector<1x64x64xf32>
    %179 = vector.shape_cast %178 : vector<1x64x64xf32> to vector<64x64xf32>
    %cst_160 = arith.constant dense<0.000000e+00> : vector<32x64xf32>
    %180 = tpu.matmul %177, %179, %cst_160 {dimension_numbers = #tpu.dot_dimension_numbers<[1], [0], [0], [1], [0, 0, 1, 1], [], []>} : vector<32x64xf32>, vector<64x64xf32>, vector<32x64xf32> -> vector<32x64xf32>
    %c1_161 = arith.constant 1 : index
    %c0_162 = arith.constant 0 : index
    %181 = vector.load %arg11[%c1_161, %c0_162] : memref<56x64xf32, #tpu.memory_space<vmem>>, vector<32x64xf32>
    %c1_163 = arith.constant 1 : index
    %c0_164 = arith.constant 0 : index
    %c0_165 = arith.constant 0 : index
    %182 = vector.load %arg4[%c1_163, %c0_164, %c0_165] : memref<9x64x64xf32, #tpu.memory_space<vmem>>, vector<1x64x64xf32>
    %183 = vector.shape_cast %182 : vector<1x64x64xf32> to vector<64x64xf32>
    %cst_166 = arith.constant dense<0.000000e+00> : vector<32x64xf32>
    %184 = tpu.matmul %181, %183, %cst_166 {dimension_numbers = #tpu.dot_dimension_numbers<[1], [0], [0], [1], [0, 0, 1, 1], [], []>} : vector<32x64xf32>, vector<64x64xf32>, vector<32x64xf32> -> vector<32x64xf32>
    %185 = arith.addf %180, %184 : vector<32x64xf32>
    %c2_167 = arith.constant 2 : index
    %c0_168 = arith.constant 0 : index
    %186 = vector.load %arg11[%c2_167, %c0_168] : memref<56x64xf32, #tpu.memory_space<vmem>>, vector<32x64xf32>
    %c2_169 = arith.constant 2 : index
    %c0_170 = arith.constant 0 : index
    %c0_171 = arith.constant 0 : index
    %187 = vector.load %arg4[%c2_169, %c0_170, %c0_171] : memref<9x64x64xf32, #tpu.memory_space<vmem>>, vector<1x64x64xf32>
    %188 = vector.shape_cast %187 : vector<1x64x64xf32> to vector<64x64xf32>
    %cst_172 = arith.constant dense<0.000000e+00> : vector<32x64xf32>
    %189 = tpu.matmul %186, %188, %cst_172 {dimension_numbers = #tpu.dot_dimension_numbers<[1], [0], [0], [1], [0, 0, 1, 1], [], []>} : vector<32x64xf32>, vector<64x64xf32>, vector<32x64xf32> -> vector<32x64xf32>
    %190 = arith.addf %185, %189 : vector<32x64xf32>
    %c8_173 = arith.constant 8 : index
    %c0_174 = arith.constant 0 : index
    %191 = vector.load %arg11[%c8_173, %c0_174] : memref<56x64xf32, #tpu.memory_space<vmem>>, vector<32x64xf32>
    %c3_175 = arith.constant 3 : index
    %c0_176 = arith.constant 0 : index
    %c0_177 = arith.constant 0 : index
    %192 = vector.load %arg4[%c3_175, %c0_176, %c0_177] : memref<9x64x64xf32, #tpu.memory_space<vmem>>, vector<1x64x64xf32>
    %193 = vector.shape_cast %192 : vector<1x64x64xf32> to vector<64x64xf32>
    %cst_178 = arith.constant dense<0.000000e+00> : vector<32x64xf32>
    %194 = tpu.matmul %191, %193, %cst_178 {dimension_numbers = #tpu.dot_dimension_numbers<[1], [0], [0], [1], [0, 0, 1, 1], [], []>} : vector<32x64xf32>, vector<64x64xf32>, vector<32x64xf32> -> vector<32x64xf32>
    %195 = arith.addf %190, %194 : vector<32x64xf32>
    %c9_179 = arith.constant 9 : index
    %c0_180 = arith.constant 0 : index
    %196 = vector.load %arg11[%c9_179, %c0_180] : memref<56x64xf32, #tpu.memory_space<vmem>>, vector<32x64xf32>
    %c4_181 = arith.constant 4 : index
    %c0_182 = arith.constant 0 : index
    %c0_183 = arith.constant 0 : index
    %197 = vector.load %arg4[%c4_181, %c0_182, %c0_183] : memref<9x64x64xf32, #tpu.memory_space<vmem>>, vector<1x64x64xf32>
    %198 = vector.shape_cast %197 : vector<1x64x64xf32> to vector<64x64xf32>
    %cst_184 = arith.constant dense<0.000000e+00> : vector<32x64xf32>
    %199 = tpu.matmul %196, %198, %cst_184 {dimension_numbers = #tpu.dot_dimension_numbers<[1], [0], [0], [1], [0, 0, 1, 1], [], []>} : vector<32x64xf32>, vector<64x64xf32>, vector<32x64xf32> -> vector<32x64xf32>
    %200 = arith.addf %195, %199 : vector<32x64xf32>
    %c10 = arith.constant 10 : index
    %c0_185 = arith.constant 0 : index
    %201 = vector.load %arg11[%c10, %c0_185] : memref<56x64xf32, #tpu.memory_space<vmem>>, vector<32x64xf32>
    %c5_186 = arith.constant 5 : index
    %c0_187 = arith.constant 0 : index
    %c0_188 = arith.constant 0 : index
    %202 = vector.load %arg4[%c5_186, %c0_187, %c0_188] : memref<9x64x64xf32, #tpu.memory_space<vmem>>, vector<1x64x64xf32>
    %203 = vector.shape_cast %202 : vector<1x64x64xf32> to vector<64x64xf32>
    %cst_189 = arith.constant dense<0.000000e+00> : vector<32x64xf32>
    %204 = tpu.matmul %201, %203, %cst_189 {dimension_numbers = #tpu.dot_dimension_numbers<[1], [0], [0], [1], [0, 0, 1, 1], [], []>} : vector<32x64xf32>, vector<64x64xf32>, vector<32x64xf32> -> vector<32x64xf32>
    %205 = arith.addf %200, %204 : vector<32x64xf32>
    %c16_190 = arith.constant 16 : index
    %c0_191 = arith.constant 0 : index
    %206 = vector.load %arg11[%c16_190, %c0_191] : memref<56x64xf32, #tpu.memory_space<vmem>>, vector<32x64xf32>
    %c6_192 = arith.constant 6 : index
    %c0_193 = arith.constant 0 : index
    %c0_194 = arith.constant 0 : index
    %207 = vector.load %arg4[%c6_192, %c0_193, %c0_194] : memref<9x64x64xf32, #tpu.memory_space<vmem>>, vector<1x64x64xf32>
    %208 = vector.shape_cast %207 : vector<1x64x64xf32> to vector<64x64xf32>
    %cst_195 = arith.constant dense<0.000000e+00> : vector<32x64xf32>
    %209 = tpu.matmul %206, %208, %cst_195 {dimension_numbers = #tpu.dot_dimension_numbers<[1], [0], [0], [1], [0, 0, 1, 1], [], []>} : vector<32x64xf32>, vector<64x64xf32>, vector<32x64xf32> -> vector<32x64xf32>
    %210 = arith.addf %205, %209 : vector<32x64xf32>
    %c17_196 = arith.constant 17 : index
    %c0_197 = arith.constant 0 : index
    %211 = vector.load %arg11[%c17_196, %c0_197] : memref<56x64xf32, #tpu.memory_space<vmem>>, vector<32x64xf32>
    %c7_198 = arith.constant 7 : index
    %c0_199 = arith.constant 0 : index
    %c0_200 = arith.constant 0 : index
    %212 = vector.load %arg4[%c7_198, %c0_199, %c0_200] : memref<9x64x64xf32, #tpu.memory_space<vmem>>, vector<1x64x64xf32>
    %213 = vector.shape_cast %212 : vector<1x64x64xf32> to vector<64x64xf32>
    %cst_201 = arith.constant dense<0.000000e+00> : vector<32x64xf32>
    %214 = tpu.matmul %211, %213, %cst_201 {dimension_numbers = #tpu.dot_dimension_numbers<[1], [0], [0], [1], [0, 0, 1, 1], [], []>} : vector<32x64xf32>, vector<64x64xf32>, vector<32x64xf32> -> vector<32x64xf32>
    %215 = arith.addf %210, %214 : vector<32x64xf32>
    %c18_202 = arith.constant 18 : index
    %c0_203 = arith.constant 0 : index
    %216 = vector.load %arg11[%c18_202, %c0_203] : memref<56x64xf32, #tpu.memory_space<vmem>>, vector<32x64xf32>
    %c8_204 = arith.constant 8 : index
    %c0_205 = arith.constant 0 : index
    %c0_206 = arith.constant 0 : index
    %217 = vector.load %arg4[%c8_204, %c0_205, %c0_206] : memref<9x64x64xf32, #tpu.memory_space<vmem>>, vector<1x64x64xf32>
    %218 = vector.shape_cast %217 : vector<1x64x64xf32> to vector<64x64xf32>
    %cst_207 = arith.constant dense<0.000000e+00> : vector<32x64xf32>
    %219 = tpu.matmul %216, %218, %cst_207 {dimension_numbers = #tpu.dot_dimension_numbers<[1], [0], [0], [1], [0, 0, 1, 1], [], []>} : vector<32x64xf32>, vector<64x64xf32>, vector<32x64xf32> -> vector<32x64xf32>
    %220 = arith.addf %215, %219 : vector<32x64xf32>
    %c2_208 = arith.constant 2 : index
    %c0_209 = arith.constant 0 : index
    %c0_210 = arith.constant 0 : index
    %221 = vector.load %arg5[%c2_208, %c0_209, %c0_210] : memref<3x1x64xf32, #tpu.memory_space<vmem>>, vector<1x1x64xf32>
    %222 = vector.shape_cast %221 : vector<1x1x64xf32> to vector<1x64xf32>
    %223 = vector.broadcast %222 : vector<1x64xf32> to vector<32x64xf32>
    %224 = arith.mulf %220, %223 : vector<32x64xf32>
    %c2_211 = arith.constant 2 : index
    %c0_212 = arith.constant 0 : index
    %c0_213 = arith.constant 0 : index
    %225 = vector.load %arg6[%c2_211, %c0_212, %c0_213] : memref<3x1x64xf32, #tpu.memory_space<vmem>>, vector<1x1x64xf32>
    %226 = vector.shape_cast %225 : vector<1x1x64xf32> to vector<1x64xf32>
    %227 = vector.broadcast %226 : vector<1x64xf32> to vector<32x64xf32>
    %228 = arith.addf %224, %227 : vector<32x64xf32>
    %cst_214 = arith.constant 0.000000e+00 : f32
    %229 = vector.broadcast %cst_214 : f32 to vector<32x64xf32>
    %230 = arith.maximumf %228, %229 : vector<32x64xf32>
    %231 = vector.shape_cast %230 : vector<32x64xf32> to vector<2x16x64xf32>
    %232 = vector.extract_strided_slice %231 {offsets = [0, 0, 0], sizes = [2, 8, 64], strides = [1, 1, 1]} : vector<2x16x64xf32> to vector<2x8x64xf32>
    %233 = vector.extract_strided_slice %231 {offsets = [0, 8, 0], sizes = [2, 8, 64], strides = [1, 1, 1]} : vector<2x16x64xf32> to vector<2x8x64xf32>
    %234 = arith.maximumf %232, %233 : vector<2x8x64xf32>
    %235 = vector.shape_cast %234 : vector<2x8x64xf32> to vector<16x64xf32>
    %c0_215 = arith.constant 0 : index
    %c0_216 = arith.constant 0 : index
    %236 = vector.load %arg9[%c0_215, %c0_216] : memref<256x64xf32, #tpu.memory_space<vmem>>, vector<16x64xf32>
    tpu.vector_store %arg9[%c0_215, %c0_216], %235 {strides = array<i32>} : memref<256x64xf32, #tpu.memory_space<vmem>>, vector<16x64xf32>,
    %c0_217 = arith.constant 0 : index
    %c0_218 = arith.constant 0 : index
    %237 = tpu.strided_load %arg9[%c0_217, %c0_218] {strides = array<i32: 2, 1>} : memref<256x64xf32, #tpu.memory_space<vmem>>, vector<8x64xf32>
    %c1_219 = arith.constant 1 : index
    %c0_220 = arith.constant 0 : index
    %238 = tpu.strided_load %arg9[%c1_219, %c0_220] {strides = array<i32: 2, 1>} : memref<256x64xf32, #tpu.memory_space<vmem>>, vector<8x64xf32>
    %239 = arith.maximumf %237, %238 : vector<8x64xf32>
    %240 = vector.extract_strided_slice %239 {offsets = [0, 0], sizes = [2, 64], strides = [1, 1]} : vector<8x64xf32> to vector<2x64xf32>
    %241 = vector.extract_strided_slice %239 {offsets = [4, 0], sizes = [2, 64], strides = [1, 1]} : vector<8x64xf32> to vector<2x64xf32>
    %242 = tpu.concatenate %240, %241 in 1 : vector<2x64xf32>, vector<2x64xf32> -> vector<2x128xf32>
    %c0_221 = arith.constant 0 : index
    %c0_222 = arith.constant 0 : index
    %c0_223 = arith.constant 0 : index
    %243 = vector.load %arg7[%c0_221, %c0_222, %c0_223] : memref<1x2x128xf32, #tpu.memory_space<vmem>>, vector<1x2x128xf32>
    %244 = vector.shape_cast %243 : vector<1x2x128xf32> to vector<2x128xf32>
    %245 = vector.shape_cast %242 : vector<2x128xf32> to vector<1x2x128xf32>
    tpu.vector_store %arg7[%c0_221, %c0_222, %c0_223], %245 {strides = array<i32>} : memref<1x2x128xf32, #tpu.memory_space<vmem>>, vector<1x2x128xf32>,
    return
  }
  func.func @transform_0(%arg0: i32) -> (i32, i32, i32) {
    %c0_i32 = arith.constant 0 : i32
    %c0_i32_0 = arith.constant 0 : i32
    %c0_i32_1 = arith.constant 0 : i32
    return %arg0, %c0_i32, %c0_i32_0 : i32, i32, i32
  }
  func.func @transform_1(%arg0: i32) -> (i32, i32, i32) {
    %c0_i32 = arith.constant 0 : i32
    %c0_i32_0 = arith.constant 0 : i32
    %c0_i32_1 = arith.constant 0 : i32
    %c0_i32_2 = arith.constant 0 : i32
    return %c0_i32, %c0_i32_0, %c0_i32_1 : i32, i32, i32
  }
  func.func @transform_2(%arg0: i32) -> (i32, i32, i32) {
    %c0_i32 = arith.constant 0 : i32
    %c0_i32_0 = arith.constant 0 : i32
    %c0_i32_1 = arith.constant 0 : i32
    %c0_i32_2 = arith.constant 0 : i32
    return %c0_i32, %c0_i32_0, %c0_i32_1 : i32, i32, i32
  }
  func.func @transform_3(%arg0: i32) -> (i32, i32, i32) {
    %c0_i32 = arith.constant 0 : i32
    %c0_i32_0 = arith.constant 0 : i32
    %c0_i32_1 = arith.constant 0 : i32
    %c0_i32_2 = arith.constant 0 : i32
    return %c0_i32, %c0_i32_0, %c0_i32_1 : i32, i32, i32
  }
  func.func @transform_4(%arg0: i32) -> (i32, i32, i32) {
    %c0_i32 = arith.constant 0 : i32
    %c0_i32_0 = arith.constant 0 : i32
    %c0_i32_1 = arith.constant 0 : i32
    %c0_i32_2 = arith.constant 0 : i32
    return %c0_i32, %c0_i32_0, %c0_i32_1 : i32, i32, i32
  }
  func.func @transform_5(%arg0: i32) -> (i32, i32, i32) {
    %c0_i32 = arith.constant 0 : i32
    %c0_i32_0 = arith.constant 0 : i32
    %c0_i32_1 = arith.constant 0 : i32
    %c0_i32_2 = arith.constant 0 : i32
    return %c0_i32, %c0_i32_0, %c0_i32_1 : i32, i32, i32
  }
  func.func @transform_6(%arg0: i32) -> (i32, i32, i32) {
    %c0_i32 = arith.constant 0 : i32
    %c0_i32_0 = arith.constant 0 : i32
    %c0_i32_1 = arith.constant 0 : i32
    return %arg0, %c0_i32, %c0_i32_0 : i32, i32, i32
  }
}

</mosaic_0001>

<bundles_post_ra>
// kernel: tpu_custom_call.1
= control target key start
LH: loop header
LB: loop body
LE: loop exit
PB: predicated region body
PF: predicated region fallthrough
CT: control target
= control target key end

     0   :  { %11 = vsyncpa [#allocation7], 0  ;;  %s10536_s0 = inlined_call_operand.vmem [shape: f32[2,608,1], index: 0, kind: input, shape index: {}]   ;;  %s10537_s1 = inlined_call_operand.vmem [shape: f32[9,1,64], index: 1, kind: input, shape index: {}]   ;;  %s10538_s2 = inlined_call_operand.vmem [shape: f32[9,64,64], index: 2, kind: input, shape index: {}]   ;;  %s10539_s3 = inlined_call_operand.vmem [shape: f32[9,64,64], index: 3, kind: input, shape index: {}]   ;;  %s10540_s4 = inlined_call_operand.vmem [shape: f32[3,1,64], index: 4, kind: input, shape index: {}]   ;;  %s10541_s5 = inlined_call_operand.vmem [shape: f32[3,1,64], index: 5, kind: input, shape index: {}]   ;;  %s10542_s6 = inlined_call_operand.hbm [shape: f32[2,2,128], index: 6, kind: output, shape index: {}]  }
   0x1   :  { %13 = vsyncpa [#allocation7 + $0x1], 0  ;;  %s7733_s21 = smov 0   ;;  %s7735_s22 = smov 0  }
   0x2   :  { %s7737_s23 = smov 0   ;;  %s7739_s24 = smov 0  }
   0x3 LB: > { %s7754_s25 = sadd.s32 4294967295, %s7692_s24   ;;  %s5861_s26 = sadd.s32 4294967294, %s7692_s24   ;;  %s7692_s24 = sphi %s7739_s24, %s10551_s24   ;;  %s7688_s23 = sphi %s7737_s23, %s10550_s23   ;;  %s7684_s22 = sphi %s7735_s22, %s10549_s22   ;;  %s7680_s21 = sphi %s7733_s21, %s10548_s21  }
   0x4   : > { %s7758_s27 = sadd.s32 1, %s7692_s24   ;;  %s157_s28 = sadd.s32 1, %s7688_s23 }
   0x5   : > { %s154_s29 = ssub.s32 %s7692_s24, %s7758_s27  ;;  %p167_p0 = scmp.ne.s32.totalorder %s7688_s23, %s7684_s22 }
   0x6   : > { %p155_p1 = scmp.eq.s32.totalorder %s154_s29, 0  ;;  %p168_p2 = scmp.eq.s32.totalorder %s7754_s25, 1 }
   0x7   : > { %p173_p3 = scmp.ne.s32.totalorder %s7684_s22, %s7680_s21  ;;  %p174_p4 = scmp.eq.s32.totalorder %s5861_s26, 1 }
   0x8   : > { %s7769_s30 = scalar_select %p155_p1, %s7688_s23, %s157_s28  }
   0x9   : > { %p7771_p5 = por %p168_p2, %p167_p0  ;;  %p7775_p6 = por %p174_p4, %p173_p3 }
   0xa   : > { %p5864_p7 = scmp.ge.s32.totalorder %s7692_s24, 1  ;;  %p215_p8 = scmp.lt.s32.totalorder %s7692_s24, 3 }
   0xc   : > { %p216_p9 = pnand %p5864_p7, %p215_p8 }
   0xd   : > { %p245_p10 = scmp.lt.s32.totalorder (!%p216_p9), %s7754_s25, 1  ;;  %v7694_v0 = vmov (!%p216_p9), 0   ;;  %v5886_v55 = vld [vmem:[%s10538_s2 + $0x40] sm:$0xff] (!%p216_p9)  ;;  %v5887_v56 = vld [vmem:[%s10538_s2 + $0x48] sm:$0xff] (!%p216_p9)  ;;  %vm250_vm0 = vcmask (!%p216_p9), 523264   ;;  %vm253_vm1 = vcmask (!%p216_p9), 516096  }
   0xe   : > { %219 = sbr.rel (%p216_p9) target bundleno = 1404 (0x57c), region = 44  ;;  %7596 = vset.pattern.permute.xlu1 (!%p216_p9), %v7694_v0  ;;  %7595 = vset.pattern.permute.xlu0 (!%p216_p9), %v7694_v0  ;;  %v7088_v57 = vpack.c.bf16 (!%p216_p9), %v5887_v56, %v5886_v55  ;;  %v5926_v58 = vld [vmem:[%s10538_s2 + $0x80] sm:$0xff] (!%p216_p9)  ;;  %v5927_v59 = vld [vmem:[%s10538_s2 + $0x88] sm:$0xff] (!%p216_p9)  ;;  %vm258_vm2 = vcmask (!%p216_p9), 522240   ;;  %s242_s11 = sand.u32 (!%p216_p9), 1, %s7684_s22  }
   0xf   : > { %v7856_v62 = vpack.c.bf16 (!%p216_p9), %v5927_v59, %v5926_v58  ;;  %s5865_s12 = sshll.u32 (!%p216_p9), %s242_s11, 1  ;;  %s6203_s14 = sshll.u32 (!%p216_p9), %s7754_s25, 5 }
  0x10   : > { %7089 = vmatprep.subr.bf16.mxu1 (!%p216_p9), %v7088_v57  ;;  %s244_s15 = scalar_lea.vmem (!%p216_p9), [#allocation6], %s5865_s12  ;;  %s10493_s18 = scalar_lea.hbm (!%p216_p9), %s10542_s6, %s6203_s14 }
  0x11   : > { %7091 = vmatpush3.bf16.msra.mxu1 (!%p216_p9), %v7088_v57  ;;  %7121 = vmatprep.subr.bf16.mxu0 (!%p216_p9), %v7856_v62  ;;  %s5789_s19 = scalar_lea.sflag (!%p216_p9), [#allocation7], %s242_s11 }
  0x12   : > { %7123 = vmatpush3.bf16.msra.mxu0 (!%p216_p9), %v7856_v62 }
  0x15   : > { %s246_s9 = scalar_select %p245_p10, %s7754_s25, 1 }
  0x16   : > { %s7697_s25 = smov [#allocation6]  }
  0x17   : > { %s7552_s10 = smul.u32 608, %s246_s9  ;;  %s7634_s26 = sshll.u32 %s7697_s25, 4  ;;  %s7635_s26 = int_to_ptr.vmem [resolvable:$false] %s7634_s26 }
  0x18   : > { %s7636_s28 = scalar_lea.vmem %s7635_s26, 64 }
  0x19   : > { %s7786_s13 = scalar_lea.vmem %s10536_s0, %s7552_s10  ;;  %s7696_s10 = smov 64  }
  0x1a   : > { %v266_v1 = vld [vmem:[%s7786_s13 + $0x10] sm:$0xff]  ;;  %v264_v2 = vld [vmem:[%s7786_s13] sm:$0xff]  ;;  %v265_v4 = vld [vmem:[%s7786_s13 + $0x8] sm:$0xff] }
  0x1b   : > { %352 = vperm.xlu1 %7596, %v266_v1   ;;  %342 = vperm.xlu0 %7595, %v264_v2   ;;  %v268_v3 = vld [vmem:[%s7786_s13 + $0x20] sm:$0xff]  ;;  %v270_v5 = vld [vmem:[%s7786_s13 + $0x30] sm:$0xff]  ;;  %v269_v6 = vld [vmem:[%s7786_s13 + $0x28] sm:$0xff] }
  0x1c   : > { %v271_v7 = vld [vmem:[%s7786_s13 + $0x38] sm:$0xff]  ;;  %v273_v9 = vld [vmem:[%s7786_s13 + $0x48] sm:$0xff]  ;;  %v272_v10 = vld [vmem:[%s7786_s13 + $0x40] sm:$0xff] }
  0x1d   : > { %v267_v8 = vld [vmem:[%s7786_s13 + $0x18] sm:$0xff]  ;;  %v276_v11 = vld [vmem:[%s7786_s13 + $0x60] sm:$0xff]  ;;  %v274_v12 = vld [vmem:[%s7786_s13 + $0x50] sm:$0xff] }
  0x1e   : > { %v278_v13 = vld [vmem:[%s7786_s13 + $0x70] sm:$0xff]  ;;  %v277_v14 = vld [vmem:[%s7786_s13 + $0x68] sm:$0xff]  ;;  %v279_v15 = vld [vmem:[%s7786_s13 + $0x78] sm:$0xff] }
  0x1f   : > { %362 = vperm.xlu1 %7596, %v268_v3   ;;  %347 = vperm.xlu0 %7595, %v265_v4   ;;  %v275_v16 = vld [vmem:[%s7786_s13 + $0x58] sm:$0xff]  ;;  %v281_v17 = vld [vmem:[%s7786_s13 + $0x88] sm:$0xff]  ;;  %v280_v18 = vld [vmem:[%s7786_s13 + $0x80] sm:$0xff] }
  0x20   : > { %v284_v19 = vld [vmem:[%s7786_s13 + $0xa0] sm:$0xff]  ;;  %v282_v20 = vld [vmem:[%s7786_s13 + $0x90] sm:$0xff]  ;;  %v285_v22 = vld [vmem:[%s7786_s13 + $0xa8] sm:$0xff] }
  0x21   : > { %v286_v21 = vld [vmem:[%s7786_s13 + $0xb0] sm:$0xff]  ;;  %v287_v23 = vld [vmem:[%s7786_s13 + $0xb8] sm:$0xff]  ;;  %v289_v25 = vld [vmem:[%s7786_s13 + $0xc8] sm:$0xff] }
  0x22   : > { %v283_v24 = vld [vmem:[%s7786_s13 + $0x98] sm:$0xff]  ;;  %v288_v26 = vld [vmem:[%s7786_s13 + $0xc0] sm:$0xff]  ;;  %v290_v28 = vld [vmem:[%s7786_s13 + $0xd0] sm:$0xff] }
  0x23   : > { %372 = vperm.xlu1 %7596, %v270_v5   ;;  %367 = vperm.xlu0 %7595, %v269_v6   ;;  %v292_v27 = vld [vmem:[%s7786_s13 + $0xe0] sm:$0xff]  ;;  %v294_v29 = vld [vmem:[%s7786_s13 + $0xf0] sm:$0xff]  ;;  %v293_v30 = vld [vmem:[%s7786_s13 + $0xe8] sm:$0xff] }
  0x24   : > { %v296_v31 = vld [vmem:[%s7786_s13 + $0x100] sm:$0xff]  ;;  %v291_v32 = vld [vmem:[%s7786_s13 + $0xd8] sm:$0xff]  ;;  %v298_v33 = vld [vmem:[%s7786_s13 + $0x110] sm:$0xff] }
  0x25   : > { %v297_v34 = vld [vmem:[%s7786_s13 + $0x108] sm:$0xff]  ;;  %v300_v35 = vld [vmem:[%s7786_s13 + $0x120] sm:$0xff]  ;;  %v295_v36 = vld [vmem:[%s7786_s13 + $0xf8] sm:$0xff] }
  0x26   : > { %v302_v37 = vld [vmem:[%s7786_s13 + $0x130] sm:$0xff]  ;;  %v301_v38 = vld [vmem:[%s7786_s13 + $0x128] sm:$0xff]  ;;  %v303_v39 = vld [vmem:[%s7786_s13 + $0x138] sm:$0xff] }
  0x27   : > { %377 = vperm.xlu1 %7596, %v271_v7   ;;  %357 = vperm.xlu0 %7595, %v267_v8   ;;  %v299_v40 = vld [vmem:[%s7786_s13 + $0x118] sm:$0xff]  ;;  %v305_v41 = vld [vmem:[%s7786_s13 + $0x148] sm:$0xff]  ;;  %v304_v42 = vld [vmem:[%s7786_s13 + $0x140] sm:$0xff] }
  0x28   : > { %v307_v43 = vld [vmem:[%s7786_s13 + $0x158] sm:$0xff]  ;;  %v306_v44 = vld [vmem:[%s7786_s13 + $0x150] sm:$0xff]  ;;  %v309_v45 = vld [vmem:[%s7786_s13 + $0x168] sm:$0xff] }
  0x29   : > { %v308_v46 = vld [vmem:[%s7786_s13 + $0x160] sm:$0xff]  ;;  %v311_v47 = vld [vmem:[%s7786_s13 + $0x178] sm:$0xff]  ;;  %v310_v48 = vld [vmem:[%s7786_s13 + $0x170] sm:$0xff] }
  0x2a   : > { %v313_v49 = vld [vmem:[%s7786_s13 + $0x188] sm:$0xff]  ;;  %v312_v50 = vld [vmem:[%s7786_s13 + $0x180] sm:$0xff]  ;;  %v315_v51 = vld [vmem:[%s7786_s13 + $0x198] sm:$0xff] }
  0x2b   : > { %387 = vperm.xlu1 %7596, %v273_v9   ;;  %382 = vperm.xlu0 %7595, %v272_v10   ;;  %v314_v52 = vld [vmem:[%s7786_s13 + $0x190] sm:$0xff]  ;;  %v317_v53 = vld [vmem:[%s7786_s13 + $0x1a8] sm:$0xff]  ;;  %v316_v54 = vld [vmem:[%s7786_s13 + $0x1a0] sm:$0xff] }
  0x2c   : > { %v319_v60 = vld [vmem:[%s7786_s13 + $0x1b8] sm:$0xff]  ;;  %v318_v61 = vld [vmem:[%s7786_s13 + $0x1b0] sm:$0xff]  ;;  %v321_v63 = vld [vmem:[%s7786_s13 + $0x1c8] sm:$0xff] }
  0x2d   : > { %v320_v0 = vld [vmem:[%s7786_s13 + $0x1c0] sm:$0xff]  ;;  %v5888_v1 = vld [vmem:[%s10538_s2 + $0x50] sm:$0xff]  ;;  %v5889_v2 = vld [vmem:[%s10538_s2 + $0x58] sm:$0xff] }
  0x2e   : > { %v7092_v3 = vpack.c.bf16 %v5889_v2, %v5888_v1  ;;  %v5928_v4 = vld [vmem:[%s10538_s2 + $0x90] sm:$0xff]  ;;  %v5929_v5 = vld [vmem:[%s10538_s2 + $0x98] sm:$0xff]  ;;  %v325_v9 = vld [vmem:[%s7786_s13 + $0x1e8] sm:$0xff] }
  0x2f   : > { %402 = vperm.xlu1 %7596, %v276_v11   ;;  %392 = vperm.xlu0 %7595, %v274_v12   ;;  %v7874_v6 = vpack.c.bf16 %v5929_v5, %v5928_v4  ;;  %v323_v7 = vld [vmem:[%s7786_s13 + $0x1d8] sm:$0xff]  ;;  %v322_v8 = vld [vmem:[%s7786_s13 + $0x1d0] sm:$0xff]  ;;  %v324_v10 = vld [vmem:[%s7786_s13 + $0x1e0] sm:$0xff] }
  0x30   : > { %7093 = vmatprep.subr.bf16.mxu1 %v7092_v3  ;;  %v327_v11 = vld [vmem:[%s7786_s13 + $0x1f8] sm:$0xff]  ;;  %v5890_v12 = vld [vmem:[%s10538_s2 + $0x60] sm:$0xff]  ;;  %v337_v57 = vld [vmem:[%s7786_s13 + $0x248] sm:$0xff] }
  0x31   : > { %7095 = vmatpush3.bf16.msra.mxu1 %v7092_v3  ;;  %7125 = vmatprep.subr.bf16.mxu0 %v7874_v6  ;;  %v7982_v3 = vld [vmem:[%s10537_s1 + $0x4] ss:$0 sm:$0xff] }
  0x32   : > { %7127 = vmatpush3.bf16.msra.mxu0 %v7874_v6 }
  0x33   : > { %412 = vperm.xlu1 %7596, %v278_v13   ;;  %407 = vperm.xlu0 %7595, %v277_v14   ;;  %v5891_v13 = vld [vmem:[%s10538_s2 + $0x68] sm:$0xff]  ;;  %v326_v14 = vld [vmem:[%s7786_s13 + $0x1f0] sm:$0xff] }
  0x37   : > { %417 = vperm.xlu1 %7596, %v279_v15   ;;  %397 = vperm.xlu0 %7595, %v275_v16   ;;  %v7096_v15 = vpack.c.bf16 %v5891_v13, %v5890_v12  ;;  %v5930_v16 = vld [vmem:[%s10538_s2 + $0xa0] sm:$0xff] }
  0x39   : > { %7097 = vmatprep.subr.bf16.mxu1 %v7096_v15 }
  0x3a   : > { %7099 = vmatpush3.bf16.msra.mxu1 %v7096_v15 }
  0x3b   : > { %427 = vperm.xlu1 %7596, %v281_v17   ;;  %422 = vperm.xlu0 %7595, %v280_v18   ;;  %v5931_v17 = vld [vmem:[%s10538_s2 + $0xa8] sm:$0xff] }
  0x3c   : > { %v7896_v18 = vpack.c.bf16 %v5931_v17, %v5930_v16 }
  0x3e   : > { %7129 = vmatprep.subr.bf16.mxu0 %v7896_v18 }
  0x3f   : > { %442 = vperm.xlu1 %7596, %v284_v19   ;;  %432 = vperm.xlu0 %7595, %v282_v20   ;;  %v329_v19 = vld [vmem:[%s7786_s13 + $0x208] sm:$0xff]  ;;  %v328_v20 = vld [vmem:[%s7786_s13 + $0x200] sm:$0xff] }
  0x40   : > { %7131 = vmatpush3.bf16.msra.mxu0 %v7896_v18 }
  0x43   : > { %452 = vperm.xlu1 %7596, %v286_v21   ;;  %447 = vperm.xlu0 %7595, %v285_v22  }
  0x47   : > { %457 = vperm.xlu1 %7596, %v287_v23   ;;  %437 = vperm.xlu0 %7595, %v283_v24   ;;  %v331_v23 = vld [vmem:[%s7786_s13 + $0x218] sm:$0xff]  ;;  %v330_v24 = vld [vmem:[%s7786_s13 + $0x210] sm:$0xff] }
  0x4b   : > { %467 = vperm.xlu1 %7596, %v289_v25   ;;  %462 = vperm.xlu0 %7595, %v288_v26   ;;  %v5892_v25 = vld [vmem:[%s10538_s2 + $0x70] sm:$0xff]  ;;  %v5893_v26 = vld [vmem:[%s10538_s2 + $0x78] sm:$0xff] }
  0x4f   : > { %482 = vperm.xlu1 %7596, %v292_v27   ;;  %472 = vperm.xlu0 %7595, %v290_v28  }
  0x53   : > { %492 = vperm.xlu1 %7596, %v294_v29   ;;  %487 = vperm.xlu0 %7595, %v293_v30   ;;  %v7100_v29 = vpack.c.bf16 %v5893_v26, %v5892_v25  ;;  %v5932_v30 = vld [vmem:[%s10538_s2 + $0xb0] sm:$0xff] }
  0x54   : > { %v338_v26 = vld [vmem:[%s7786_s13 + $0x250] sm:$0xff] }
  0x55   : > { %7101 = vmatprep.subr.bf16.mxu1 %v7100_v29 }
  0x56   : > { %7103 = vmatpush3.bf16.msra.mxu1 %v7100_v29 }
  0x57   : > { %502 = vperm.xlu1 %7596, %v296_v31   ;;  %477 = vperm.xlu0 %7595, %v291_v32   ;;  %v5933_v31 = vld [vmem:[%s10538_s2 + $0xb8] sm:$0xff] }
  0x58   : > { %v7920_v32 = vpack.c.bf16 %v5933_v31, %v5932_v30 }
  0x5a   : > { %7133 = vmatprep.subr.bf16.mxu0 %v7920_v32 }
  0x5b   : > { %512 = vperm.xlu1 %7596, %v298_v33   ;;  %507 = vperm.xlu0 %7595, %v297_v34   ;;  %v333_v33 = vld [vmem:[%s7786_s13 + $0x228] sm:$0xff]  ;;  %v332_v34 = vld [vmem:[%s7786_s13 + $0x220] sm:$0xff] }
  0x5c   : > { %7135 = vmatpush3.bf16.msra.mxu0 %v7920_v32 }
  0x5f   : > { %522 = vperm.xlu1 %7596, %v300_v35   ;;  %497 = vperm.xlu0 %7595, %v295_v36   ;;  %v10543_v35 = vmov 0.0  }
  0x60   : > { %251 = vst.msk [vmem:[#allocation4] sm:$0xff] %vm250_vm0, %v10543_v35  ;;  %252 = vst.msk [vmem:[#allocation4 + $0x8] sm:$0xff] %vm250_vm0, %v10543_v35 }
  0x61   : > { %255 = vst.msk [vmem:[#allocation4 + $0x91] sm:$0xff] %vm250_vm0, %v10543_v35  ;;  %256 = vst.msk [vmem:[#allocation4 + $0x99] sm:$0xff] %vm250_vm0, %v10543_v35 }
  0x62   : > { %257 = vst.msk [vmem:[#allocation4 + $0xa1] sm:$0xff] %vm250_vm0, %v10543_v35  ;;  %260 = vst.msk [vmem:[#allocation5] sm:$0xff] %vm250_vm0, %v10543_v35 }
  0x63   : > { %532 = vperm.xlu1 %7596, %v302_v37   ;;  %527 = vperm.xlu0 %7595, %v301_v38   ;;  %262 = vst.msk [vmem:[#allocation5 + $0x29] sm:$0xff] %vm250_vm0, %v10543_v35  ;;  %v7947_v38 = vld [vmem:[%s10537_s1] ss:$0 sm:$0xff] }
  0x64   : > { %254 = vst.msk [vmem:[#allocation4 + $0x10] sm:$0x1] %vm253_vm1, %v10543_v35  ;;  %261 = vst.msk [vmem:[#allocation5 + $0x8] sm:$0x1] %vm253_vm1, %v10543_v35 }
  0x67   : > { %537 = vperm.xlu1 %7596, %v303_v39   ;;  %517 = vperm.xlu0 %7595, %v299_v40   ;;  %v7954_v40 = vld [vmem:[%s10537_s1 + $0x1] ss:$0 sm:$0xff] }
  0x68   : > { %v2576_v58 = vld [vmem:[#allocation4 + $0x1] sm:$0xff] }
  0x69   : > { %6546 = vmatprep.mubr.msk.f32.mxu1 %vm250_vm0, %v2576_v58 }
  0x6b   : > { %547 = vperm.xlu1 %7596, %v305_v41   ;;  %542 = vperm.xlu0 %7595, %v304_v42   ;;  %v335_v41 = vld [vmem:[%s7786_s13 + $0x238] sm:$0xff]  ;;  %v334_v42 = vld [vmem:[%s7786_s13 + $0x230] sm:$0xff] }
  0x6f   : > { %557 = vperm.xlu1 %7596, %v307_v43   ;;  %552 = vperm.xlu0 %7595, %v306_v44   ;;  %v7961_v43 = vld [vmem:[%s10537_s1 + $0x3] ss:$0 sm:$0xff]  ;;  %v7966_v44 = vld [vmem:[%s10537_s1 + $0x2] ss:$0 sm:$0xff] }
  0x73   : > { %567 = vperm.xlu1 %7596, %v309_v45   ;;  %562 = vperm.xlu0 %7595, %v308_v46  }
  0x77   : > { %577 = vperm.xlu1 %7596, %v311_v47   ;;  %572 = vperm.xlu0 %7595, %v310_v48  }
  0x7b   : > { %587 = vperm.xlu1 %7596, %v313_v49   ;;  %582 = vperm.xlu0 %7595, %v312_v50  }
  0x7f   : > { %597 = vperm.xlu1 %7596, %v315_v51   ;;  %592 = vperm.xlu0 %7595, %v314_v52  }
  0x83   : > { %607 = vperm.xlu1 %7596, %v317_v53   ;;  %602 = vperm.xlu0 %7595, %v316_v54  }
  0x87   : > { %617 = vperm.xlu1 %7596, %v319_v60   ;;  %612 = vperm.xlu0 %7595, %v318_v61   ;;  %v336_v61 = vld [vmem:[%s7786_s13 + $0x240] sm:$0xff] }
  0x8b   : > { %627 = vperm.xlu1 %7596, %v321_v63   ;;  %622 = vperm.xlu0 %7595, %v320_v0   ;;  %v2577_v63 = vld [vmem:[#allocation4 + $0x9] sm:$0xff] }
  0x8c   : > { %v2987_v0 = vld [vmem:[#allocation4 + $0x2] sm:$0xff]  ;;  %6547 = vmatmul.mubr.msk.f32.vlgmr.msra.gmra.mrb[0].mxu1 %vm250_vm0, %v2577_v63 }
  0x8d   : > { %6626 = vmatprep.mubr.msk.f32.mxu0 %vm250_vm0, %v2987_v0 }
  0x8f   : > { %637 = vperm.xlu1 %7596, %v323_v7   ;;  %632 = vperm.xlu0 %7595, %v322_v8  }
  0x93   : > { %647 = vperm.xlu1 %7596, %v325_v9   ;;  %642 = vperm.xlu0 %7595, %v324_v10  }
  0x97   : > { %657 = vperm.xlu1 %7596, %v327_v11   ;;  %652 = vperm.xlu0 %7595, %v326_v14  }
  0x9a   : > { %v353_v21 = vpop.permute.xlu1 %352  ;;  %v343_v22 = vpop.permute.xlu0 %342 }
  0x9b   : > { %722 = vst.msk [vmem:[#allocation2 + $0x10] sm:$0xff] %vm250_vm0, %v353_v21  ;;  %720 = vst.msk [vmem:[#allocation2] sm:$0xff] %vm250_vm0, %v343_v22  ;;  %667 = vperm.xlu1 %7596, %v329_v19   ;;  %662 = vperm.xlu0 %7595, %v328_v20   ;;  %v339_v20 = vld [vmem:[%s7786_s13 + $0x258] sm:$0xff]  ;;  %s5802_s13 = sshll.u32 %s244_s15, 4  ;;  %s10495_s13 = int_to_ptr.vmem [resolvable:$true] %s5802_s13 }
  0x9c   : > { %s7630_s20 = scalar_lea.vmem %s10495_s13, 32  ;;  %p7637_p0 = scmp.lt.s32.totalorder %s10495_s13, %s7635_s26 }
  0x9d   : > { %p7631_p11 = scmp.ne.s32.totalorder %s10495_s13, %s7630_s20  ;;  %p7638_p1 = scmp.lt.s32.totalorder %s7636_s28, %s7630_s20 }
  0x9e   : > { %v363_v27 = vpop.permute.xlu1 %362  ;;  %v348_v28 = vpop.permute.xlu0 %347 }
  0x9f   : > { %724 = vst.msk [vmem:[#allocation2 + $0x20] sm:$0xff] %vm250_vm0, %v363_v27  ;;  %721 = vst.msk [vmem:[#allocation2 + $0x8] sm:$0xff] %vm250_vm0, %v348_v28  ;;  %677 = vperm.xlu1 %7596, %v331_v23   ;;  %672 = vperm.xlu0 %7595, %v330_v24   ;;  %v8000_v27 = vld [vmem:[%s10537_s1 + $0x5] ss:$0 sm:$0xff]  ;;  %p7632_p12 = pnand %p7631_p11, %p7771_p5  ;;  %p7639_p2 = por %p7638_p1, %p7637_p0 }
  0xa1   : > { %p7633_p13 = pneg %p7632_p12 }
  0xa2   : > { %v373_v36 = vpop.permute.xlu1 %372  ;;  %v368_v37 = vpop.permute.xlu0 %367  ;;  %v796_v39 = vld [vmem:[#allocation2] sm:$0xff]  ;;  %v798_v13 = vld [vmem:[#allocation2 + $0x10] sm:$0xff] }
  0xa3   : > { %726 = vst.msk [vmem:[#allocation2 + $0x30] sm:$0xff] %vm250_vm0, %v373_v36  ;;  %725 = vst.msk [vmem:[#allocation2 + $0x28] sm:$0xff] %vm250_vm0, %v368_v37  ;;  %687 = vperm.xlu1 %7596, %v333_v33   ;;  %682 = vperm.xlu0 %7595, %v332_v34   ;;  %v867_v49 = vmul.f32 %v7947_v38, %v796_v39  ;;  %v869_v36 = vmul.f32 %v7947_v38, %v798_v13  ;;  %p7640_p3 = pnand %p7639_p2, %p7633_p13 }
  0xa6   : > { %v797_v45 = vld [vmem:[#allocation2 + $0x8] sm:$0xff]  ;;  %v378_v47 = vpop.permute.xlu1 %377  ;;  %v358_v48 = vpop.permute.xlu0 %357  ;;  %v800_v55 = vld [vmem:[#allocation2 + $0x20] sm:$0xff] }
  0xa7   : > { %v931_v46 = vld [vmem:[#allocation2 + $0x1] sm:$0xff]  ;;  %v868_v50 = vmul.f32 %v7947_v38, %v797_v45  ;;  %v932_v51 = vld [vmem:[#allocation2 + $0x9] sm:$0xff]  ;;  %727 = vst.msk [vmem:[#allocation2 + $0x38] sm:$0xff] %vm250_vm0, %v378_v47  ;;  %723 = vst.msk [vmem:[#allocation2 + $0x18] sm:$0xff] %vm250_vm0, %v358_v48  ;;  %697 = vperm.xlu1 %7596, %v335_v41   ;;  %692 = vperm.xlu0 %7595, %v334_v42   ;;  %v1343_v9 = vmul.f32 %v7961_v43, %v800_v55 }
  0xa8   : > { %v1003_v52 = vmul.f32 %v7954_v40, %v931_v46  ;;  %v1131_v53 = vld [vmem:[#allocation2 + $0x2] sm:$0xff]  ;;  %v1132_v54 = vld [vmem:[#allocation2 + $0xa] sm:$0xff]  ;;  %v1004_v56 = vmul.f32 %v7954_v40, %v932_v51  ;;  %v871_v14 = vmul.f32 %v7947_v38, %v800_v55 }
  0xa9   : > { %v1203_v60 = vmul.f32 %v7966_v44, %v1131_v53  ;;  %v1204_v2 = vmul.f32 %v7966_v44, %v1132_v54 }
  0xaa   : > { %v1067_v59 = vadd.f32 %v1003_v52, %v867_v49  ;;  %v1068_v1 = vadd.f32 %v1004_v56, %v868_v50  ;;  %v801_v4 = vld [vmem:[#allocation2 + $0x28] sm:$0xff]  ;;  %v388_v7 = vpop.permute.xlu1 %387  ;;  %v383_v8 = vpop.permute.xlu0 %382  ;;  %v802_v16 = vld [vmem:[#allocation2 + $0x30] sm:$0xff] }
  0xab   : > { %v935_v5 = vld [vmem:[#allocation2 + $0x21] sm:$0xff]  ;;  %v872_v11 = vmul.f32 %v7947_v38, %v801_v4  ;;  %v936_v12 = vld [vmem:[#allocation2 + $0x29] sm:$0xff]  ;;  %729 = vst.msk [vmem:[#allocation2 + $0x48] sm:$0xff] %vm250_vm0, %v388_v7  ;;  %728 = vst.msk [vmem:[#allocation2 + $0x40] sm:$0xff] %vm250_vm0, %v383_v8  ;;  %707 = vperm.xlu1 %7596, %v337_v57   ;;  %702 = vperm.xlu0 %7595, %v336_v61   ;;  %v1344_v24 = vmul.f32 %v7961_v43, %v801_v4 }
  0xac   : > { %v1267_v10 = vadd.f32 %v1203_v60, %v1067_v59  ;;  %v1268_v15 = vadd.f32 %v1204_v2, %v1068_v1  ;;  %v1007_v17 = vmul.f32 %v7954_v40, %v935_v5  ;;  %v1008_v19 = vmul.f32 %v7954_v40, %v936_v12  ;;  %v1135_v22 = vld [vmem:[#allocation2 + $0x22] sm:$0xff]  ;;  %v1136_v23 = vld [vmem:[#allocation2 + $0x2a] sm:$0xff] }
  0xad   : > { %v1483_v25 = vmul.f32 %v7982_v3, %v935_v5  ;;  %v873_v37 = vmul.f32 %v7947_v38, %v802_v16  ;;  %v1345_v46 = vmul.f32 %v7961_v43, %v802_v16  ;;  %v1207_v47 = vmul.f32 %v7966_v44, %v1135_v22 }
  0xae   : > { %v1407_v21 = vadd.f32 %v1343_v9, %v1267_v10  ;;  %v1071_v28 = vadd.f32 %v1007_v17, %v871_v14  ;;  %v1072_v29 = vadd.f32 %v1008_v19, %v872_v11  ;;  %v803_v30 = vld [vmem:[#allocation2 + $0x38] sm:$0xff]  ;;  %v403_v33 = vpop.permute.xlu1 %402  ;;  %v393_v34 = vpop.permute.xlu0 %392  ;;  %v1408_v39 = vadd.f32 %v1344_v24, %v1268_v15  ;;  %v8025_v15 = vld [vmem:[%s10537_s1 + $0x6] ss:$0 sm:$0xff] }
  0xaf   : > { %v937_v31 = vld [vmem:[#allocation2 + $0x31] sm:$0xff]  ;;  %732 = vst.msk [vmem:[#allocation2 + $0x60] sm:$0xff] %vm250_vm0, %v403_v33  ;;  %730 = vst.msk [vmem:[#allocation2 + $0x50] sm:$0xff] %vm250_vm0, %v393_v34  ;;  %717 = vperm.xlu1 %7596, %v339_v20   ;;  %v1208_v48 = vmul.f32 %v7966_v44, %v1136_v23  ;;  %v934_v51 = vld [vmem:[#allocation2 + $0x19] sm:$0xff]  ;;  %712 = vperm.xlu0 %7595, %v338_v26   ;;  %v1484_v52 = vmul.f32 %v7982_v3, %v936_v12 }
  0xb0   : > { %v1547_v41 = vadd.f32 %v1483_v25, %v1407_v21  ;;  %v799_v42 = vld [vmem:[#allocation2 + $0x18] sm:$0xff]  ;;  %v1009_v49 = vmul.f32 %v7954_v40, %v937_v31  ;;  %v1623_v53 = vmul.f32 %v8000_v27, %v1135_v22  ;;  %v1624_v54 = vmul.f32 %v8000_v27, %v1136_v23 }
  0xb1   : > { %v933_v45 = vld [vmem:[#allocation2 + $0x11] sm:$0xff]  ;;  %v874_v55 = vmul.f32 %v7947_v38, %v803_v30  ;;  %v1271_v57 = vadd.f32 %v1207_v47, %v1071_v28  ;;  %v1272_v58 = vadd.f32 %v1208_v48, %v1072_v29  ;;  %v870_v59 = vmul.f32 %v7947_v38, %v799_v42  ;;  %v1134_v61 = vld [vmem:[#allocation2 + $0x1a] sm:$0xff] }
  0xb2   : > { %v1137_v50 = vld [vmem:[#allocation2 + $0x32] sm:$0xff]  ;;  %v1005_v60 = vmul.f32 %v7954_v40, %v933_v45  ;;  %v804_v63 = vld [vmem:[#allocation2 + $0x40] sm:$0xff]  ;;  %v413_v1 = vpop.permute.xlu1 %412  ;;  %v408_v2 = vpop.permute.xlu0 %407  ;;  %v1548_v4 = vadd.f32 %v1484_v52, %v1408_v39  ;;  %v1687_v5 = vadd.f32 %v1623_v53, %v1547_v41  ;;  %v1006_v8 = vmul.f32 %v7954_v40, %v934_v51  ;;  %v805_v9 = vld [vmem:[#allocation2 + $0x48] sm:$0xff] }
  0xb3   : > { %v1133_v56 = vld [vmem:[#allocation2 + $0x12] sm:$0xff]  ;;  %v1209_v7 = vmul.f32 %v7966_v44, %v1137_v50  ;;  %v939_v10 = vld [vmem:[#allocation2 + $0x41] sm:$0xff]  ;;  %734 = vst.msk [vmem:[#allocation2 + $0x70] sm:$0xff] %vm250_vm0, %v413_v1  ;;  %733 = vst.msk [vmem:[#allocation2 + $0x68] sm:$0xff] %vm250_vm0, %v408_v2  ;;  %v1073_v11 = vadd.f32 %v1009_v49, %v873_v37  ;;  %v1346_v12 = vmul.f32 %v7961_v43, %v803_v30 }
  0xb4   : > { %v938_v0 = vld [vmem:[#allocation2 + $0x39] sm:$0xff]  ;;  %v1069_v13 = vadd.f32 %v1005_v60, %v869_v36  ;;  %v1205_v14 = vmul.f32 %v7966_v44, %v1133_v56  ;;  %v1070_v16 = vadd.f32 %v1006_v8, %v870_v59  ;;  %v1206_v17 = vmul.f32 %v7966_v44, %v1134_v61  ;;  %v1139_v36 = vld [vmem:[#allocation2 + $0x42] sm:$0xff] }
  0xb5   : > { %v875_v19 = vmul.f32 %v7947_v38, %v804_v63  ;;  %v1010_v20 = vmul.f32 %v7954_v40, %v938_v0  ;;  %v1485_v21 = vmul.f32 %v7982_v3, %v937_v31  ;;  %v1348_v23 = vmul.f32 %v7961_v43, %v805_v9  ;;  %v1138_v34 = vld [vmem:[#allocation2 + $0x3a] sm:$0xff]  ;;  %v8052_v56 = vld [vmem:[%s10537_s1 + $0x8] ss:$0 sm:$0xff] }
  0xb6   : > { %v1269_v22 = vadd.f32 %v1205_v14, %v1069_v13  ;;  %v1011_v24 = vmul.f32 %v7954_v40, %v939_v10  ;;  %v418_v25 = vpop.permute.xlu1 %417  ;;  %v398_v26 = vpop.permute.xlu0 %397  ;;  %v1688_v28 = vadd.f32 %v1624_v54, %v1548_v4  ;;  %v1625_v29 = vmul.f32 %v8000_v27, %v1137_v50  ;;  %v8045_v50 = vld [vmem:[%s10537_s1 + $0x7] ss:$0 sm:$0xff] }
  0xb7   : > { %v1270_v30 = vadd.f32 %v1206_v17, %v1070_v16  ;;  %v1764_v33 = vmul.f32 %v8025_v15, %v805_v9  ;;  %735 = vst.msk [vmem:[#allocation2 + $0x78] sm:$0xff] %vm250_vm0, %v418_v25  ;;  %731 = vst.msk [vmem:[#allocation2 + $0x58] sm:$0xff] %vm250_vm0, %v398_v26  ;;  %v1074_v37 = vadd.f32 %v1010_v20, %v874_v55  ;;  %v808_v61 = vld [vmem:[#allocation2 + $0x60] sm:$0xff]  ;;  %v1140_v17 = vld [vmem:[#allocation2 + $0x4a] sm:$0xff] }
  0xb8   : > { %v1409_v31 = vadd.f32 %v1345_v46, %v1269_v22  ;;  %v1075_v39 = vadd.f32 %v1011_v24, %v875_v19  ;;  %v1347_v41 = vmul.f32 %v7961_v43, %v804_v63  ;;  %v8038_v42 = vadd.f32 %v1209_v7, %v1073_v11 }
  0xb9   : > { %v876_v45 = vmul.f32 %v7947_v38, %v805_v9  ;;  %v1410_v47 = vadd.f32 %v1346_v12, %v1270_v30  ;;  %v1486_v48 = vmul.f32 %v7982_v3, %v938_v0  ;;  %v1412_v49 = vadd.f32 %v1348_v23, %v1272_v58  ;;  %v940_v0 = vld [vmem:[#allocation2 + $0x49] sm:$0xff] }
  0xba   : > { %v1210_v51 = vmul.f32 %v7966_v44, %v1138_v34  ;;  %v1211_v46 = vmul.f32 %v7966_v44, %v1139_v36  ;;  %v1411_v52 = vadd.f32 %v1347_v41, %v1271_v57  ;;  %v428_v53 = vpop.permute.xlu1 %427  ;;  %v423_v54 = vpop.permute.xlu0 %422  ;;  %v1828_v55 = vadd.f32 %v1764_v33, %v1688_v28  ;;  %v806_v12 = vld [vmem:[#allocation2 + $0x50] sm:$0xff] }
  0xbb   : > { %v1487_v58 = vmul.f32 %v7982_v3, %v939_v10  ;;  %v1550_v59 = vadd.f32 %v1486_v48, %v1410_v47  ;;  %v1763_v60 = vmul.f32 %v8025_v15, %v804_v63  ;;  %737 = vst.msk [vmem:[#allocation2 + $0x88] sm:$0xff] %vm250_vm0, %v428_v53  ;;  %736 = vst.msk [vmem:[#allocation2 + $0x80] sm:$0xff] %vm250_vm0, %v423_v54 }
  0xbc   : > { %v1549_v57 = vadd.f32 %v1485_v21, %v1409_v31  ;;  %v8058_v1 = vadd.f32 %v1210_v51, %v1074_v37  ;;  %v1275_v2 = vadd.f32 %v1211_v46, %v1075_v39  ;;  %v1626_v4 = vmul.f32 %v8000_v27, %v1138_v34  ;;  %v809_v31 = vld [vmem:[#allocation2 + $0x68] sm:$0xff] }
  0xbd   : > { %v1551_v7 = vadd.f32 %v1487_v58, %v1411_v52  ;;  %v1627_v8 = vmul.f32 %v8000_v27, %v1139_v36  ;;  %v1827_v9 = vadd.f32 %v1763_v60, %v1687_v5  ;;  %v1903_v11 = vmul.f32 %v8045_v50, %v939_v10  ;;  %v8076_v10 = vld [vmem:[%s10540_s4] ss:$0 sm:$0xff]  ;;  %v943_v37 = vld [vmem:[#allocation2 + $0x61] sm:$0xff]  ;;  %v944_v39 = vld [vmem:[#allocation2 + $0x69] sm:$0xff] }
  0xbe   : > { %v2043_v63 = vmul.f32 %v8052_v56, %v1139_v36  ;;  %v879_v13 = vmul.f32 %v7947_v38, %v808_v61  ;;  %v1351_v14 = vmul.f32 %v7961_v43, %v808_v61  ;;  %v1012_v16 = vmul.f32 %v7954_v40, %v940_v0  ;;  %v443_v19 = vpop.permute.xlu1 %442  ;;  %v433_v20 = vpop.permute.xlu0 %432 }
  0xbf   : > { %v8067_v21 = vadd.f32 %v1626_v4, %v1550_v59  ;;  %v1967_v22 = vadd.f32 %v1903_v11, %v1827_v9  ;;  %v1767_v23 = vmul.f32 %v8025_v15, %v808_v61  ;;  %v1488_v5 = vmul.f32 %v7982_v3, %v940_v0  ;;  %740 = vst.msk [vmem:[#allocation2 + $0xa0] sm:$0xff] %vm250_vm0, %v443_v19  ;;  %v810_v59 = vld [vmem:[#allocation2 + $0x70] sm:$0xff] }
  0xc0   : > { %738 = vst.msk [vmem:[#allocation2 + $0x90] sm:$0xff] %vm250_vm0, %v433_v20  ;;  %v1689_v24 = vadd.f32 %v1625_v29, %v1549_v57  ;;  %v8079_v25 = vmul.f32 %v7947_v38, %v806_v12  ;;  %v1076_v26 = vadd.f32 %v1012_v16, %v876_v45  ;;  %v1904_v28 = vmul.f32 %v8045_v50, %v940_v0  ;;  %v8089_v45 = vld [vmem:[%s10541_s5] ss:$0 sm:$0xff] }
  0xc1   : > { %v1691_v30 = vadd.f32 %v1627_v8, %v1551_v7  ;;  %v2107_v33 = vadd.f32 %v2043_v63, %v1967_v22  ;;  %v1212_v34 = vmul.f32 %v7966_v44, %v1140_v17  ;;  %v1349_v36 = vmul.f32 %v7961_v43, %v806_v12 }
  0xc2   : > { %v1415_v41 = vadd.f32 %v1351_v14, %v1275_v2  ;;  %v1628_v47 = vmul.f32 %v8000_v27, %v1140_v17  ;;  %v1968_v48 = vadd.f32 %v1904_v28, %v1828_v55  ;;  %v2044_v29 = vmul.f32 %v8052_v56, %v1140_v17  ;;  %v453_v51 = vpop.permute.xlu1 %452  ;;  %v448_v46 = vpop.permute.xlu0 %447 }
  0xc3   : > { %v2178_v52 = vmul.f32 %v8076_v10, %v2107_v33  ;;  %v1276_v53 = vadd.f32 %v1212_v34, %v1076_v26  ;;  %v1552_v54 = vadd.f32 %v1488_v5, %v1412_v49  ;;  %v1765_v58 = vmul.f32 %v8025_v15, %v806_v12  ;;  %742 = vst.msk [vmem:[#allocation2 + $0xb0] sm:$0xff] %vm250_vm0, %v453_v51  ;;  %v1143_v49 = vld [vmem:[#allocation2 + $0x62] sm:$0xff]  ;;  %v1144_v12 = vld [vmem:[#allocation2 + $0x6a] sm:$0xff] }
  0xc4   : > { %741 = vst.msk [vmem:[#allocation2 + $0xa8] sm:$0xff] %vm250_vm0, %v448_v46  ;;  %v2108_v55 = vadd.f32 %v2044_v29, %v1968_v48  ;;  %v880_v60 = vmul.f32 %v7947_v38, %v809_v31  ;;  %v1015_v61 = vmul.f32 %v7954_v40, %v943_v37  ;;  %v1016_v0 = vmul.f32 %v7954_v40, %v944_v39  ;;  %v945_v34 = vld [vmem:[#allocation2 + $0x71] sm:$0xff] }
  0xc5   : > { %v1831_v57 = vadd.f32 %v1767_v23, %v1691_v30  ;;  %v8099_v2 = vadd.f32 %v1349_v36, %v8038_v42  ;;  %v8101_v4 = vadd.f32 %v1765_v58, %v1689_v24  ;;  %v1352_v7 = vmul.f32 %v7961_v43, %v809_v31  ;;  %v811_v58 = vld [vmem:[#allocation2 + $0x78] sm:$0xff] }
  0xc6   : > { %v8105_v8 = vadd.f32 %v8089_v45, %v2178_v52  ;;  %v2179_v9 = vmul.f32 %v8076_v10, %v2108_v55  ;;  %v881_v11 = vmul.f32 %v7947_v38, %v810_v59  ;;  %v1491_v63 = vmul.f32 %v7982_v3, %v943_v37  ;;  %v458_v14 = vpop.permute.xlu1 %457  ;;  %v438_v16 = vpop.permute.xlu0 %437 }
  0xc7   : > { %v1692_v17 = vadd.f32 %v1628_v47, %v1552_v54  ;;  %v8111_v42 = vmul.f32 %v7961_v43, %v810_v59  ;;  %v8114_v19 = vmul.f32 %v8025_v15, %v810_v59  ;;  %v1416_v20 = vadd.f32 %v1352_v7, %v1276_v53  ;;  %743 = vst.msk [vmem:[#allocation2 + $0xb8] sm:$0xff] %vm250_vm0, %v458_v14  ;;  %v1145_v59 = vld [vmem:[#allocation2 + $0x72] sm:$0xff] }
  0xc8   : > { %739 = vst.msk [vmem:[#allocation2 + $0x98] sm:$0xff] %vm250_vm0, %v438_v16  ;;  %v1079_v22 = vadd.f32 %v1015_v61, %v879_v13  ;;  %v1080_v23 = vadd.f32 %v1016_v0, %v880_v60  ;;  %v1215_v5 = vmul.f32 %v7966_v44, %v1143_v49  ;;  %v1492_v24 = vmul.f32 %v7982_v3, %v944_v39  ;;  %v942_v16 = vld [vmem:[#allocation2 + $0x59] sm:$0xff] }
  0xc9   : > { %v8121_v26 = vadd.f32 %v8089_v45, %v2179_v9  ;;  %v1216_v28 = vmul.f32 %v7966_v44, %v1144_v12  ;;  %v1768_v30 = vmul.f32 %v8025_v15, %v809_v31  ;;  %v1907_v33 = vmul.f32 %v8045_v50, %v943_v37 }
  0xca   : > { %v2313_v36 = vmax.f32 %v8105_v8, 0.0  ;;  %v1555_v47 = vadd.f32 %v1491_v63, %v1415_v41  ;;  %v1556_v48 = vadd.f32 %v1492_v24, %v1416_v20  ;;  %v1631_v13 = vmul.f32 %v8000_v27, %v1143_v49  ;;  %v468_v29 = vpop.permute.xlu1 %467  ;;  %v463_v51 = vpop.permute.xlu0 %462 }
  0xcb   : > { %v1832_v46 = vadd.f32 %v1768_v30, %v1692_v17  ;;  %v1908_v52 = vmul.f32 %v8045_v50, %v944_v39  ;;  %v1971_v53 = vadd.f32 %v1907_v33, %v1831_v57  ;;  %v2047_v54 = vmul.f32 %v8052_v56, %v1143_v49  ;;  %745 = vst.msk [vmem:[#allocation2 + $0xc8] sm:$0xff] %vm250_vm0, %v468_v29  ;;  %v807_v57 = vld [vmem:[#allocation2 + $0x58] sm:$0xff] }
  0xcc   : > { %744 = vst.msk [vmem:[#allocation2 + $0xc0] sm:$0xff] %vm250_vm0, %v463_v51  ;;  %v8132_v31 = vadd.f32 %v1215_v5, %v1079_v22  ;;  %v8134_v37 = vadd.f32 %v1216_v28, %v1080_v23  ;;  %v1632_v41 = vmul.f32 %v8000_v27, %v1144_v12  ;;  %v1017_v55 = vmul.f32 %v7954_v40, %v945_v34  ;;  %v941_v49 = vld [vmem:[#allocation2 + $0x51] sm:$0xff] }
  0xcd   : > { %v2314_v60 = vmax.f32 %v8121_v26, 0.0  ;;  %v1972_v39 = vadd.f32 %v1908_v52, %v1832_v46  ;;  %v2048_v61 = vmul.f32 %v8052_v56, %v1144_v12  ;;  %v2111_v0 = vadd.f32 %v2047_v54, %v1971_v53  ;;  %v1141_v33 = vld [vmem:[#allocation2 + $0x52] sm:$0xff] }
  0xce   : > { %v8140_v7 = vadd.f32 %v1631_v13, %v1555_v47  ;;  %v8142_v9 = vadd.f32 %v1632_v41, %v1556_v48  ;;  %v8145_v63 = vmul.f32 %v7947_v38, %v811_v58  ;;  %v1217_v14 = vmul.f32 %v7966_v44, %v1145_v59  ;;  %v483_v17 = vpop.permute.xlu1 %482  ;;  %v473_v20 = vpop.permute.xlu0 %472 }
  0xcf   : > { %v2112_v22 = vadd.f32 %v2048_v61, %v1972_v39  ;;  %v2182_v23 = vmul.f32 %v8076_v10, %v2111_v0  ;;  %v8150_v12 = vmul.f32 %v7961_v43, %v811_v58  ;;  %v8153_v5 = vmul.f32 %v7982_v3, %v945_v34  ;;  %748 = vst.msk [vmem:[#allocation2 + $0xe0] sm:$0xff] %vm250_vm0, %v483_v17 }
  0xd0   : > { %746 = vst.msk [vmem:[#allocation2 + $0xd0] sm:$0xff] %vm250_vm0, %v473_v20  ;;  %v1081_v24 = vadd.f32 %v1017_v55, %v881_v11  ;;  %v8158_v26 = vmul.f32 %v8000_v27, %v1145_v59  ;;  %v878_v28 = vmul.f32 %v7947_v38, %v807_v57  ;;  %v1013_v30 = vmul.f32 %v7954_v40, %v941_v49 }
  0xd1   : > { %v2183_v47 = vmul.f32 %v8076_v10, %v2112_v22  ;;  %v2253_v48 = vadd.f32 %v8089_v45, %v2182_v23  ;;  %v1014_v13 = vmul.f32 %v7954_v40, %v942_v16  ;;  %v1350_v29 = vmul.f32 %v7961_v43, %v807_v57 }
  0xd2   : > { %v8167_v51 = vmul.f32 %v8025_v15, %v811_v58  ;;  %v1909_v11 = vmul.f32 %v8045_v50, %v945_v34  ;;  %v2049_v46 = vmul.f32 %v8052_v56, %v1145_v59  ;;  %v1489_v52 = vmul.f32 %v7982_v3, %v941_v49  ;;  %v493_v53 = vpop.permute.xlu1 %492  ;;  %v488_v54 = vpop.permute.xlu0 %487  ;;  %v1142_v34 = vld [vmem:[#allocation2 + $0x5a] sm:$0xff] }
  0xd3   : > { %v2254_v41 = vadd.f32 %v8089_v45, %v2183_v47  ;;  %v2317_v55 = vmax.f32 %v2253_v48, 0.0  ;;  %v1213_v39 = vmul.f32 %v7966_v44, %v1141_v33  ;;  %v1414_v61 = vadd.f32 %v1350_v29, %v8058_v1  ;;  %750 = vst.msk [vmem:[#allocation2 + $0xf0] sm:$0xff] %vm250_vm0, %v493_v53  ;;  %749 = vst.msk [vmem:[#allocation2 + $0xe8] sm:$0xff] %vm250_vm0, %v488_v54  ;;  %v947_v54 = vld [vmem:[#allocation2 + $0x81] sm:$0xff] }
  0xd4   : > { %v1077_v58 = vadd.f32 %v1013_v30, %v8079_v25  ;;  %v1553_v59 = vadd.f32 %v1489_v52, %v8099_v2  ;;  %v1629_v0 = vmul.f32 %v8000_v27, %v1141_v33  ;;  %v1766_v17 = vmul.f32 %v8025_v15, %v807_v57 }
  0xd5   : > { %v2318_v20 = vmax.f32 %v2254_v41, 0.0  ;;  %v2377_v22 = vmax.f32 %v2313_v36, %v2317_v55  ;;  %v1078_v23 = vadd.f32 %v1014_v13, %v878_v28  ;;  %v1490_v1 = vmul.f32 %v7982_v3, %v942_v16  ;;  %v812_v36 = vld [vmem:[#allocation2 + $0x80] sm:$0xff] }
  0xd6   : > { %v1693_v47 = vadd.f32 %v1629_v0, %v1553_v59  ;;  %v1830_v48 = vadd.f32 %v1766_v17, %v8067_v21  ;;  %v1905_v29 = vmul.f32 %v8045_v50, %v941_v49  ;;  %v1906_v25 = vmul.f32 %v8045_v50, %v942_v16  ;;  %v503_v30 = vpop.permute.xlu1 %502  ;;  %v478_v2 = vpop.permute.xlu0 %477  ;;  %v946_v13 = vld [vmem:[#allocation2 + $0x79] sm:$0xff] }
  0xd7   : > { %v2378_v52 = vmax.f32 %v2314_v60, %v2318_v20  ;;  %2409 = vst.msk [vmem:[#allocation3] sm:$0xff] %vm250_vm0, %v2377_v22  ;;  %v1214_v57 = vmul.f32 %v7966_v44, %v1142_v34  ;;  %v1554_v53 = vadd.f32 %v1490_v1, %v1414_v61  ;;  %v2045_v8 = vmul.f32 %v8052_v56, %v1141_v33  ;;  %v813_v60 = vld [vmem:[#allocation2 + $0x88] sm:$0xff] }
  0xd8   : > { %752 = vst.msk [vmem:[#allocation2 + $0x100] sm:$0xff] %vm250_vm0, %v503_v30  ;;  %747 = vst.msk [vmem:[#allocation2 + $0xd8] sm:$0xff] %vm250_vm0, %v478_v2  ;;  %v1833_v21 = vadd.f32 %v8114_v19, %v1693_v47  ;;  %v1969_v49 = vadd.f32 %v1905_v29, %v8101_v4  ;;  %v1970_v16 = vadd.f32 %v1906_v25, %v1830_v48  ;;  %v1147_v25 = vld [vmem:[#allocation2 + $0x82] sm:$0xff] }
  0xd9   : > { %v2046_v28 = vmul.f32 %v8052_v56, %v1142_v34  ;;  %2410 = vst.msk [vmem:[#allocation3 + $0x8] sm:$0xff] %vm250_vm0, %v2378_v52  ;;  %v8196_v41 = vadd.f32 %v1217_v14, %v1081_v24  ;;  %v1277_v33 = vadd.f32 %v1213_v39, %v1077_v58  ;;  %v1278_v55 = vadd.f32 %v1214_v57, %v1078_v23  ;;  %v1146_v58 = vld [vmem:[#allocation2 + $0x7a] sm:$0xff] }
  0xda   : > { %v1630_v61 = vmul.f32 %v8000_v27, %v1142_v34  ;;  %v1973_v59 = vadd.f32 %v1909_v11, %v1833_v21  ;;  %v2109_v0 = vadd.f32 %v2045_v8, %v1969_v49  ;;  %v883_v19 = vmul.f32 %v7947_v38, %v812_v36  ;;  %v513_v4 = vpop.permute.xlu1 %512  ;;  %v508_v20 = vpop.permute.xlu0 %507 }
  0xdb   : > { %v2110_v17 = vadd.f32 %v2046_v28, %v1970_v16  ;;  %v1356_v1 = vmul.f32 %v7961_v43, %v813_v60  ;;  %v1018_v47 = vmul.f32 %v7954_v40, %v946_v13  ;;  %v1019_v48 = vmul.f32 %v7954_v40, %v947_v54  ;;  %754 = vst.msk [vmem:[#allocation2 + $0x110] sm:$0xff] %vm250_vm0, %v513_v4 }
  0xdc   : > { %v1694_v22 = vadd.f32 %v1630_v61, %v1554_v53  ;;  %753 = vst.msk [vmem:[#allocation2 + $0x108] sm:$0xff] %vm250_vm0, %v508_v20  ;;  %v2113_v14 = vadd.f32 %v2049_v46, %v1973_v59  ;;  %v2180_v24 = vmul.f32 %v8076_v10, %v2109_v0  ;;  %v1772_v39 = vmul.f32 %v8025_v15, %v813_v60 }
  0xdd   : > { %v2181_v11 = vmul.f32 %v8076_v10, %v2110_v17  ;;  %v1417_v34 = vadd.f32 %v8111_v42, %v1277_v33  ;;  %v8210_v23 = vmul.f32 %v7947_v38, %v813_v60  ;;  %v1082_v29 = vadd.f32 %v1018_v47, %v8145_v63  ;;  %v816_v17 = vld [vmem:[#allocation2 + $0xa0] sm:$0xff]  ;;  %v948_v47 = vld [vmem:[#allocation2 + $0x89] sm:$0xff] }
  0xde   : > { %v1355_v30 = vmul.f32 %v7961_v43, %v812_v36  ;;  %v2184_v2 = vmul.f32 %v8076_v10, %v2113_v14  ;;  %v2251_v46 = vadd.f32 %v8089_v45, %v2180_v24  ;;  %v1418_v52 = vadd.f32 %v8150_v12, %v1278_v55  ;;  %v523_v53 = vpop.permute.xlu1 %522  ;;  %v498_v8 = vpop.permute.xlu0 %497 }
  0xdf   : > { %v1083_v57 = vadd.f32 %v1019_v48, %v883_v19  ;;  %v8218_v21 = vadd.f32 %v1356_v1, %v8134_v37  ;;  %v1834_v42 = vadd.f32 %v8167_v51, %v1694_v22  ;;  %v1218_v49 = vmul.f32 %v7966_v44, %v1146_v58  ;;  %756 = vst.msk [vmem:[#allocation2 + $0x120] sm:$0xff] %vm250_vm0, %v523_v53 }
  0xe0   : > { %v1419_v63 = vadd.f32 %v1355_v30, %v8132_v31  ;;  %751 = vst.msk [vmem:[#allocation2 + $0xf8] sm:$0xff] %vm250_vm0, %v498_v8  ;;  %v8226_v16 = vadd.f32 %v8089_v45, %v2181_v11  ;;  %v2255_v12 = vadd.f32 %v8089_v45, %v2184_v2  ;;  %v1836_v28 = vadd.f32 %v1772_v39, %v8142_v9 }
  0xe1   : > { %v1219_v37 = vmul.f32 %v7966_v44, %v1147_v25  ;;  %v8231_v60 = vadd.f32 %v1218_v49, %v1082_v29  ;;  %v1494_v51 = vmul.f32 %v7982_v3, %v946_v13  ;;  %v1495_v33 = vmul.f32 %v7982_v3, %v947_v54  ;;  %v814_v29 = vld [vmem:[#allocation2 + $0x90] sm:$0xff] }
  0xe2   : > { %v1771_v31 = vmul.f32 %v8025_v15, %v812_v36  ;;  %v2315_v55 = vmax.f32 %v2251_v46, 0.0  ;;  %v2319_v61 = vmax.f32 %v2255_v12, 0.0  ;;  %v1910_v0 = vmul.f32 %v8045_v50, %v946_v13  ;;  %v533_v19 = vpop.permute.xlu1 %532  ;;  %v528_v4 = vpop.permute.xlu0 %527 }
  0xe3   : > { %v1283_v59 = vadd.f32 %v1219_v37, %v1083_v57  ;;  %v1558_v20 = vadd.f32 %v1494_v51, %v1418_v52  ;;  %v1559_v9 = vadd.f32 %v1495_v33, %v1419_v63  ;;  %v1911_v1 = vmul.f32 %v8045_v50, %v947_v54  ;;  %758 = vst.msk [vmem:[#allocation2 + $0x130] sm:$0xff] %vm250_vm0, %v533_v19 }
  0xe4   : > { %v1835_v22 = vadd.f32 %v1771_v31, %v8140_v7  ;;  %757 = vst.msk [vmem:[#allocation2 + $0x128] sm:$0xff] %vm250_vm0, %v528_v4  ;;  %v2379_v36 = vmax.f32 %v2315_v55, %v2319_v61  ;;  %v1634_v48 = vmul.f32 %v8000_v27, %v1146_v58  ;;  %v1974_v14 = vadd.f32 %v1910_v0, %v1834_v42  ;;  %v1148_v42 = vld [vmem:[#allocation2 + $0x8a] sm:$0xff] }
  0xe5   : > { %v2050_v13 = vmul.f32 %v8052_v56, %v1146_v58  ;;  %v1635_v24 = vmul.f32 %v8000_v27, %v1147_v25  ;;  %v2051_v39 = vmul.f32 %v8052_v56, %v1147_v25  ;;  %v1359_v7 = vmul.f32 %v7961_v43, %v816_v17  ;;  %v817_v0 = vld [vmem:[#allocation2 + $0xa8] sm:$0xff] }
  0xe6   : > { %v1975_v11 = vadd.f32 %v1911_v1, %v1835_v22  ;;  %v2316_v54 = vmax.f32 %v8226_v16, 0.0  ;;  %2411 = vst.msk [vmem:[#allocation3 + $0x10] sm:$0xff] %vm250_vm0, %v2379_v36  ;;  %v1557_v2 = vadd.f32 %v8153_v5, %v1417_v34  ;;  %v1020_v46 = vmul.f32 %v7954_v40, %v948_v47  ;;  %v538_v52 = vpop.permute.xlu1 %537  ;;  %v518_v57 = vpop.permute.xlu0 %517  ;;  %v952_v22 = vld [vmem:[#allocation2 + $0xa9] sm:$0xff] }
  0xe7   : > { %v2114_v30 = vadd.f32 %v2050_v13, %v1974_v14  ;;  %v8250_v58 = vadd.f32 %v1634_v48, %v1558_v20  ;;  %v1699_v53 = vadd.f32 %v1635_v24, %v1559_v9  ;;  %v887_v25 = vmul.f32 %v7947_v38, %v816_v17  ;;  %759 = vst.msk [vmem:[#allocation2 + $0x138] sm:$0xff] %vm250_vm0, %v538_v52  ;;  %v818_v48 = vld [vmem:[#allocation2 + $0xb0] sm:$0xff]  ;;  %v1151_v52 = vld [vmem:[#allocation2 + $0xa2] sm:$0xff] }
  0xe8   : > { %v2115_v8 = vadd.f32 %v2051_v39, %v1975_v11  ;;  %755 = vst.msk [vmem:[#allocation2 + $0x118] sm:$0xff] %vm250_vm0, %v518_v57  ;;  %v1775_v63 = vmul.f32 %v8025_v15, %v816_v17  ;;  %v8258_v5 = vmul.f32 %v7947_v38, %v814_v29  ;;  %v1496_v34 = vmul.f32 %v7982_v3, %v948_v47  ;;  %v951_v17 = vld [vmem:[#allocation2 + $0xa1] sm:$0xff] }
  0xe9   : > { %v2185_v49 = vmul.f32 %v8076_v10, %v2114_v30  ;;  %v1423_v12 = vadd.f32 %v1359_v7, %v1283_v59  ;;  %v1084_v37 = vadd.f32 %v1020_v46, %v8210_v23  ;;  %v1912_v51 = vmul.f32 %v8045_v50, %v948_v47 }
  0xea   : > { %v2186_v16 = vmul.f32 %v8076_v10, %v2115_v8  ;;  %v1697_v31 = vadd.f32 %v8158_v26, %v1557_v2  ;;  %v1220_v55 = vmul.f32 %v7966_v44, %v1148_v42  ;;  %v1357_v61 = vmul.f32 %v7961_v43, %v814_v29  ;;  %v548_v19 = vpop.permute.xlu1 %547  ;;  %v543_v4 = vpop.permute.xlu0 %542 }
  0xeb   : > { %v2256_v33 = vadd.f32 %v8089_v45, %v2185_v49  ;;  %v1839_v20 = vadd.f32 %v1775_v63, %v1699_v53  ;;  %v1636_v9 = vmul.f32 %v8000_v27, %v1148_v42  ;;  %v1976_v59 = vadd.f32 %v1912_v51, %v1836_v28  ;;  %761 = vst.msk [vmem:[#allocation2 + $0x148] sm:$0xff] %vm250_vm0, %v548_v19  ;;  %v1152_v49 = vld [vmem:[#allocation2 + $0xaa] sm:$0xff] }
  0xec   : > { %v2052_v23 = vmul.f32 %v8052_v56, %v1148_v42  ;;  %760 = vst.msk [vmem:[#allocation2 + $0x140] sm:$0xff] %vm250_vm0, %v543_v4  ;;  %v8273_v26 = vadd.f32 %v8089_v45, %v2186_v16  ;;  %v1560_v47 = vadd.f32 %v1496_v34, %v8218_v21  ;;  %v1773_v36 = vmul.f32 %v8025_v15, %v814_v29 }
  0xed   : > { %v2320_v1 = vmax.f32 %v2256_v33, 0.0  ;;  %v1284_v14 = vadd.f32 %v1220_v55, %v1084_v37  ;;  %v888_v28 = vmul.f32 %v7947_v38, %v817_v0  ;;  %v1023_v24 = vmul.f32 %v7954_v40, %v951_v17 }
  0xee   : > { %v2116_v13 = vadd.f32 %v2052_v23, %v1976_v59  ;;  %v8280_v39 = vadd.f32 %v1357_v61, %v8196_v41  ;;  %v8282_v7 = vadd.f32 %v1773_v36, %v1697_v31  ;;  %v1024_v30 = vmul.f32 %v7954_v40, %v952_v22  ;;  %v558_v2 = vpop.permute.xlu1 %557  ;;  %v553_v46 = vpop.permute.xlu0 %552  ;;  %v953_v61 = vld [vmem:[#allocation2 + $0xb1] sm:$0xff] }
  0xef   : > { %v2380_v11 = vmax.f32 %v2316_v54, %v2320_v1  ;;  %v889_v29 = vmul.f32 %v7947_v38, %v818_v48  ;;  %v1360_v57 = vmul.f32 %v7961_v43, %v817_v0  ;;  %v1499_v53 = vmul.f32 %v7982_v3, %v951_v17  ;;  %763 = vst.msk [vmem:[#allocation2 + $0x158] sm:$0xff] %vm250_vm0, %v558_v2 }
  0xf0   : > { %v2187_v21 = vmul.f32 %v8076_v10, %v2116_v13  ;;  %762 = vst.msk [vmem:[#allocation2 + $0x150] sm:$0xff] %vm250_vm0, %v553_v46  ;;  %v2321_v41 = vmax.f32 %v8273_v26, 0.0  ;;  %v1700_v54 = vadd.f32 %v1636_v9, %v1560_v47  ;;  %v8294_v8 = vmul.f32 %v7961_v43, %v818_v48 }
  0xf1   : > { %2412 = vst.msk [vmem:[#allocation3 + $0x18] sm:$0xff] %vm250_vm0, %v2380_v11  ;;  %v8297_v42 = vmul.f32 %v8025_v15, %v818_v48  ;;  %v1087_v63 = vadd.f32 %v1023_v24, %v887_v25  ;;  %v1088_v34 = vadd.f32 %v1024_v30, %v888_v28  ;;  %v1424_v16 = vadd.f32 %v1360_v57, %v1284_v14  ;;  %v1153_v48 = vld [vmem:[#allocation2 + $0xb2] sm:$0xff] }
  0xf2   : > { %v1500_v37 = vmul.f32 %v7982_v3, %v952_v22  ;;  %v8301_v51 = vadd.f32 %v8089_v45, %v2187_v21  ;;  %v1223_v33 = vmul.f32 %v7966_v44, %v1151_v52  ;;  %v1776_v31 = vmul.f32 %v8025_v15, %v817_v0  ;;  %v568_v19 = vpop.permute.xlu1 %567  ;;  %v563_v4 = vpop.permute.xlu0 %562 }
  0xf3   : > { %v1915_v55 = vmul.f32 %v8045_v50, %v951_v17  ;;  %v1224_v9 = vmul.f32 %v7966_v44, %v1152_v49  ;;  %v1563_v59 = vadd.f32 %v1499_v53, %v1423_v12  ;;  %v1639_v23 = vmul.f32 %v8000_v27, %v1151_v52  ;;  %765 = vst.msk [vmem:[#allocation2 + $0x168] sm:$0xff] %vm250_vm0, %v568_v19  ;;  %v819_v17 = vld [vmem:[#allocation2 + $0xb8] sm:$0xff] }
  0xf4   : > { %v1564_v25 = vadd.f32 %v1500_v37, %v1424_v16  ;;  %764 = vst.msk [vmem:[#allocation2 + $0x160] sm:$0xff] %vm250_vm0, %v563_v4  ;;  %v1840_v1 = vadd.f32 %v1776_v31, %v1700_v54  ;;  %v1916_v47 = vmul.f32 %v8045_v50, %v952_v22  ;;  %v2055_v0 = vmul.f32 %v8052_v56, %v1151_v52  ;;  %v815_v22 = vld [vmem:[#allocation2 + $0x98] sm:$0xff] }
  0xf5   : > { %v1979_v36 = vadd.f32 %v1915_v55, %v1839_v20  ;;  %v8312_v14 = vadd.f32 %v1223_v33, %v1087_v63  ;;  %v8314_v13 = vadd.f32 %v1224_v9, %v1088_v34  ;;  %v1640_v12 = vmul.f32 %v8000_v27, %v1152_v49  ;;  %v949_v20 = vld [vmem:[#allocation2 + $0x91] sm:$0xff]  ;;  %v950_v63 = vld [vmem:[#allocation2 + $0x99] sm:$0xff] }
  0xf6   : > { %v1025_v28 = vmul.f32 %v7954_v40, %v953_v61  ;;  %v2322_v24 = vmax.f32 %v8301_v51, 0.0  ;;  %v1980_v11 = vadd.f32 %v1916_v47, %v1840_v1  ;;  %v2056_v30 = vmul.f32 %v8052_v56, %v1152_v49  ;;  %v578_v46 = vpop.permute.xlu1 %577  ;;  %v573_v21 = vpop.permute.xlu0 %572  ;;  %v1149_v19 = vld [vmem:[#allocation2 + $0x92] sm:$0xff] }
  0xf7   : > { %v2119_v2 = vadd.f32 %v2055_v0, %v1979_v36  ;;  %v8320_v52 = vadd.f32 %v1639_v23, %v1563_v59  ;;  %v8322_v57 = vadd.f32 %v1640_v12, %v1564_v25  ;;  %v8325_v53 = vmul.f32 %v7947_v38, %v819_v17  ;;  %767 = vst.msk [vmem:[#allocation2 + $0x178] sm:$0xff] %vm250_vm0, %v578_v46 }
  0xf8   : > { %v1225_v54 = vmul.f32 %v7966_v44, %v1153_v48  ;;  %766 = vst.msk [vmem:[#allocation2 + $0x170] sm:$0xff] %vm250_vm0, %v573_v21  ;;  %v2120_v49 = vadd.f32 %v2056_v30, %v1980_v11  ;;  %v8332_v16 = vmul.f32 %v7961_v43, %v819_v17  ;;  %v8335_v37 = vmul.f32 %v7982_v3, %v953_v61 }
  0xf9   : > { %v2190_v34 = vmul.f32 %v8076_v10, %v2119_v2  ;;  %v1089_v51 = vadd.f32 %v1025_v28, %v889_v29  ;;  %v8338_v33 = vmul.f32 %v8000_v27, %v1153_v48  ;;  %v886_v31 = vmul.f32 %v7947_v38, %v815_v22  ;;  %v1150_v28 = vld [vmem:[#allocation2 + $0x9a] sm:$0xff] }
  0xfa   : > { %v1021_v55 = vmul.f32 %v7954_v40, %v949_v20  ;;  %v2191_v4 = vmul.f32 %v8076_v10, %v2120_v49  ;;  %v1022_v59 = vmul.f32 %v7954_v40, %v950_v63  ;;  %v1358_v25 = vmul.f32 %v7961_v43, %v815_v22 }
  0xfb   : > { %v2261_v9 = vadd.f32 %v8089_v45, %v2190_v34  ;;  %v8347_v23 = vmul.f32 %v8025_v15, %v819_v17  ;;  %v1917_v29 = vmul.f32 %v8045_v50, %v953_v61  ;;  %v2057_v1 = vmul.f32 %v8052_v56, %v1153_v48  ;;  %v954_v34 = vld [vmem:[#allocation2 + $0xb9] sm:$0xff] }
  0xfc   : > { %v1497_v38 = vmul.f32 %v7982_v3, %v949_v20  ;;  %v2262_v47 = vadd.f32 %v8089_v45, %v2191_v4  ;;  %v1221_v0 = vmul.f32 %v7966_v44, %v1149_v19  ;;  %v1422_v12 = vadd.f32 %v1358_v25, %v8231_v60 }
  0xfd   : > { %v2325_v36 = vmax.f32 %v2261_v9, 0.0  ;;  %v1085_v40 = vadd.f32 %v1021_v55, %v8258_v5  ;;  %v1637_v17 = vmul.f32 %v8000_v27, %v1149_v19  ;;  %v1774_v61 = vmul.f32 %v8025_v15, %v815_v22  ;;  %v820_v22 = vld [vmem:[#allocation2 + $0xc0] sm:$0xff] }
  0xfe   : > { %v1561_v43 = vadd.f32 %v1497_v38, %v8280_v39  ;;  %v2326_v11 = vmax.f32 %v2262_v47, 0.0  ;;  %v1086_v30 = vadd.f32 %v1022_v59, %v886_v31  ;;  %v1498_v2 = vmul.f32 %v7982_v3, %v950_v63  ;;  %v8369_v39 = vld [vmem:[%s10537_s1 + $0x2] ss:$0 sm:$0xff] }
  0xff   : > { %v2381_v48 = vmax.f32 %v2321_v41, %v2325_v36  ;;  %v1838_v44 = vadd.f32 %v1774_v61, %v8250_v58  ;;  %v1913_v60 = vmul.f32 %v8045_v50, %v949_v20  ;;  %v1914_v5 = vmul.f32 %v8045_v50, %v950_v63  ;;  %v821_v63 = vld [vmem:[#allocation2 + $0xc8] sm:$0xff] }
 0x100   : > { %v1701_v46 = vadd.f32 %v1637_v17, %v1561_v43  ;;  %v2382_v21 = vmax.f32 %v2322_v24, %v2326_v11  ;;  %v1222_v26 = vmul.f32 %v8369_v39, %v1150_v28  ;;  %v1562_v41 = vadd.f32 %v1498_v2, %v1422_v12  ;;  %v955_v31 = vld [vmem:[#allocation2 + $0xc1] sm:$0xff] }
 0x101   : > { %2413 = vst.msk [vmem:[#allocation3 + $0x20] sm:$0xff] %vm250_vm0, %v2381_v48  ;;  %v2053_v3 = vmul.f32 %v8052_v56, %v1149_v19  ;;  %v1977_v20 = vadd.f32 %v1913_v60, %v8282_v7  ;;  %v1978_v49 = vadd.f32 %v1914_v5, %v1838_v44  ;;  %v2054_v24 = vmul.f32 %v8052_v56, %v1150_v28  ;;  %v8383_v7 = vld [vmem:[%s10537_s1] ss:$0 sm:$0xff]  ;;  %v1155_v48 = vld [vmem:[#allocation2 + $0xc2] sm:$0xff] }
 0x102   : > { %v1841_v58 = vadd.f32 %v8297_v42, %v1701_v46  ;;  %2414 = vst.msk [vmem:[#allocation3 + $0x28] sm:$0xff] %vm250_vm0, %v2382_v21  ;;  %v8377_v55 = vadd.f32 %v1225_v54, %v1089_v51  ;;  %v1285_v4 = vadd.f32 %v1221_v0, %v1085_v40  ;;  %v1286_v9 = vadd.f32 %v1222_v26, %v1086_v30  ;;  %v8389_v54 = vld [vmem:[%s10537_s1 + $0x3] ss:$0 sm:$0xff]  ;;  %v1154_v43 = vld [vmem:[#allocation2 + $0xba] sm:$0xff] }
 0x103   : > { %v1638_v59 = vmul.f32 %v8000_v27, %v1150_v28  ;;  %v2117_v25 = vadd.f32 %v2053_v3, %v1977_v20  ;;  %v2118_v38 = vadd.f32 %v2054_v24, %v1978_v49  ;;  %v891_v42 = vmul.f32 %v8383_v7, %v820_v22  ;;  %v8395_v27 = vld [vmem:[%s10537_s1 + $0x1] ss:$0 sm:$0xff] }
 0x104   : > { %v1981_v19 = vadd.f32 %v1917_v29, %v1841_v58  ;;  %v1364_v51 = vmul.f32 %v8389_v54, %v821_v63  ;;  %v1026_v29 = vmul.f32 %v8395_v27, %v954_v34  ;;  %v1027_v36 = vmul.f32 %v8395_v27, %v955_v31 }
 0x105   : > { %v1702_v47 = vadd.f32 %v1638_v59, %v1562_v41  ;;  %v2188_v12 = vmul.f32 %v8076_v10, %v2117_v25  ;;  %v2189_v40 = vmul.f32 %v8076_v10, %v2118_v38  ;;  %v1780_v28 = vmul.f32 %v8025_v15, %v821_v63  ;;  %v956_v25 = vld [vmem:[#allocation2 + $0xc9] sm:$0xff]  ;;  %v588_v38 = vpop.permute.xlu1 %587 }
 0x106   : > { %v2121_v0 = vadd.f32 %v2057_v1, %v1981_v19  ;;  %v1425_v17 = vadd.f32 %v8294_v8, %v1285_v4  ;;  %v892_v61 = vmul.f32 %v8383_v7, %v821_v63  ;;  %v1090_v11 = vadd.f32 %v1026_v29, %v8325_v53  ;;  %v824_v19 = vld [vmem:[#allocation2 + $0xe0] sm:$0xff]  ;;  %769 = vst.msk [vmem:[#allocation2 + $0x188] sm:$0xff] %vm250_vm0, %v588_v38 }
 0x107   : > { %v1363_v30 = vmul.f32 %v8389_v54, %v820_v22  ;;  %v2259_v1 = vadd.f32 %v8089_v45, %v2188_v12  ;;  %v1426_v46 = vadd.f32 %v8332_v16, %v1286_v9  ;;  %v1091_v44 = vadd.f32 %v1027_v36, %v891_v42  ;;  %v583_v42 = vpop.permute.xlu0 %582  ;;  %v822_v12 = vld [vmem:[#allocation2 + $0xd0] sm:$0xff] }
 0x108   : > { %v2192_v2 = vmul.f32 %v8076_v10, %v2121_v0  ;;  %v8410_v60 = vadd.f32 %v1364_v51, %v8314_v13  ;;  %v1842_v5 = vadd.f32 %v8347_v23, %v1702_v47  ;;  %v1226_v8 = vmul.f32 %v8369_v39, %v1154_v43  ;;  %v8426_v13 = vld [vmem:[%s10537_s1 + $0x4] ss:$0 sm:$0xff]  ;;  %768 = vst.msk [vmem:[#allocation2 + $0x180] sm:$0xff] %vm250_vm0, %v583_v42  ;;  %v826_v42 = vld [vmem:[#allocation2 + $0xf0] sm:$0xff] }
 0x109   : > { %v1427_v21 = vadd.f32 %v1363_v30, %v8312_v14  ;;  %v8416_v53 = vadd.f32 %v8089_v45, %v2189_v40  ;;  %v1844_v41 = vadd.f32 %v1780_v28, %v8322_v57  ;;  %v1227_v3 = vmul.f32 %v8369_v39, %v1155_v48 }
 0x10a   : > { %v2263_v26 = vadd.f32 %v8089_v45, %v2192_v2  ;;  %v8421_v16 = vadd.f32 %v1226_v8, %v1090_v11  ;;  %v1502_v23 = vmul.f32 %v8426_v13, %v954_v34  ;;  %v1503_v14 = vmul.f32 %v8426_v13, %v955_v31 }
 0x10b   : > { %v1779_v58 = vmul.f32 %v8025_v15, %v820_v22  ;;  %v2323_v20 = vmax.f32 %v2259_v1, 0.0  ;;  %v1291_v24 = vadd.f32 %v1227_v3, %v1091_v44  ;;  %v1918_v57 = vmul.f32 %v8045_v50, %v954_v34  ;;  %v1156_v44 = vld [vmem:[#allocation2 + $0xca] sm:$0xff] }
 0x10c   : > { %v2327_v49 = vmax.f32 %v2263_v26, 0.0  ;;  %v1566_v63 = vadd.f32 %v1502_v23, %v1426_v46  ;;  %v1567_v4 = vadd.f32 %v1503_v14, %v1427_v21  ;;  %v1919_v59 = vmul.f32 %v8045_v50, %v955_v31 }
 0x10d   : > { %v1843_v9 = vadd.f32 %v1779_v58, %v8320_v52  ;;  %v2324_v47 = vmax.f32 %v8416_v53, 0.0  ;;  %v1982_v29 = vadd.f32 %v1918_v57, %v1842_v5  ;;  %v2058_v22 = vmul.f32 %v8052_v56, %v1154_v43  ;;  %v8441_v52 = vld [vmem:[%s10537_s1 + $0x5] ss:$0 sm:$0xff] }
 0x10e   : > { %v2383_v51 = vmax.f32 %v2323_v20, %v2327_v49  ;;  %v1642_v34 = vmul.f32 %v8441_v52, %v1154_v43  ;;  %v1643_v31 = vmul.f32 %v8441_v52, %v1155_v48  ;;  %v2059_v0 = vmul.f32 %v8052_v56, %v1155_v48 }
 0x10f   : > { %v1983_v36 = vadd.f32 %v1919_v59, %v1843_v9  ;;  %v2122_v40 = vadd.f32 %v2058_v22, %v1982_v29  ;;  %v1367_v28 = vmul.f32 %v8389_v54, %v824_v19  ;;  %v1565_v11 = vadd.f32 %v8335_v37, %v1425_v17  ;;  %v960_v9 = vld [vmem:[#allocation2 + $0xe9] sm:$0xff] }
 0x110   : > { %2415 = vst.msk [vmem:[#allocation3 + $0x30] sm:$0xff] %vm250_vm0, %v2383_v51  ;;  %v1028_v30 = vmul.f32 %v8395_v27, %v956_v25  ;;  %v8450_v2 = vadd.f32 %v1642_v34, %v1566_v63  ;;  %v1707_v1 = vadd.f32 %v1643_v31, %v1567_v4  ;;  %v895_v43 = vmul.f32 %v8383_v7, %v824_v19  ;;  %v825_v4 = vld [vmem:[#allocation2 + $0xe8] sm:$0xff] }
 0x111   : > { %v2123_v46 = vadd.f32 %v2059_v0, %v1983_v36  ;;  %v2193_v5 = vmul.f32 %v8076_v10, %v2122_v40  ;;  %v1783_v48 = vmul.f32 %v8025_v15, %v824_v19  ;;  %v1365_v8 = vmul.f32 %v8389_v54, %v822_v12  ;;  %v959_v15 = vld [vmem:[#allocation2 + $0xe1] sm:$0xff]  ;;  %v598_v19 = vpop.permute.xlu1 %597  ;;  %v1160_v0 = vld [vmem:[#allocation2 + $0xea] sm:$0xff] }
 0x112   : > { %v1504_v21 = vmul.f32 %v8426_v13, %v956_v25  ;;  %v8459_v37 = vmul.f32 %v8383_v7, %v822_v12  ;;  %v1092_v17 = vadd.f32 %v1028_v30, %v892_v61  ;;  %v1920_v26 = vmul.f32 %v8045_v50, %v956_v25  ;;  %v593_v25 = vpop.permute.xlu0 %592  ;;  %771 = vst.msk [vmem:[#allocation2 + $0x198] sm:$0xff] %vm250_vm0, %v598_v19  ;;  %v1159_v34 = vld [vmem:[#allocation2 + $0xe2] sm:$0xff] }
 0x113   : > { %v2194_v53 = vmul.f32 %v8076_v10, %v2123_v46  ;;  %v2264_v3 = vadd.f32 %v8089_v45, %v2193_v5  ;;  %v1431_v23 = vadd.f32 %v1367_v28, %v1291_v24  ;;  %v1705_v14 = vadd.f32 %v8338_v33, %v1565_v11  ;;  %v8474_v33 = vld [vmem:[%s10537_s1 + $0x6] ss:$0 sm:$0xff]  ;;  %770 = vst.msk [vmem:[#allocation2 + $0x190] sm:$0xff] %vm250_vm0, %v593_v25 }
 0x114   : > { %v1228_v58 = vmul.f32 %v8369_v39, %v1156_v44  ;;  %v1847_v20 = vadd.f32 %v1783_v48, %v1707_v1  ;;  %v1644_v49 = vmul.f32 %v8441_v52, %v1156_v44  ;;  %v1984_v57 = vadd.f32 %v1920_v26, %v1844_v41  ;;  %v828_v26 = vld [vmem:[#allocation2 + $0x100] sm:$0xff] }
 0x115   : > { %v2060_v63 = vmul.f32 %v8052_v56, %v1156_v44  ;;  %v2328_v59 = vmax.f32 %v2264_v3, 0.0  ;;  %v8468_v61 = vadd.f32 %v1365_v8, %v8377_v55  ;;  %v1568_v50 = vadd.f32 %v1504_v21, %v8410_v60  ;;  %v608_v1 = vpop.permute.xlu1 %607 }
 0x116   : > { %v1781_v24 = vmul.f32 %v8474_v33, %v822_v12  ;;  %v8478_v41 = vadd.f32 %v8089_v45, %v2194_v53  ;;  %v1292_v56 = vadd.f32 %v1228_v58, %v1092_v17  ;;  %v1031_v55 = vmul.f32 %v8395_v27, %v959_v15  ;;  %773 = vst.msk [vmem:[#allocation2 + $0x1a8] sm:$0xff] %vm250_vm0, %v608_v1  ;;  %v8509_v53 = vld [vmem:[%s10537_s1 + $0x7] ss:$0 sm:$0xff] }
 0x117   : > { %v2124_v38 = vadd.f32 %v2060_v63, %v1984_v57  ;;  %v2384_v60 = vmax.f32 %v2324_v47, %v2328_v59  ;;  %v896_v29 = vmul.f32 %v8383_v7, %v825_v4  ;;  %v1032_v22 = vmul.f32 %v8395_v27, %v960_v9  ;;  %v823_v59 = vld [vmem:[#allocation2 + $0xd8] sm:$0xff] }
 0x118   : > { %v8483_v51 = vadd.f32 %v1781_v24, %v1705_v14  ;;  %v1095_v36 = vadd.f32 %v1031_v55, %v895_v43  ;;  %v1368_v12 = vmul.f32 %v8389_v54, %v825_v4  ;;  %v1507_v40 = vmul.f32 %v8426_v13, %v959_v15 }
 0x119   : > { %v2195_v31 = vmul.f32 %v8076_v10, %v2124_v38  ;;  %2416 = vst.msk [vmem:[#allocation3 + $0x38] sm:$0xff] %vm250_vm0, %v2384_v60  ;;  %v1708_v28 = vadd.f32 %v1644_v49, %v1568_v50  ;;  %v8492_v47 = vmul.f32 %v8383_v7, %v826_v42  ;;  %v8495_v11 = vmul.f32 %v8389_v54, %v826_v42  ;;  %v603_v10 = vpop.permute.xlu0 %602  ;;  %v957_v50 = vld [vmem:[#allocation2 + $0xd1] sm:$0xff] }
 0x11a   : > { %v8498_v30 = vmul.f32 %v8474_v33, %v826_v42  ;;  %v2329_v46 = vmax.f32 %v8478_v41, 0.0  ;;  %v1231_v43 = vmul.f32 %v8369_v39, %v1159_v34  ;;  %v1432_v44 = vadd.f32 %v1368_v12, %v1292_v56  ;;  %772 = vst.msk [vmem:[#allocation2 + $0x1a0] sm:$0xff] %vm250_vm0, %v603_v10 }
 0x11b   : > { %v1571_v5 = vadd.f32 %v1507_v40, %v1431_v23  ;;  %v1096_v48 = vadd.f32 %v1032_v22, %v896_v29  ;;  %v1232_v8 = vmul.f32 %v8369_v39, %v1160_v0  ;;  %v1784_v21 = vmul.f32 %v8474_v33, %v825_v4  ;;  %v8521_v4 = vld [vmem:[%s10537_s1 + $0x8] ss:$0 sm:$0xff]  ;;  %v8537_v40 = vld [vmem:[%s10540_s4] ss:$0 sm:$0xff] }
 0x11c   : > { %v1923_v17 = vmul.f32 %v8509_v53, %v959_v15  ;;  %v8513_v3 = vadd.f32 %v8089_v45, %v2195_v31  ;;  %v1295_v23 = vadd.f32 %v1231_v43, %v1095_v36  ;;  %v1508_v14 = vmul.f32 %v8426_v13, %v960_v9  ;;  %v958_v45 = vld [vmem:[#allocation2 + $0xd9] sm:$0xff] }
 0x11d   : > { %v1647_v58 = vmul.f32 %v8441_v52, %v1159_v34  ;;  %v1848_v49 = vadd.f32 %v1784_v21, %v1708_v28  ;;  %v1924_v57 = vmul.f32 %v8509_v53, %v960_v9  ;;  %v2063_v15 = vmul.f32 %v8521_v4, %v1159_v34  ;;  %v1157_v34 = vld [vmem:[#allocation2 + $0xd2] sm:$0xff]  ;;  %v1158_v31 = vld [vmem:[#allocation2 + $0xda] sm:$0xff] }
 0x11e   : > { %v1987_v63 = vadd.f32 %v1923_v17, %v1847_v20  ;;  %v1572_v24 = vadd.f32 %v1508_v14, %v1432_v44  ;;  %v1371_v25 = vmul.f32 %v8389_v54, %v828_v26  ;;  %v1787_v56 = vmul.f32 %v8474_v33, %v828_v26  ;;  %v8552_v21 = vld [vmem:[%s10541_s5] ss:$0 sm:$0xff] }
 0x11f   : > { %v1711_v19 = vadd.f32 %v1647_v58, %v1571_v5  ;;  %v1648_v38 = vmul.f32 %v8441_v52, %v1160_v0  ;;  %v1988_v9 = vadd.f32 %v1924_v57, %v1848_v49  ;;  %v2064_v20 = vmul.f32 %v8521_v4, %v1160_v0  ;;  %v618_v5 = vpop.permute.xlu1 %617 }
 0x120   : > { %v2127_v42 = vadd.f32 %v2063_v15, %v1987_v63  ;;  %v8528_v55 = vadd.f32 %v1232_v8, %v1096_v48  ;;  %v894_v60 = vmul.f32 %v8383_v7, %v823_v59  ;;  %v1029_v29 = vmul.f32 %v8395_v27, %v957_v50  ;;  %v613_v48 = vpop.permute.xlu0 %612  ;;  %775 = vst.msk [vmem:[#allocation2 + $0x1b8] sm:$0xff] %vm250_vm0, %v618_v5 }
 0x121   : > { %v1030_v22 = vmul.f32 %v8395_v27, %v958_v45  ;;  %v2330_v36 = vmax.f32 %v8513_v3, 0.0  ;;  %v2128_v12 = vadd.f32 %v2064_v20, %v1988_v9  ;;  %v899_v28 = vmul.f32 %v8383_v7, %v828_v26  ;;  %774 = vst.msk [vmem:[#allocation2 + $0x1b0] sm:$0xff] %vm250_vm0, %v613_v48  ;;  %v1163_v48 = vld [vmem:[#allocation2 + $0x102] sm:$0xff] }
 0x122   : > { %v2198_v0 = vmul.f32 %v8537_v40, %v2127_v42  ;;  %v8541_v1 = vadd.f32 %v1648_v38, %v1572_v24  ;;  %v8543_v10 = vadd.f32 %v1371_v25, %v1295_v23  ;;  %v8545_v43 = vadd.f32 %v1787_v56, %v1711_v19  ;;  %v829_v38 = vld [vmem:[#allocation2 + $0x108] sm:$0xff] }
 0x123   : > { %v1366_v44 = vmul.f32 %v8389_v54, %v823_v59  ;;  %v2199_v8 = vmul.f32 %v8537_v40, %v2128_v12  ;;  %v1229_v26 = vmul.f32 %v8369_v39, %v1157_v34  ;;  %v1230_v3 = vmul.f32 %v8369_v39, %v1158_v31 }
 0x124   : > { %v2269_v17 = vadd.f32 %v8552_v21, %v2198_v0  ;;  %v1093_v23 = vadd.f32 %v1029_v29, %v8459_v37  ;;  %v1094_v14 = vadd.f32 %v1030_v22, %v894_v60  ;;  %v1505_v58 = vmul.f32 %v8426_v13, %v957_v50  ;;  %v964_v60 = vld [vmem:[#allocation2 + $0x109] sm:$0xff] }
 0x125   : > { %v1782_v49 = vmul.f32 %v8474_v33, %v823_v59  ;;  %v2270_v57 = vadd.f32 %v8552_v21, %v2199_v8  ;;  %v1430_v15 = vadd.f32 %v1366_v44, %v8421_v16  ;;  %v1921_v24 = vmul.f32 %v8509_v53, %v957_v50  ;;  %v963_v16 = vld [vmem:[#allocation2 + $0x101] sm:$0xff]  ;;  %v1164_v8 = vld [vmem:[#allocation2 + $0x10a] sm:$0xff] }
 0x126   : > { %v2333_v63 = vmax.f32 %v2269_v17, 0.0  ;;  %v1506_v19 = vmul.f32 %v8426_v13, %v958_v45  ;;  %v1645_v25 = vmul.f32 %v8441_v52, %v1157_v34  ;;  %v1922_v37 = vmul.f32 %v8509_v53, %v958_v45 }
 0x127   : > { %v1846_v56 = vadd.f32 %v1782_v49, %v8450_v2  ;;  %v2334_v9 = vmax.f32 %v2270_v57, 0.0  ;;  %v1985_v20 = vadd.f32 %v1921_v24, %v8483_v51  ;;  %v2061_v42 = vmul.f32 %v8521_v4, %v1157_v34  ;;  %v830_v34 = vld [vmem:[#allocation2 + $0x110] sm:$0xff]  ;;  %v628_v49 = vpop.permute.xlu1 %627 }
 0x128   : > { %v2385_v59 = vmax.f32 %v2329_v46, %v2333_v63  ;;  %v8573_v50 = vadd.f32 %v1229_v26, %v1093_v23  ;;  %v1569_v29 = vadd.f32 %v1505_v58, %v8468_v61  ;;  %v2062_v2 = vmul.f32 %v8521_v4, %v1158_v31  ;;  %777 = vst.msk [vmem:[#allocation2 + $0x1c8] sm:$0xff] %vm250_vm0, %v628_v49 }
 0x129   : > { %v1986_v22 = vadd.f32 %v1922_v37, %v1846_v56  ;;  %v2386_v12 = vmax.f32 %v2330_v36, %v2334_v9  ;;  %v1570_v45 = vadd.f32 %v1506_v19, %v1430_v15  ;;  %v2125_v0 = vadd.f32 %v2061_v42, %v1985_v20  ;;  %v2441_v56 = vld [vmem:[#allocation3] ss:$2 sm:$0xff]  ;;  %v2473_v37 = vld [vmem:[#allocation3 + $0x1] ss:$2 sm:$0xff] }
 0x12a   : > { %2417 = vst.msk [vmem:[#allocation3 + $0x40] sm:$0xff] %vm250_vm0, %v2385_v59  ;;  %v900_v41 = vmul.f32 %v8383_v7, %v829_v38  ;;  %v8579_v46 = vadd.f32 %v1230_v3, %v1094_v14  ;;  %v1035_v44 = vmul.f32 %v8395_v27, %v963_v16  ;;  %v1036_v5 = vmul.f32 %v8395_v27, %v964_v60 }
 0x12b   : > { %v2126_v51 = vadd.f32 %v2062_v2, %v1986_v22  ;;  %2418 = vst.msk [vmem:[#allocation3 + $0x48] sm:$0xff] %vm250_vm0, %v2386_v12  ;;  %v1646_v61 = vmul.f32 %v8441_v52, %v1158_v31  ;;  %v2196_v36 = vmul.f32 %v8537_v40, %v2125_v0  ;;  %v1372_v17 = vmul.f32 %v8389_v54, %v829_v38  ;;  %v832_v12 = vld [vmem:[#allocation2 + $0x120] sm:$0xff] }
 0x12c   : > { %v1511_v26 = vmul.f32 %v8426_v13, %v963_v16  ;;  %v1709_v3 = vadd.f32 %v1645_v25, %v1569_v29  ;;  %v1099_v14 = vadd.f32 %v1035_v44, %v899_v28  ;;  %v1100_v58 = vadd.f32 %v1036_v5, %v900_v41 }
 0x12d   : > { %v2197_v23 = vmul.f32 %v8537_v40, %v2126_v51  ;;  %v8589_v57 = vadd.f32 %v1646_v61, %v1570_v45  ;;  %v8592_v63 = vmul.f32 %v8383_v7, %v830_v34  ;;  %v8595_v31 = vmul.f32 %v8389_v54, %v830_v34 }
 0x12e   : > { %v1436_v15 = vadd.f32 %v1372_v17, %v8528_v55  ;;  %v8600_v24 = vadd.f32 %v8552_v21, %v2196_v36  ;;  %v8603_v19 = vmul.f32 %v8474_v33, %v830_v34  ;;  %v1235_v28 = vmul.f32 %v8369_v39, %v1163_v48  ;;  %v961_v34 = vld [vmem:[#allocation2 + $0xf1] sm:$0xff]  ;;  %v962_v36 = vld [vmem:[#allocation2 + $0xf9] sm:$0xff] }
 0x12f   : > { %v1236_v25 = vmul.f32 %v8369_v39, %v1164_v8  ;;  %v1512_v9 = vmul.f32 %v8426_v13, %v964_v60  ;;  %v1575_v59 = vadd.f32 %v1511_v26, %v8543_v10  ;;  %v1651_v55 = vmul.f32 %v8441_v52, %v1163_v48  ;;  %v827_v10 = vld [vmem:[#allocation2 + $0xf8] sm:$0xff] }
 0x130   : > { %v1788_v20 = vmul.f32 %v8474_v33, %v829_v38  ;;  %v8612_v42 = vadd.f32 %v8552_v21, %v2197_v23  ;;  %v1299_v29 = vadd.f32 %v1235_v28, %v1099_v14  ;;  %v1927_v2 = vmul.f32 %v8509_v53, %v963_v16 }
 0x131   : > { %v8614_v22 = vadd.f32 %v1236_v25, %v1100_v58  ;;  %v1576_v45 = vadd.f32 %v1512_v9, %v1436_v15  ;;  %v1928_v41 = vmul.f32 %v8509_v53, %v964_v60  ;;  %v2504_v51 = vmax.f32 %v2441_v56, %v2473_v37  ;;  %v1162_v56 = vld [vmem:[#allocation2 + $0xfa] sm:$0xff] }
 0x132   : > { %v1852_v0 = vadd.f32 %v1788_v20, %v8541_v1  ;;  %v2331_v44 = vmax.f32 %v8600_v24, 0.0  ;;  %v1652_v38 = vmul.f32 %v8441_v52, %v1164_v8  ;;  %v1991_v5 = vadd.f32 %v1927_v2, %v8545_v43 }
 0x133   : > { %v2067_v61 = vmul.f32 %v8521_v4, %v1163_v48  ;;  %v1715_v17 = vadd.f32 %v1651_v55, %v1575_v59  ;;  %v2068_v26 = vmul.f32 %v8521_v4, %v1164_v8  ;;  %2520 = vst.msk [vmem:[#allocation4 + $0x11] sm:$0xff] %vm250_vm0, %v2504_v51  ;;  %v1375_v1 = vmul.f32 %v8389_v54, %v832_v12  ;;  %v1161_v8 = vld [vmem:[#allocation2 + $0xf2] sm:$0xff]  ;;  %v623_v59 = vpop.permute.xlu0 %622 }
 0x134   : > { %v1992_v16 = vadd.f32 %v1928_v41, %v1852_v0  ;;  %v1791_v23 = vmul.f32 %v8474_v33, %v832_v12  ;;  %v898_v14 = vmul.f32 %v8383_v7, %v827_v10  ;;  %v1033_v58 = vmul.f32 %v8395_v27, %v961_v34  ;;  %776 = vst.msk [vmem:[#allocation2 + $0x1c0] sm:$0xff] %vm250_vm0, %v623_v59 }
 0x135   : > { %v2131_v60 = vadd.f32 %v2067_v61, %v1991_v5  ;;  %v8629_v49 = vadd.f32 %v1652_v38, %v1576_v45  ;;  %v8632_v48 = vmul.f32 %v8383_v7, %v832_v12  ;;  %v1034_v15 = vmul.f32 %v8395_v27, %v962_v36 }
 0x136   : > { %v2132_v43 = vadd.f32 %v2068_v26, %v1992_v16  ;;  %v1433_v25 = vadd.f32 %v8495_v11, %v8573_v50  ;;  %v1370_v37 = vmul.f32 %v8389_v54, %v827_v10  ;;  %v1509_v9 = vmul.f32 %v8426_v13, %v961_v34 }
 0x137   : > { %v2202_v28 = vmul.f32 %v8537_v40, %v2131_v60  ;;  %v8641_v20 = vadd.f32 %v1375_v1, %v1299_v29  ;;  %v1849_v2 = vadd.f32 %v8498_v30, %v1709_v3  ;;  %v1097_v12 = vadd.f32 %v1033_v58, %v8492_v47  ;;  %v967_v1 = vld [vmem:[#allocation2 + $0x121] sm:$0xff] }
 0x138   : > { %v2203_v55 = vmul.f32 %v8537_v40, %v2132_v43  ;;  %v8646_v45 = vadd.f32 %v1791_v23, %v1715_v17  ;;  %v1098_v0 = vadd.f32 %v1034_v15, %v898_v14  ;;  %v1233_v11 = vmul.f32 %v8369_v39, %v1161_v8  ;;  %v968_v43 = vld [vmem:[#allocation2 + $0x129] sm:$0xff] }
 0x139   : > { %v1434_v50 = vadd.f32 %v1370_v37, %v8579_v46  ;;  %v8651_v41 = vadd.f32 %v8552_v21, %v2202_v28  ;;  %v1234_v51 = vmul.f32 %v8369_v39, %v1162_v56  ;;  %v1510_v29 = vmul.f32 %v8426_v13, %v962_v36 }
 0x13a   : > { %v1786_v30 = vmul.f32 %v8474_v33, %v827_v10  ;;  %v8657_v47 = vadd.f32 %v8552_v21, %v2203_v55  ;;  %v2578_v3 = vld [vmem:[#allocation4 + $0x11] sm:$0xff]  ;;  %v1573_v5 = vadd.f32 %v1509_v9, %v1433_v25  ;;  %v1649_v61 = vmul.f32 %v8441_v52, %v1161_v8 }
 0x13b   : > { %v2988_v38 = vld [vmem:[#allocation4 + $0xa] sm:$0xff]  ;;  %v1925_v17 = vmul.f32 %v8509_v53, %v961_v34  ;;  %v2332_v46 = vmax.f32 %v8612_v42, 0.0  ;;  %6549 = vmatprep.mubr.msk.f32.mxu1 %vm250_vm0, %v2578_v3  ;;  %v8664_v16 = vadd.f32 %v1233_v11, %v1097_v12  ;;  %v1926_v26 = vmul.f32 %v8509_v53, %v962_v36  ;;  %v638_v3 = vpop.permute.xlu1 %637 }
 0x13c   : > { %6627 = vmatmul.mubr.msk.f32.vlgmr.msra.gmra.mrb[0].mxu0 %vm250_vm0, %v2988_v38  ;;  %v1850_v10 = vadd.f32 %v1786_v30, %v8589_v57  ;;  %v8668_v60 = vadd.f32 %v1234_v51, %v1098_v0  ;;  %v1574_v23 = vadd.f32 %v1510_v29, %v1434_v50  ;;  %v2065_v58 = vmul.f32 %v8521_v4, %v1161_v8  ;;  %v833_v34 = vld [vmem:[#allocation2 + $0x128] sm:$0xff]  ;;  %v834_v9 = vld [vmem:[#allocation2 + $0x130] sm:$0xff]  ;;  %v633_v38 = vpop.permute.xlu0 %632 }
 0x13d   : > { %v1989_v14 = vadd.f32 %v1925_v17, %v1849_v2  ;;  %v2337_v15 = vmax.f32 %v8651_v41, 0.0  ;;  %v1650_v28 = vmul.f32 %v8441_v52, %v1162_v56  ;;  %v2066_v37 = vmul.f32 %v8521_v4, %v1162_v56  ;;  %v1167_v0 = vld [vmem:[#allocation2 + $0x122] sm:$0xff]  ;;  %v1168_v11 = vld [vmem:[#allocation2 + $0x12a] sm:$0xff]  ;;  %779 = vst.msk [vmem:[#allocation2 + $0x1d8] sm:$0xff] %vm250_vm0, %v638_v3  ;;  %778 = vst.msk [vmem:[#allocation2 + $0x1d0] sm:$0xff] %vm250_vm0, %v633_v38 }
 0x13e   : > { %v1990_v25 = vadd.f32 %v1926_v26, %v1850_v10  ;;  %v2338_v57 = vmax.f32 %v8657_v47, 0.0  ;;  %v8675_v36 = vadd.f32 %v1649_v61, %v1573_v5  ;;  %v1039_v55 = vmul.f32 %v8395_v27, %v967_v1 }
 0x13f   : > { %v2129_v59 = vadd.f32 %v2065_v58, %v1989_v14  ;;  %v904_v8 = vmul.f32 %v8383_v7, %v833_v34  ;;  %v1040_v12 = vmul.f32 %v8395_v27, %v968_v43  ;;  %v1376_v50 = vmul.f32 %v8389_v54, %v833_v34 }
 0x140   : > { %v2130_v2 = vadd.f32 %v2066_v37, %v1990_v25  ;;  %v8681_v51 = vadd.f32 %v1650_v28, %v1574_v23  ;;  %v905_v29 = vmul.f32 %v8383_v7, %v834_v9  ;;  %v1515_v30 = vmul.f32 %v8426_v13, %v967_v1 }
 0x141   : > { %v2200_v56 = vmul.f32 %v8537_v40, %v2129_v59  ;;  %v8688_v61 = vmul.f32 %v8389_v54, %v834_v9  ;;  %v8691_v17 = vmul.f32 %v8474_v33, %v834_v9  ;;  %v1440_v10 = vadd.f32 %v1376_v50, %v8614_v22  ;;  %v969_v22 = vld [vmem:[#allocation2 + $0x131] sm:$0xff] }
 0x142   : > { %v2201_v5 = vmul.f32 %v8537_v40, %v2130_v2  ;;  %v1103_v23 = vadd.f32 %v1039_v55, %v8632_v48  ;;  %v1239_v14 = vmul.f32 %v8369_v39, %v1167_v0  ;;  %v1240_v58 = vmul.f32 %v8369_v39, %v1168_v11  ;;  %v648_v48 = vpop.permute.xlu1 %647  ;;  %v643_v55 = vpop.permute.xlu0 %642 }
 0x143   : > { %v2271_v26 = vadd.f32 %v8552_v21, %v2200_v56  ;;  %v1104_v25 = vadd.f32 %v1040_v12, %v904_v8  ;;  %v1516_v37 = vmul.f32 %v8426_v13, %v968_v43  ;;  %v1792_v9 = vmul.f32 %v8474_v33, %v833_v34  ;;  %781 = vst.msk [vmem:[#allocation2 + $0x1e8] sm:$0xff] %vm250_vm0, %v648_v48 }
 0x144   : > { %v2272_v28 = vadd.f32 %v8552_v21, %v2201_v5  ;;  %v1579_v2 = vadd.f32 %v1515_v30, %v8641_v20  ;;  %v1655_v50 = vmul.f32 %v8441_v52, %v1167_v0  ;;  %v1931_v56 = vmul.f32 %v8509_v53, %v967_v1  ;;  %780 = vst.msk [vmem:[#allocation2 + $0x1e0] sm:$0xff] %vm250_vm0, %v643_v55  ;;  %v835_v1 = vld [vmem:[#allocation2 + $0x138] sm:$0xff] }
 0x145   : > { %v2335_v59 = vmax.f32 %v2271_v26, 0.0  ;;  %v1580_v38 = vadd.f32 %v1516_v37, %v1440_v10  ;;  %v1856_v35 = vadd.f32 %v1792_v9, %v8629_v49  ;;  %v1932_v8 = vmul.f32 %v8509_v53, %v968_v43  ;;  %v8715_v5 = vld [vmem:[#allocation2 + $0x132] sm:$0xff] }
 0x146   : > { %v2336_v3 = vmax.f32 %v2272_v28, 0.0  ;;  %v1995_v20 = vadd.f32 %v1931_v56, %v8646_v45  ;;  %v2071_v12 = vmul.f32 %v8521_v4, %v1167_v0  ;;  %v1041_v30 = vmul.f32 %v8395_v27, %v969_v22  ;;  %v831_v28 = vld [vmem:[#allocation2 + $0x118] sm:$0xff]  ;;  %v658_v37 = vpop.permute.xlu1 %657  ;;  %v653_v9 = vpop.permute.xlu0 %652 }
 0x147   : > { %v2387_v34 = vmax.f32 %v2331_v44, %v2335_v59  ;;  %v1656_v43 = vmul.f32 %v8441_v52, %v1168_v11  ;;  %v1996_v10 = vadd.f32 %v1932_v8, %v1856_v35  ;;  %v2072_v26 = vmul.f32 %v8521_v4, %v1168_v11  ;;  %783 = vst.msk [vmem:[#allocation2 + $0x1f8] sm:$0xff] %vm250_vm0, %v658_v37  ;;  %v1166_v37 = vld [vmem:[#allocation2 + $0x11a] sm:$0xff] }
 0x148   : > { %v2388_v49 = vmax.f32 %v2332_v46, %v2336_v3  ;;  %v8722_v24 = vadd.f32 %v1239_v14, %v1103_v23  ;;  %v8724_v44 = vadd.f32 %v1240_v58, %v1104_v25  ;;  %v8726_v45 = vadd.f32 %v1655_v50, %v1579_v2  ;;  %v965_v23 = vld [vmem:[#allocation2 + $0x111] sm:$0xff]  ;;  %v966_v14 = vld [vmem:[#allocation2 + $0x119] sm:$0xff]  ;;  %782 = vst.msk [vmem:[#allocation2 + $0x1f0] sm:$0xff] %vm250_vm0, %v653_v9 }
 0x149   : > { %2419 = vst.msk [vmem:[#allocation3 + $0x50] sm:$0xff] %vm250_vm0, %v2387_v34  ;;  %v2135_v0 = vadd.f32 %v2071_v12, %v1995_v20  ;;  %v8729_v42 = vadd.f32 %v1656_v43, %v1580_v38  ;;  %v2136_v46 = vadd.f32 %v2072_v26, %v1996_v10  ;;  %v8732_v35 = vmul.f32 %v8383_v7, %v835_v1  ;;  %v1165_v3 = vld [vmem:[#allocation2 + $0x112] sm:$0xff] }
 0x14a   : > { %2420 = vst.msk [vmem:[#allocation3 + $0x58] sm:$0xff] %vm250_vm0, %v2388_v49  ;;  %v8736_v11 = vmul.f32 %v8369_v39, %v8715_v5  ;;  %v8741_v25 = vadd.f32 %v1041_v30, %v905_v29  ;;  %v8744_v59 = vmul.f32 %v8389_v54, %v835_v1  ;;  %v8747_v2 = vmul.f32 %v8426_v13, %v969_v22 }
 0x14b   : > { %v2206_v58 = vmul.f32 %v8537_v40, %v2135_v0  ;;  %v2207_v50 = vmul.f32 %v8537_v40, %v2136_v46  ;;  %v8752_v56 = vmul.f32 %v8441_v52, %v8715_v5  ;;  %v8755_v48 = vmul.f32 %v8474_v33, %v835_v1 }
 0x14c   : > { %v902_v55 = vmul.f32 %v8383_v7, %v831_v28  ;;  %v1037_v38 = vmul.f32 %v8395_v27, %v965_v23  ;;  %v1038_v8 = vmul.f32 %v8395_v27, %v966_v14  ;;  %v1374_v34 = vmul.f32 %v8389_v54, %v831_v28 }
 0x14d   : > { %v2277_v29 = vadd.f32 %v8552_v21, %v2206_v58  ;;  %v2278_v20 = vadd.f32 %v8552_v21, %v2207_v50  ;;  %v1933_v12 = vmul.f32 %v8509_v53, %v969_v22  ;;  %v1437_v30 = vadd.f32 %v8595_v31, %v8664_v16 }
 0x14e   : > { %v1513_v1 = vmul.f32 %v8426_v13, %v965_v23  ;;  %v1853_v43 = vadd.f32 %v8603_v19, %v8675_v36  ;;  %v1237_v10 = vmul.f32 %v8369_v39, %v1165_v3  ;;  %v1438_v26 = vadd.f32 %v1374_v34, %v8668_v60  ;;  %v2443_v19 = vld [vmem:[#allocation3 + $0x10] ss:$2 sm:$0xff]  ;;  %v2475_v36 = vld [vmem:[#allocation3 + $0x11] ss:$2 sm:$0xff] }
 0x14f   : > { %v2341_v49 = vmax.f32 %v2277_v29, 0.0  ;;  %v2342_v0 = vmax.f32 %v2278_v20, 0.0  ;;  %v1514_v9 = vmul.f32 %v8426_v13, %v966_v14  ;;  %v1653_v22 = vmul.f32 %v8441_v52, %v1165_v3 }
 0x150   : > { %v1577_v46 = vadd.f32 %v1513_v1, %v1437_v30  ;;  %v1101_v16 = vadd.f32 %v1037_v38, %v8592_v63  ;;  %v1102_v58 = vadd.f32 %v1038_v8, %v902_v55  ;;  %v1790_v50 = vmul.f32 %v8474_v33, %v831_v28  ;;  %v837_v38 = vld [vmem:[#allocation2 + $0x148] sm:$0xff] }
 0x151   : > { %v2389_v31 = vmax.f32 %v2337_v15, %v2341_v49  ;;  %v2390_v60 = vmax.f32 %v2338_v57, %v2342_v0  ;;  %v1578_v29 = vadd.f32 %v1514_v9, %v1438_v26  ;;  %v1929_v20 = vmul.f32 %v8509_v53, %v965_v23  ;;  %v836_v23 = vld [vmem:[#allocation2 + $0x140] sm:$0xff] }
 0x152   : > { %v1717_v34 = vadd.f32 %v1653_v22, %v1577_v46  ;;  %v1238_v30 = vmul.f32 %v8369_v39, %v1166_v37  ;;  %v1654_v41 = vmul.f32 %v8441_v52, %v1166_v37  ;;  %v1854_v63 = vadd.f32 %v1790_v50, %v8681_v51  ;;  %v970_v51 = vld [vmem:[#allocation2 + $0x139] sm:$0xff]  ;;  %v971_v0 = vld [vmem:[#allocation2 + $0x141] sm:$0xff] }
 0x153   : > { %2421 = vst.msk [vmem:[#allocation3 + $0x60] sm:$0xff] %vm250_vm0, %v2389_v31  ;;  %v1930_v15 = vmul.f32 %v8509_v53, %v966_v14  ;;  %2422 = vst.msk [vmem:[#allocation3 + $0x68] sm:$0xff] %vm250_vm0, %v2390_v60  ;;  %v1993_v47 = vadd.f32 %v1929_v20, %v1853_v43  ;;  %v2069_v57 = vmul.f32 %v8521_v4, %v1165_v3  ;;  %v10547_v3 = vmov 0.0   ;;  %v1171_v60 = vld [vmem:[#allocation2 + $0x142] sm:$0xff] }
 0x154   : > { %v1857_v28 = vadd.f32 %v8691_v17, %v1717_v34  ;;  %v2505_v55 = vmax.f32 %v2443_v19, %v2475_v36  ;;  %v2073_v8 = vmul.f32 %v8521_v4, %v8715_v5  ;;  %v1301_v1 = vadd.f32 %v1237_v10, %v1101_v16  ;;  %v1170_v36 = vld [vmem:[#allocation2 + $0x13a] sm:$0xff]  ;;  %263 = vst.msk [vmem:[#allocation5 + $0x31] sm:$0x7f] %vm258_vm2, %v10547_v3 }
 0x155   : > { %v1994_v49 = vadd.f32 %v1930_v15, %v1854_v63  ;;  %v2070_v26 = vmul.f32 %v8521_v4, %v1166_v37  ;;  %v1302_v14 = vadd.f32 %v1238_v30, %v1102_v58  ;;  %v1718_v9 = vadd.f32 %v1654_v41, %v1578_v29 }
 0x156   : > { %v1997_v46 = vadd.f32 %v1933_v12, %v1857_v28  ;;  %v2133_v22 = vadd.f32 %v2069_v57, %v1993_v47  ;;  %2521 = vst.msk [vmem:[#allocation4 + $0x19] sm:$0xff] %vm250_vm0, %v2505_v55  ;;  %v1380_v5 = vmul.f32 %v8389_v54, %v837_v38  ;;  %v1796_v43 = vmul.f32 %v8474_v33, %v837_v38 }
 0x157   : > { %v2134_v17 = vadd.f32 %v2070_v26, %v1994_v49  ;;  %2536 = vst.msk [vmem:[#allocation4 + $0x19] sm:$0x1] %vm253_vm1, %v10547_v3  ;;  %2544 = vst.msk [vmem:[#allocation4 + $0x20] sm:$0x1] %vm253_vm1, %v10547_v3  ;;  %v907_v10 = vmul.f32 %v8383_v7, %v836_v23  ;;  %v1042_v12 = vmul.f32 %v8395_v27, %v970_v51 }
 0x158   : > { %v2137_v37 = vadd.f32 %v2073_v8, %v1997_v46  ;;  %v2204_v31 = vmul.f32 %v8537_v40, %v2133_v22  ;;  %v1043_v16 = vmul.f32 %v8395_v27, %v971_v0  ;;  %v8804_v58 = vadd.f32 %v8736_v11, %v8741_v25 }
 0x159   : > { %v1441_v50 = vadd.f32 %v8688_v61, %v1301_v1  ;;  %v2205_v19 = vmul.f32 %v8537_v40, %v2134_v17  ;;  %v1379_v29 = vmul.f32 %v8389_v54, %v836_v23  ;;  %v908_v30 = vmul.f32 %v8383_v7, %v837_v38  ;;  %v2445_v38 = vld [vmem:[#allocation3 + $0x20] ss:$2 sm:$0xff] }
 0x15a   : > { %v2208_v34 = vmul.f32 %v8537_v40, %v2137_v37  ;;  %v2275_v20 = vadd.f32 %v8552_v21, %v2204_v31  ;;  %v1442_v41 = vadd.f32 %v8744_v59, %v1302_v14  ;;  %v8814_v63 = vadd.f32 %v1380_v5, %v8724_v44  ;;  %v2477_v14 = vld [vmem:[#allocation3 + $0x21] ss:$2 sm:$0xff] }
 0x15b   : > { %v8817_v11 = vadd.f32 %v1796_v43, %v8729_v42  ;;  %v1858_v61 = vadd.f32 %v8755_v48, %v1718_v9  ;;  %v1106_v25 = vadd.f32 %v1042_v12, %v8732_v35  ;;  %v1107_v28 = vadd.f32 %v1043_v16, %v907_v10  ;;  %v839_v43 = vld [vmem:[#allocation2 + $0x158] sm:$0xff]  ;;  %v972_v10 = vld [vmem:[#allocation2 + $0x149] sm:$0xff] }
 0x15c   : > { %v2279_v15 = vadd.f32 %v8552_v21, %v2208_v34  ;;  %v1242_v47 = vmul.f32 %v8369_v39, %v1170_v36  ;;  %v1243_v57 = vmul.f32 %v8369_v39, %v1171_v60  ;;  %v8825_v55 = vadd.f32 %v8552_v21, %v2205_v19  ;;  %v838_v12 = vld [vmem:[#allocation2 + $0x150] sm:$0xff]  ;;  %v668_v34 = vpop.permute.xlu1 %667 }
 0x15d   : > { %v1443_v44 = vadd.f32 %v1379_v29, %v8722_v24  ;;  %v1518_v59 = vmul.f32 %v8426_v13, %v970_v51  ;;  %v1519_v42 = vmul.f32 %v8426_v13, %v971_v0  ;;  %v2339_v48 = vmax.f32 %v2275_v20, 0.0  ;;  %v973_v16 = vld [vmem:[#allocation2 + $0x151] sm:$0xff]  ;;  %v663_v20 = vpop.permute.xlu0 %662  ;;  %785 = vst.msk [vmem:[#allocation2 + $0x208] sm:$0xff] %vm250_vm0, %v668_v34 }
 0x15e   : > { %v2343_v8 = vmax.f32 %v2279_v15, 0.0  ;;  %v2579_v35 = vld [vmem:[#allocation4 + $0x19] sm:$0xff]  ;;  %v1795_v49 = vmul.f32 %v8474_v33, %v836_v23  ;;  %v1934_v26 = vmul.f32 %v8509_v53, %v970_v51  ;;  %v1306_v39 = vadd.f32 %v1242_v47, %v1106_v25  ;;  %784 = vst.msk [vmem:[#allocation2 + $0x200] sm:$0xff] %vm250_vm0, %v663_v20 }
 0x15f   : > { %v2989_v1 = vld [vmem:[#allocation4 + $0x12] sm:$0xff]  ;;  %6550 = vmatmul.mubr.msk.f32.gmra.mrb[2].mxu1 %vm250_vm0, %v2579_v35  ;;  %v1582_v24 = vadd.f32 %v1518_v59, %v1442_v41  ;;  %v1935_v9 = vmul.f32 %v8509_v53, %v971_v0  ;;  %v2074_v5 = vmul.f32 %v8521_v4, %v1170_v36  ;;  %v8837_v23 = vadd.f32 %v1243_v57, %v1107_v28  ;;  %v1172_v57 = vld [vmem:[#allocation2 + $0x14a] sm:$0xff] }
 0x160   : > { %6629 = vmatprep.mubr.msk.f32.mxu0 %vm250_vm0, %v2989_v1  ;;  %v2391_v46 = vmax.f32 %v2339_v48, %v2343_v8  ;;  %v1859_v22 = vadd.f32 %v1795_v49, %v8726_v45  ;;  %v1998_v17 = vadd.f32 %v1934_v26, %v1858_v61  ;;  %v1583_v51 = vadd.f32 %v1519_v42, %v1443_v44  ;;  %v1173_v48 = vld [vmem:[#allocation2 + $0x152] sm:$0xff]  ;;  %v678_v1 = vpop.permute.xlu1 %677 }
 0x161   : > { %v1658_v37 = vmul.f32 %v8441_v52, %v1170_v36  ;;  %v2506_v31 = vmax.f32 %v2445_v38, %v2477_v14  ;;  %v1659_v0 = vmul.f32 %v8441_v52, %v1171_v60  ;;  %v2075_v45 = vmul.f32 %v8521_v4, %v1171_v60  ;;  %v673_v49 = vpop.permute.xlu0 %672  ;;  %787 = vst.msk [vmem:[#allocation2 + $0x218] sm:$0xff] %vm250_vm0, %v678_v1 }
 0x162   : > { %2423 = vst.msk [vmem:[#allocation3 + $0x70] sm:$0xff] %vm250_vm0, %v2391_v46  ;;  %v1999_v19 = vadd.f32 %v1935_v9, %v1859_v22  ;;  %v2138_v29 = vadd.f32 %v2074_v5, %v1998_v17  ;;  %v1382_v61 = vmul.f32 %v8389_v54, %v839_v43  ;;  %v1581_v36 = vadd.f32 %v8747_v2, %v1441_v50 }
 0x163   : > { %v1722_v41 = vadd.f32 %v1658_v37, %v1582_v24  ;;  %2522 = vst.msk [vmem:[#allocation4 + $0x21] sm:$0xff] %vm250_vm0, %v2506_v31  ;;  %v1044_v25 = vmul.f32 %v8395_v27, %v972_v10  ;;  %v909_v60 = vmul.f32 %v8383_v7, %v838_v12  ;;  %v1045_v47 = vmul.f32 %v8395_v27, %v973_v16 }
 0x164   : > { %v2139_v15 = vadd.f32 %v2075_v45, %v1999_v19  ;;  %v2209_v28 = vmul.f32 %v8537_v40, %v2138_v29  ;;  %v2340_v44 = vmax.f32 %v8825_v55, 0.0  ;;  %v8853_v59 = vadd.f32 %v1659_v0, %v1583_v51  ;;  %786 = vst.msk [vmem:[#allocation2 + $0x210] sm:$0xff] %vm250_vm0, %v673_v49  ;;  %v840_v0 = vld [vmem:[#allocation2 + $0x160] sm:$0xff] }
 0x165   : > { %v1798_v2 = vmul.f32 %v8474_v33, %v839_v43  ;;  %v1108_v50 = vadd.f32 %v1044_v25, %v908_v30  ;;  %v910_v38 = vmul.f32 %v8383_v7, %v839_v43  ;;  %v1381_v8 = vmul.f32 %v8389_v54, %v838_v12  ;;  %v8868_v30 = vld [vmem:[%s10537_s1 + $0x2] ss:$0 sm:$0xff]  ;;  %v974_v45 = vld [vmem:[#allocation2 + $0x159] sm:$0xff]  ;;  %v8920_v49 = vld [vmem:[%s10537_s1 + $0x4] ss:$0 sm:$0xff] }
 0x166   : > { %v2280_v42 = vadd.f32 %v8552_v21, %v2209_v28  ;;  %v1520_v35 = vmul.f32 %v8426_v13, %v972_v10  ;;  %v8860_v27 = vadd.f32 %v1382_v61, %v1306_v39  ;;  %v1721_v55 = vadd.f32 %v8752_v56, %v1581_v36  ;;  %v975_v29 = vld [vmem:[#allocation2 + $0x161] sm:$0xff] }
 0x167   : > { %v8862_v26 = vadd.f32 %v1798_v2, %v1722_v41  ;;  %v1244_v7 = vmul.f32 %v8868_v30, %v1172_v57  ;;  %v2210_v54 = vmul.f32 %v8537_v40, %v2139_v15  ;;  %v1109_v39 = vadd.f32 %v1045_v47, %v909_v60  ;;  %v8903_v15 = vld [vmem:[%s10537_s1 + $0x3] ss:$0 sm:$0xff]  ;;  %v8909_v60 = vld [vmem:[%s10537_s1 + $0x1] ss:$0 sm:$0xff] }
 0x168   : > { %v2344_v14 = vmax.f32 %v2280_v42, 0.0  ;;  %v1445_v24 = vadd.f32 %v1381_v8, %v8804_v58  ;;  %v1245_v9 = vmul.f32 %v8868_v30, %v1173_v48  ;;  %v1797_v46 = vmul.f32 %v8474_v33, %v838_v12  ;;  %v1174_v42 = vld [vmem:[#allocation2 + $0x15a] sm:$0xff] }
 0x169   : > { %v1308_v56 = vadd.f32 %v1244_v7, %v1108_v50  ;;  %v1936_v22 = vmul.f32 %v8509_v53, %v972_v10  ;;  %v1521_v51 = vmul.f32 %v8426_v13, %v973_v16  ;;  %v1584_v37 = vadd.f32 %v1520_v35, %v8814_v63  ;;  %v841_v10 = vld [vmem:[#allocation2 + $0x168] sm:$0xff]  ;;  %v688_v7 = vpop.permute.xlu1 %687 }
 0x16a   : > { %v2392_v17 = vmax.f32 %v2340_v44, %v2344_v14  ;;  %v2580_v5 = vld [vmem:[#allocation4 + $0x21] sm:$0xff]  ;;  %v1937_v31 = vmul.f32 %v8509_v53, %v973_v16  ;;  %v1861_v58 = vadd.f32 %v1797_v46, %v1721_v55  ;;  %v2076_v12 = vmul.f32 %v8521_v4, %v1172_v57  ;;  %789 = vst.msk [vmem:[#allocation2 + $0x228] sm:$0xff] %vm250_vm0, %v688_v7 }
 0x16b   : > { %v2990_v43 = vld [vmem:[#allocation4 + $0x1a] sm:$0xff]  ;;  %6552 = vmatprep.mubr.msk.f32.mxu1 %vm250_vm0, %v2580_v5  ;;  %v2000_v19 = vadd.f32 %v1936_v22, %v8817_v11  ;;  %v8886_v34 = vadd.f32 %v8552_v21, %v2210_v54  ;;  %v8889_v13 = vadd.f32 %v1245_v9, %v1109_v39  ;;  %v1585_v63 = vadd.f32 %v1521_v51, %v1445_v24  ;;  %v1175_v35 = vld [vmem:[#allocation2 + $0x162] sm:$0xff]  ;;  %v683_v54 = vpop.permute.xlu0 %682 }
 0x16c   : > { %6630 = vmatmul.mubr.msk.f32.gmra.mrb[2].mxu0 %vm250_vm0, %v2990_v43  ;;  %2424 = vst.msk [vmem:[#allocation3 + $0x78] sm:$0xff] %vm250_vm0, %v2392_v17  ;;  %v1660_v16 = vmul.f32 %v8441_v52, %v1172_v57  ;;  %v2001_v20 = vadd.f32 %v1937_v31, %v1861_v58  ;;  %v2077_v41 = vmul.f32 %v8521_v4, %v1173_v48  ;;  %v8896_v11 = vld [vmem:[%s10537_s1] ss:$0 sm:$0xff]  ;;  %788 = vst.msk [vmem:[#allocation2 + $0x220] sm:$0xff] %vm250_vm0, %v683_v54 }
 0x16d   : > { %v2140_v61 = vadd.f32 %v2076_v12, %v2000_v19  ;;  %v911_v36 = vmul.f32 %v8896_v11, %v840_v0  ;;  %v1661_v25 = vmul.f32 %v8441_v52, %v1173_v48  ;;  %v1384_v28 = vmul.f32 %v8903_v15, %v841_v10  ;;  %v843_v12 = vld [vmem:[#allocation2 + $0x178] sm:$0xff] }
 0x16e   : > { %v1046_v47 = vmul.f32 %v8909_v60, %v974_v45  ;;  %v1047_v57 = vmul.f32 %v8909_v60, %v975_v29  ;;  %v1724_v44 = vadd.f32 %v1660_v16, %v1584_v37  ;;  %v2141_v2 = vadd.f32 %v2077_v41, %v2001_v20 }
 0x16f   : > { %v2211_v52 = vmul.f32 %v8537_v40, %v2140_v61  ;;  %v1800_v50 = vmul.f32 %v8474_v33, %v841_v10  ;;  %v2345_v48 = vmax.f32 %v8886_v34, 0.0  ;;  %v1383_v1 = vmul.f32 %v8903_v15, %v840_v0  ;;  %v9021_v34 = vld [vmem:[%s10540_s4] ss:$0 sm:$0xff] }
 0x170   : > { %v1110_v8 = vadd.f32 %v1046_v47, %v910_v38  ;;  %v1522_v55 = vmul.f32 %v8920_v49, %v974_v45  ;;  %v8923_v14 = vadd.f32 %v1661_v25, %v1585_v63  ;;  %v2212_v39 = vmul.f32 %v8537_v40, %v2141_v2  ;;  %v8966_v2 = vld [vmem:[%s10537_s1 + $0x6] ss:$0 sm:$0xff] }
 0x171   : > { %v912_v24 = vmul.f32 %v8896_v11, %v841_v10  ;;  %v1111_v9 = vadd.f32 %v1047_v57, %v911_v36  ;;  %v8930_v38 = vadd.f32 %v8552_v21, %v2211_v52  ;;  %v8932_v46 = vadd.f32 %v1384_v28, %v1308_v56  ;;  %v8945_v56 = vld [vmem:[%s10537_s1 + $0x5] ss:$0 sm:$0xff]  ;;  %v976_v10 = vld [vmem:[#allocation2 + $0x169] sm:$0xff] }
 0x172   : > { %v1246_v22 = vmul.f32 %v8868_v30, %v1174_v42  ;;  %v1447_v17 = vadd.f32 %v1383_v1, %v8837_v23  ;;  %v8936_v5 = vadd.f32 %v1800_v50, %v1724_v44  ;;  %v1247_v43 = vmul.f32 %v8868_v30, %v1175_v35  ;;  %v842_v36 = vld [vmem:[#allocation2 + $0x170] sm:$0xff]  ;;  %v698_v50 = vpop.permute.xlu1 %697 }
 0x173   : > { %v1523_v51 = vmul.f32 %v8920_v49, %v975_v29  ;;  %v1799_v37 = vmul.f32 %v8474_v33, %v840_v0  ;;  %v1586_v58 = vadd.f32 %v1522_v55, %v8860_v27  ;;  %v1662_v19 = vmul.f32 %v8945_v56, %v1174_v42  ;;  %v1176_v52 = vld [vmem:[#allocation2 + $0x16a] sm:$0xff]  ;;  %791 = vst.msk [vmem:[#allocation2 + $0x238] sm:$0xff] %vm250_vm0, %v698_v50  ;;  %v844_v50 = vld [vmem:[#allocation2 + $0x180] sm:$0xff] }
 0x174   : > { %v1310_v31 = vadd.f32 %v1246_v22, %v1110_v8  ;;  %v1938_v23 = vmul.f32 %v8509_v53, %v974_v45  ;;  %v8950_v63 = vadd.f32 %v8552_v21, %v2212_v39  ;;  %v8952_v16 = vadd.f32 %v1247_v43, %v1111_v9  ;;  %v977_v45 = vld [vmem:[#allocation2 + $0x171] sm:$0xff] }
 0x175   : > { %v1863_v33 = vadd.f32 %v1799_v37, %v8853_v59  ;;  %v1939_v27 = vmul.f32 %v8509_v53, %v975_v29  ;;  %v2346_v0 = vmax.f32 %v8930_v38, 0.0  ;;  %v1587_v20 = vadd.f32 %v1523_v51, %v1447_v17 }
 0x176   : > { %v2002_v41 = vadd.f32 %v1938_v23, %v8862_v26  ;;  %v2078_v61 = vmul.f32 %v8521_v4, %v1174_v42  ;;  %v2079_v28 = vmul.f32 %v8521_v4, %v1175_v35  ;;  %v1386_v47 = vmul.f32 %v8903_v15, %v843_v12  ;;  %v693_v42 = vpop.permute.xlu0 %692  ;;  %v708_v23 = vpop.permute.xlu1 %707 }
 0x177   : > { %v2003_v25 = vadd.f32 %v1939_v27, %v1863_v33  ;;  %v1048_v57 = vmul.f32 %v8909_v60, %v976_v10  ;;  %v1663_v59 = vmul.f32 %v8945_v56, %v1175_v35  ;;  %v1726_v44 = vadd.f32 %v1662_v19, %v1586_v58  ;;  %v1177_v35 = vld [vmem:[#allocation2 + $0x172] sm:$0xff]  ;;  %790 = vst.msk [vmem:[#allocation2 + $0x230] sm:$0xff] %vm250_vm0, %v693_v42  ;;  %v979_v42 = vld [vmem:[#allocation2 + $0x181] sm:$0xff] }
 0x178   : > { %v2142_v29 = vadd.f32 %v2078_v61, %v2002_v41  ;;  %v1802_v26 = vmul.f32 %v8966_v2, %v843_v12  ;;  %v2347_v4 = vmax.f32 %v8950_v63, 0.0  ;;  %v913_v1 = vmul.f32 %v8896_v11, %v842_v36  ;;  %v2479_v61 = vld [vmem:[#allocation3 + $0x31] ss:$2 sm:$0xff] }
 0x179   : > { %v2143_v8 = vadd.f32 %v2079_v28, %v2003_v25  ;;  %v1049_v55 = vmul.f32 %v8909_v60, %v977_v45  ;;  %v8974_v7 = vadd.f32 %v1663_v59, %v1587_v20  ;;  %v1112_v54 = vadd.f32 %v1048_v57, %v912_v24  ;;  %v978_v59 = vld [vmem:[#allocation2 + $0x179] sm:$0xff] }
 0x17a   : > { %v1385_v39 = vmul.f32 %v8903_v15, %v842_v36  ;;  %v1524_v9 = vmul.f32 %v8920_v49, %v976_v10  ;;  %v914_v17 = vmul.f32 %v8896_v11, %v843_v12  ;;  %v8980_v43 = vadd.f32 %v1386_v47, %v1310_v31  ;;  %v703_v33 = vpop.permute.xlu0 %702  ;;  %v2447_v12 = vld [vmem:[#allocation3 + $0x30] ss:$2 sm:$0xff] }
 0x17b   : > { %v2214_v22 = vmul.f32 %v8537_v40, %v2143_v8  ;;  %v1248_v51 = vmul.f32 %v8868_v30, %v1176_v52  ;;  %v2213_v37 = vmul.f32 %v8537_v40, %v2142_v29  ;;  %v8984_v58 = vadd.f32 %v1802_v26, %v1726_v44  ;;  %792 = vst.msk [vmem:[#allocation2 + $0x240] sm:$0xff] %vm250_vm0, %v703_v33  ;;  %v1178_v23 = vld [vmem:[#allocation2 + $0x17a] sm:$0xff] }
 0x17c   : > { %v1249_v19 = vmul.f32 %v8868_v30, %v1177_v35  ;;  %v1449_v24 = vadd.f32 %v1385_v39, %v8889_v13  ;;  %v1113_v20 = vadd.f32 %v1049_v55, %v913_v1  ;;  %v1801_v41 = vmul.f32 %v8966_v2, %v842_v36  ;;  %v8997_v13 = vld [vmem:[%s10537_s1 + $0x7] ss:$0 sm:$0xff]  ;;  %v9033_v33 = vld [vmem:[%s10541_s5] ss:$0 sm:$0xff] }
 0x17d   : > { %v2285_v27 = vadd.f32 %v8552_v21, %v2214_v22  ;;  %v1940_v31 = vmul.f32 %v8509_v53, %v976_v10  ;;  %v1312_v40 = vadd.f32 %v1248_v51, %v1112_v54  ;;  %v1525_v25 = vmul.f32 %v8920_v49, %v977_v45  ;;  %v9005_v10 = vld [vmem:[%s10537_s1 + $0x8] ss:$0 sm:$0xff] }
 0x17e   : > { %v1588_v28 = vadd.f32 %v1524_v9, %v8932_v46  ;;  %v1941_v21 = vmul.f32 %v8997_v13, %v977_v45  ;;  %v1865_v36 = vadd.f32 %v1801_v41, %v8923_v14  ;;  %v2080_v57 = vmul.f32 %v9005_v10, %v1176_v52  ;;  %v845_v46 = vld [vmem:[#allocation2 + $0x188] sm:$0xff]  ;;  %v718_v14 = vpop.permute.xlu1 %717  ;;  %v713_v8 = vpop.permute.xlu0 %712 }
 0x17f   : > { %v2349_v47 = vmax.f32 %v2285_v27, 0.0  ;;  %v2004_v53 = vadd.f32 %v1940_v31, %v8936_v5  ;;  %v1589_v44 = vadd.f32 %v1525_v25, %v1449_v24  ;;  %v1664_v29 = vmul.f32 %v8945_v56, %v1176_v52 }
 0x180   : > { %v1665_v26 = vmul.f32 %v8945_v56, %v1177_v35  ;;  %v2507_v45 = vmax.f32 %v2447_v12, %v2479_v61  ;;  %v2005_v1 = vadd.f32 %v1941_v21, %v1865_v36  ;;  %v2081_v55 = vmul.f32 %v9005_v10, %v1177_v35  ;;  %v1179_v61 = vld [vmem:[#allocation2 + $0x182] sm:$0xff] }
 0x181   : > { %v2393_v5 = vmax.f32 %v2345_v48, %v2349_v47  ;;  %v2144_v54 = vadd.f32 %v2080_v57, %v2004_v53  ;;  %v1728_v39 = vadd.f32 %v1664_v29, %v1588_v28  ;;  %v1388_v9 = vmul.f32 %v8903_v15, %v845_v46 }
 0x182   : > { %2523 = vst.msk [vmem:[#allocation4 + $0x29] sm:$0xff] %vm250_vm0, %v2507_v45  ;;  %v1804_v52 = vmul.f32 %v8966_v2, %v845_v46  ;;  %v1050_v22 = vmul.f32 %v8909_v60, %v978_v59  ;;  %v2145_v51 = vadd.f32 %v2081_v55, %v2005_v1  ;;  %v915_v35 = vmul.f32 %v8896_v11, %v844_v50 }
 0x183   : > { %2425 = vst.msk [vmem:[#allocation3 + $0x80] sm:$0xff] %vm250_vm0, %v2393_v5  ;;  %v2215_v48 = vmul.f32 %v9021_v34, %v2144_v54  ;;  %v1051_v24 = vmul.f32 %v8909_v60, %v979_v42  ;;  %v9036_v27 = vadd.f32 %v9033_v33, %v2213_v37  ;;  %v9038_v41 = vadd.f32 %v1249_v19, %v1113_v20  ;;  %v847_v54 = vld [vmem:[#allocation2 + $0x198] sm:$0xff] }
 0x184   : > { %2537 = vst.msk [vmem:[#allocation4 + $0x29] sm:$0x1] %vm253_vm1, %v10547_v3  ;;  %2545 = vst.msk [vmem:[#allocation4 + $0x30] sm:$0x1] %vm253_vm1, %v10547_v3  ;;  %v9040_v31 = vadd.f32 %v1665_v26, %v1589_v44  ;;  %v1114_v12 = vadd.f32 %v1050_v22, %v914_v17  ;;  %v2216_v25 = vmul.f32 %v9021_v34, %v2145_v51 }
 0x185   : > { %v2286_v28 = vadd.f32 %v9033_v33, %v2215_v48  ;;  %v1387_v21 = vmul.f32 %v8903_v15, %v844_v50  ;;  %v1526_v47 = vmul.f32 %v8920_v49, %v978_v59  ;;  %v916_v36 = vmul.f32 %v8896_v11, %v845_v46  ;;  %v2449_v46 = vld [vmem:[#allocation3 + $0x40] ss:$2 sm:$0xff]  ;;  %v981_v48 = vld [vmem:[#allocation2 + $0x191] sm:$0xff] }
 0x186   : > { %v9047_v53 = vadd.f32 %v1388_v9, %v1312_v40  ;;  %v9049_v37 = vadd.f32 %v1804_v52, %v1728_v39  ;;  %v1250_v19 = vmul.f32 %v8868_v30, %v1178_v23  ;;  %v2287_v20 = vadd.f32 %v9033_v33, %v2216_v25  ;;  %v2481_v40 = vld [vmem:[#allocation3 + $0x41] ss:$2 sm:$0xff]  ;;  %v846_v39 = vld [vmem:[#allocation2 + $0x190] sm:$0xff] }
 0x187   : > { %v2350_v17 = vmax.f32 %v2286_v28, 0.0  ;;  %v1115_v57 = vadd.f32 %v1051_v24, %v915_v35  ;;  %v1251_v44 = vmul.f32 %v8868_v30, %v1179_v61  ;;  %v1451_v26 = vadd.f32 %v1387_v21, %v8952_v16  ;;  %v980_v9 = vld [vmem:[#allocation2 + $0x189] sm:$0xff] }
 0x188   : > { %v1314_v29 = vadd.f32 %v1250_v19, %v1114_v12  ;;  %v1803_v45 = vmul.f32 %v8966_v2, %v844_v50  ;;  %v1942_v14 = vmul.f32 %v8997_v13, %v978_v59  ;;  %v2351_v8 = vmax.f32 %v2287_v20, 0.0  ;;  %v1180_v25 = vld [vmem:[#allocation2 + $0x18a] sm:$0xff]  ;;  %v1181_v19 = vld [vmem:[#allocation2 + $0x192] sm:$0xff] }
 0x189   : > { %v2394_v5 = vmax.f32 %v2346_v0, %v2350_v17  ;;  %v1527_v1 = vmul.f32 %v8920_v49, %v979_v42  ;;  %v1590_v55 = vadd.f32 %v1526_v47, %v8980_v43  ;;  %v1943_v50 = vmul.f32 %v8997_v13, %v979_v42 }
 0x18a   : > { %v1867_v16 = vadd.f32 %v1803_v45, %v8974_v7  ;;  %v2006_v59 = vadd.f32 %v1942_v14, %v8984_v58  ;;  %v2082_v51 = vmul.f32 %v9005_v10, %v1178_v23  ;;  %v2348_v38 = vmax.f32 %v9036_v27, 0.0 }
 0x18b   : > { %v2581_v52 = vld [vmem:[#allocation4 + $0x29] sm:$0xff]  ;;  %v2395_v0 = vmax.f32 %v2347_v4, %v2351_v8  ;;  %2426 = vst.msk [vmem:[#allocation3 + $0x88] sm:$0xff] %vm250_vm0, %v2394_v5  ;;  %v1666_v7 = vmul.f32 %v8945_v56, %v1178_v23  ;;  %v2508_v43 = vmax.f32 %v2449_v46, %v2481_v40  ;;  %v1591_v42 = vadd.f32 %v1527_v1, %v1451_v26 }
 0x18c   : > { %v2991_v22 = vld [vmem:[#allocation4 + $0x22] sm:$0xff]  ;;  %6553 = vmatmul.mubr.msk.f32.gmra.mrb[4].mxu1 %vm250_vm0, %v2581_v52  ;;  %v2007_v35 = vadd.f32 %v1943_v50, %v1867_v16  ;;  %v2083_v58 = vmul.f32 %v9005_v10, %v1179_v61  ;;  %v2146_v24 = vadd.f32 %v2082_v51, %v2006_v59  ;;  %v1390_v63 = vmul.f32 %v8903_v15, %v847_v54 }
 0x18d   : > { %6632 = vmatprep.mubr.msk.f32.mxu0 %vm250_vm0, %v2991_v22  ;;  %2427 = vst.msk [vmem:[#allocation3 + $0x90] sm:$0xff] %vm250_vm0, %v2395_v0  ;;  %2524 = vst.msk [vmem:[#allocation4 + $0x31] sm:$0xff] %vm250_vm0, %v2508_v43  ;;  %v917_v4 = vmul.f32 %v8896_v11, %v846_v39  ;;  %v1052_v27 = vmul.f32 %v8909_v60, %v980_v9  ;;  %v1053_v12 = vmul.f32 %v8909_v60, %v981_v48 }
 0x18e   : > { %v1730_v23 = vadd.f32 %v1666_v7, %v1590_v55  ;;  %v2147_v28 = vadd.f32 %v2083_v58, %v2007_v35  ;;  %v2217_v21 = vmul.f32 %v9021_v34, %v2146_v24  ;;  %v1806_v47 = vmul.f32 %v8966_v2, %v847_v54  ;;  %v982_v24 = vld [vmem:[#allocation2 + $0x199] sm:$0xff] }
 0x18f   : > { %v9081_v20 = vadd.f32 %v1251_v44, %v1115_v57  ;;  %v1667_v17 = vmul.f32 %v8945_v56, %v1179_v61  ;;  %v1116_v26 = vadd.f32 %v1052_v27, %v916_v36  ;;  %v1117_v45 = vadd.f32 %v1053_v12, %v917_v4 }
 0x190   : > { %v2288_v14 = vadd.f32 %v9033_v33, %v2217_v21  ;;  %v1252_v46 = vmul.f32 %v8868_v30, %v1180_v25  ;;  %v1389_v40 = vmul.f32 %v8903_v15, %v846_v39  ;;  %v1528_v8 = vmul.f32 %v8920_v49, %v980_v9 }
 0x191   : > { %v9088_v5 = vadd.f32 %v1667_v17, %v1591_v42  ;;  %v918_v1 = vmul.f32 %v8896_v11, %v847_v54  ;;  %v9091_v55 = vadd.f32 %v1390_v63, %v1314_v29  ;;  %v1253_v57 = vmul.f32 %v8868_v30, %v1181_v19  ;;  %v5950_v29 = vld [vmem:[%s10538_s2 + $0xc0] sm:$0xff]  ;;  %v5951_v54 = vld [vmem:[%s10538_s2 + $0xc8] sm:$0xff] }
 0x192   : > { %v2218_v61 = vmul.f32 %v9021_v34, %v2147_v28  ;;  %v2352_v36 = vmax.f32 %v2288_v14, 0.0  ;;  %v9095_v44 = vadd.f32 %v1806_v47, %v1730_v23  ;;  %v1316_v52 = vadd.f32 %v1252_v46, %v1116_v26  ;;  %v983_v63 = vld [vmem:[#allocation2 + $0x1a1] sm:$0xff] }
 0x193   : > { %v9097_v22 = vadd.f32 %v1253_v57, %v1117_v45  ;;  %v1453_v16 = vadd.f32 %v1389_v40, %v9038_v41  ;;  %v1805_v50 = vmul.f32 %v8966_v2, %v846_v39  ;;  %v1944_v59 = vmul.f32 %v8997_v13, %v980_v9  ;;  %v849_v39 = vld [vmem:[#allocation2 + $0x1a8] sm:$0xff]  ;;  %v1182_v46 = vld [vmem:[#allocation2 + $0x19a] sm:$0xff] }
 0x194   : > { %v2396_v51 = vmax.f32 %v2348_v38, %v2352_v36  ;;  %v2582_v0 = vld [vmem:[#allocation4 + $0x31] sm:$0xff]  ;;  %v1529_v43 = vmul.f32 %v8920_v49, %v981_v48  ;;  %v1592_v42 = vadd.f32 %v1528_v8, %v9047_v53  ;;  %v1945_v41 = vmul.f32 %v8997_v13, %v981_v48  ;;  %v848_v38 = vld [vmem:[#allocation2 + $0x1a0] sm:$0xff] }
 0x195   : > { %v2992_v7 = vld [vmem:[#allocation4 + $0x2a] sm:$0xff]  ;;  %6555 = vmatprep.mubr.msk.f32.mxu1 %vm250_vm0, %v2582_v0  ;;  %v1869_v9 = vadd.f32 %v1805_v50, %v9040_v31  ;;  %v2008_v35 = vadd.f32 %v1944_v59, %v9049_v37  ;;  %v2084_v58 = vmul.f32 %v9005_v10, %v1180_v25  ;;  %v9117_v4 = vadd.f32 %v9033_v33, %v2218_v61  ;;  %v1183_v40 = vld [vmem:[#allocation2 + $0x1a2] sm:$0xff] }
 0x196   : > { %6633 = vmatmul.mubr.msk.f32.gmra.mrb[4].mxu0 %vm250_vm0, %v2992_v7  ;;  %2428 = vst.msk [vmem:[#allocation3 + $0x98] sm:$0xff] %vm250_vm0, %v2396_v51  ;;  %v1668_v53 = vmul.f32 %v8945_v56, %v1180_v25  ;;  %v1669_v48 = vmul.f32 %v8945_v56, %v1181_v19  ;;  %v7136_v27 = vpack.c.bf16 %v5951_v54, %v5950_v29 }
 0x197   : > { %v1593_v12 = vadd.f32 %v1529_v43, %v1453_v16  ;;  %v2009_v23 = vadd.f32 %v1945_v41, %v1869_v9  ;;  %v2085_v31 = vmul.f32 %v9005_v10, %v1181_v19  ;;  %v2148_v37 = vadd.f32 %v2084_v58, %v2008_v35  ;;  %v5953_v41 = vld [vmem:[%s10538_s2 + $0xd8] sm:$0xff] }
 0x198   : > { %7137 = vmatprep.subr.bf16.mxu0 %v7136_v27  ;;  %v1392_v28 = vmul.f32 %v8903_v15, %v849_v39  ;;  %v919_v21 = vmul.f32 %v8896_v11, %v848_v38  ;;  %v1054_v47 = vmul.f32 %v8909_v60, %v982_v24  ;;  %v1055_v17 = vmul.f32 %v8909_v60, %v983_v63  ;;  %v851_v58 = vld [vmem:[#allocation2 + $0x1b8] sm:$0xff] }
 0x199   : > { %v1732_v26 = vadd.f32 %v1668_v53, %v1592_v42  ;;  %v2149_v45 = vadd.f32 %v2085_v31, %v2009_v23  ;;  %v2219_v25 = vmul.f32 %v9021_v34, %v2148_v37  ;;  %v1808_v14 = vmul.f32 %v8966_v2, %v849_v39  ;;  %7139 = vmatpush3.bf16.msra.mxu0 %v7136_v27 }
 0x19a   : > { %v2353_v19 = vmax.f32 %v9117_v4, 0.0  ;;  %v1118_v8 = vadd.f32 %v1054_v47, %v918_v1  ;;  %v1119_v57 = vadd.f32 %v1055_v17, %v919_v21  ;;  %v1391_v61 = vmul.f32 %v8903_v15, %v848_v38  ;;  %v985_v21 = vld [vmem:[#allocation2 + $0x1b1] sm:$0xff] }
 0x19b   : > { %v9131_v36 = vadd.f32 %v1669_v48, %v1593_v12  ;;  %v2220_v16 = vmul.f32 %v9021_v34, %v2149_v45  ;;  %v920_v50 = vmul.f32 %v8896_v11, %v849_v39  ;;  %v1530_v59 = vmul.f32 %v8920_v49, %v982_v24  ;;  %v984_v12 = vld [vmem:[#allocation2 + $0x1a9] sm:$0xff] }
 0x19c   : > { %v9136_v29 = vadd.f32 %v1392_v28, %v1316_v52  ;;  %v1254_v54 = vmul.f32 %v8868_v30, %v1182_v46  ;;  %v1255_v51 = vmul.f32 %v8868_v30, %v1183_v40  ;;  %v1455_v0 = vadd.f32 %v1391_v61, %v9081_v20  ;;  %v5952_v52 = vld [vmem:[%s10538_s2 + $0xd0] sm:$0xff] }
 0x19d   : > { %v9142_v1 = vadd.f32 %v9033_v33, %v2219_v25  ;;  %v9144_v7 = vadd.f32 %v1808_v14, %v1732_v26  ;;  %v1531_v43 = vmul.f32 %v8920_v49, %v983_v63  ;;  %v1594_v42 = vadd.f32 %v1530_v59, %v9091_v55  ;;  %v1185_v61 = vld [vmem:[#allocation2 + $0x1b2] sm:$0xff] }
 0x19e   : > { %v1318_v39 = vadd.f32 %v1254_v54, %v1118_v8  ;;  %v9154_v9 = vadd.f32 %v1255_v51, %v1119_v57  ;;  %v1807_v20 = vmul.f32 %v8966_v2, %v848_v38  ;;  %v1946_v35 = vmul.f32 %v8997_v13, %v982_v24  ;;  %v850_v38 = vld [vmem:[#allocation2 + $0x1b0] sm:$0xff] }
 0x19f   : > { %v9159_v53 = vadd.f32 %v9033_v33, %v2220_v16  ;;  %v1595_v55 = vadd.f32 %v1531_v43, %v1455_v0  ;;  %v1670_v48 = vmul.f32 %v8945_v56, %v1182_v46  ;;  %v1947_v27 = vmul.f32 %v8997_v13, %v983_v63  ;;  %v1184_v57 = vld [vmem:[#allocation2 + $0x1aa] sm:$0xff] }
 0x1a0   : > { %v1871_v23 = vadd.f32 %v1807_v20, %v9088_v5  ;;  %v2010_v31 = vadd.f32 %v1946_v35, %v9095_v44  ;;  %v2086_v37 = vmul.f32 %v9005_v10, %v1182_v46  ;;  %v7140_v28 = vpack.c.bf16 %v5953_v41, %v5952_v52 }
 0x1a1   : > { %v1671_v24 = vmul.f32 %v8945_v56, %v1183_v40  ;;  %v1734_v47 = vadd.f32 %v1670_v48, %v1594_v42  ;;  %v1394_v17 = vmul.f32 %v8903_v15, %v851_v58  ;;  %v1810_v26 = vmul.f32 %v8966_v2, %v851_v58 }
 0x1a2   : > { %v2011_v45 = vadd.f32 %v1947_v27, %v1871_v23  ;;  %v2087_v63 = vmul.f32 %v9005_v10, %v1183_v40  ;;  %v2150_v25 = vadd.f32 %v2086_v37, %v2010_v31  ;;  %7141 = vmatprep.subr.bf16.mxu0 %v7140_v28  ;;  %v1056_v5 = vmul.f32 %v8909_v60, %v984_v12  ;;  %v5954_v27 = vld [vmem:[%s10538_s2 + $0xe0] sm:$0xff]  ;;  %v5955_v23 = vld [vmem:[%s10538_s2 + $0xe8] sm:$0xff] }
 0x1a3   : > { %v2354_v44 = vmax.f32 %v9142_v1, 0.0  ;;  %v2355_v14 = vmax.f32 %v9159_v53, 0.0  ;;  %7143 = vmatpush3.bf16.msra.mxu0 %v7140_v28  ;;  %v921_v46 = vmul.f32 %v8896_v11, %v850_v38  ;;  %v1057_v8 = vmul.f32 %v8909_v60, %v985_v21 }
 0x1a4   : > { %v9175_v16 = vadd.f32 %v1671_v24, %v1595_v55  ;;  %v2151_v59 = vadd.f32 %v2087_v63, %v2011_v45  ;;  %v2221_v40 = vmul.f32 %v9021_v34, %v2150_v25  ;;  %v922_v54 = vmul.f32 %v8896_v11, %v851_v58 }
 0x1a5   : > { %v9179_v51 = vadd.f32 %v1394_v17, %v1318_v39  ;;  %v9181_v0 = vadd.f32 %v1810_v26, %v1734_v47  ;;  %v1393_v43 = vmul.f32 %v8903_v15, %v850_v38  ;;  %v1532_v42 = vmul.f32 %v8920_v49, %v984_v12  ;;  %v2451_v17 = vld [vmem:[#allocation3 + $0x50] ss:$2 sm:$0xff]  ;;  %v2483_v26 = vld [vmem:[#allocation3 + $0x51] ss:$2 sm:$0xff] }
 0x1a6   : > { %v2222_v52 = vmul.f32 %v9021_v34, %v2151_v59  ;;  %v1120_v41 = vadd.f32 %v1056_v5, %v920_v50  ;;  %v1256_v20 = vmul.f32 %v8868_v30, %v1184_v57  ;;  %v1257_v35 = vmul.f32 %v8868_v30, %v1185_v61 }
 0x1a7   : > { %v1121_v55 = vadd.f32 %v1057_v8, %v921_v46  ;;  %v1457_v48 = vadd.f32 %v1393_v43, %v9097_v22  ;;  %v1533_v58 = vmul.f32 %v8920_v49, %v985_v21  ;;  %v1809_v39 = vmul.f32 %v8966_v2, %v850_v38  ;;  %v852_v46 = vld [vmem:[#allocation2 + $0x1c0] sm:$0xff] }
 0x1a8   : > { %v9198_v50 = vadd.f32 %v9033_v33, %v2221_v40  ;;  %v2293_v31 = vadd.f32 %v9033_v33, %v2222_v52  ;;  %v1672_v37 = vmul.f32 %v8945_v56, %v1184_v57  ;;  %v1948_v22 = vmul.f32 %v8997_v13, %v984_v12  ;;  %v986_v8 = vld [vmem:[#allocation2 + $0x1b9] sm:$0xff]  ;;  %v987_v43 = vld [vmem:[#allocation2 + $0x1c1] sm:$0xff] }
 0x1a9   : > { %v1596_v28 = vadd.f32 %v1532_v42, %v9136_v29  ;;  %v1597_v38 = vadd.f32 %v1533_v58, %v1457_v48  ;;  %v1873_v24 = vadd.f32 %v1809_v39, %v9131_v36  ;;  %v1949_v47 = vmul.f32 %v8997_v13, %v985_v21  ;;  %v853_v36 = vld [vmem:[#allocation2 + $0x1c8] sm:$0xff] }
 0x1aa   : > { %v2357_v45 = vmax.f32 %v2293_v31, 0.0  ;;  %v2012_v63 = vadd.f32 %v1948_v22, %v9144_v7  ;;  %v2088_v25 = vmul.f32 %v9005_v10, %v1184_v57  ;;  %v7144_v5 = vpack.c.bf16 %v5955_v23, %v5954_v27  ;;  %v1187_v58 = vld [vmem:[#allocation2 + $0x1c2] sm:$0xff] }
 0x1ab   : > { %v9208_v59 = vadd.f32 %v1256_v20, %v1120_v41  ;;  %v9210_v12 = vadd.f32 %v1257_v35, %v1121_v55  ;;  %v2013_v29 = vadd.f32 %v1949_v47, %v1873_v24  ;;  %v2089_v40 = vmul.f32 %v9005_v10, %v1185_v61  ;;  %v1186_v35 = vld [vmem:[#allocation2 + $0x1ba] sm:$0xff] }
 0x1ac   : > { %v2397_v21 = vmax.f32 %v2353_v19, %v2357_v45  ;;  %v1673_v42 = vmul.f32 %v8945_v56, %v1185_v61  ;;  %v2152_v7 = vadd.f32 %v2088_v25, %v2012_v63  ;;  %7145 = vmatprep.subr.bf16.mxu0 %v7144_v5  ;;  %v2509_v57 = vmax.f32 %v2451_v17, %v2483_v26 }
 0x1ad   : > { %v9216_v52 = vadd.f32 %v1672_v37, %v1596_v28  ;;  %v2153_v48 = vadd.f32 %v2089_v40, %v2013_v29  ;;  %7147 = vmatpush3.bf16.msra.mxu0 %v7144_v5  ;;  %v923_v41 = vmul.f32 %v8896_v11, %v852_v46  ;;  %v1058_v20 = vmul.f32 %v8909_v60, %v986_v8  ;;  %v5956_v5 = vld [vmem:[%s10538_s2 + $0xf0] sm:$0xff] }
 0x1ae   : > { %2429 = vst.msk [vmem:[#allocation3 + $0xa0] sm:$0xff] %vm250_vm0, %v2397_v21  ;;  %v9221_v55 = vadd.f32 %v1673_v42, %v1597_v38  ;;  %v2223_v4 = vmul.f32 %v9021_v34, %v2152_v7  ;;  %v9225_v19 = vmul.f32 %v8896_v11, %v853_v36  ;;  %2525 = vst.msk [vmem:[#allocation4 + $0x39] sm:$0xff] %vm250_vm0, %v2509_v57  ;;  %v2453_v42 = vld [vmem:[#allocation3 + $0x60] ss:$2 sm:$0xff]  ;;  %v2485_v7 = vld [vmem:[#allocation3 + $0x61] ss:$2 sm:$0xff] }
 0x1af   : > { %v1059_v61 = vmul.f32 %v8909_v60, %v987_v43  ;;  %v2224_v39 = vmul.f32 %v9021_v34, %v2153_v48  ;;  %v1396_v27 = vmul.f32 %v8903_v15, %v853_v36  ;;  %2538 = vst.msk [vmem:[#allocation4 + $0x39] sm:$0x1] %vm253_vm1, %v10547_v3  ;;  %2546 = vst.msk [vmem:[#allocation4 + $0x40] sm:$0x1] %vm253_vm1, %v10547_v3  ;;  %v2356_v53 = vmax.f32 %v9198_v50, 0.0 }
 0x1b0   : > { %v1122_v23 = vadd.f32 %v1058_v20, %v922_v54  ;;  %v1395_v31 = vmul.f32 %v8903_v15, %v852_v46  ;;  %v2294_v37 = vadd.f32 %v9033_v33, %v2223_v4  ;;  %v1812_v22 = vmul.f32 %v8966_v2, %v853_v36  ;;  %v855_v20 = vld [vmem:[#allocation2 + $0x1d8] sm:$0xff] }
 0x1b1   : > { %v1258_v28 = vmul.f32 %v8868_v30, %v1186_v35  ;;  %v1534_v38 = vmul.f32 %v8920_v49, %v986_v8  ;;  %v2295_v24 = vadd.f32 %v9033_v33, %v2224_v39  ;;  %v1123_v47 = vadd.f32 %v1059_v61, %v923_v41  ;;  %v854_v39 = vld [vmem:[#allocation2 + $0x1d0] sm:$0xff] }
 0x1b2   : > { %v1259_v17 = vmul.f32 %v8868_v30, %v1187_v58  ;;  %v1459_v26 = vadd.f32 %v1395_v31, %v9154_v9  ;;  %v2358_v45 = vmax.f32 %v2294_v37, 0.0  ;;  %v1535_v54 = vmul.f32 %v8920_v49, %v987_v43  ;;  %v5957_v9 = vld [vmem:[%s10538_s2 + $0xf8] sm:$0xff] }
 0x1b3   : > { %v1322_v63 = vadd.f32 %v1258_v28, %v1122_v23  ;;  %v1598_v25 = vadd.f32 %v1534_v38, %v9179_v51  ;;  %v2359_v29 = vmax.f32 %v2295_v24, 0.0  ;;  %v1674_v40 = vmul.f32 %v8945_v56, %v1186_v35  ;;  %v988_v23 = vld [vmem:[#allocation2 + $0x1c9] sm:$0xff]  ;;  %v989_v31 = vld [vmem:[#allocation2 + $0x1d1] sm:$0xff] }
 0x1b4   : > { %v1811_v36 = vmul.f32 %v8966_v2, %v852_v46  ;;  %v1950_v21 = vmul.f32 %v8997_v13, %v986_v8  ;;  %v2398_v51 = vmax.f32 %v2354_v44, %v2358_v45  ;;  %v1599_v57 = vadd.f32 %v1535_v54, %v1459_v26 }
 0x1b5   : > { %v1675_v48 = vmul.f32 %v8945_v56, %v1187_v58  ;;  %v1951_v41 = vmul.f32 %v8997_v13, %v987_v43  ;;  %v2399_v46 = vmax.f32 %v2355_v14, %v2359_v29  ;;  %v2090_v61 = vmul.f32 %v9005_v10, %v1186_v35 }
 0x1b6   : > { %v1875_v8 = vadd.f32 %v1811_v36, %v9175_v16  ;;  %v2014_v4 = vadd.f32 %v1950_v21, %v9181_v0  ;;  %2430 = vst.msk [vmem:[#allocation3 + $0xa8] sm:$0xff] %vm250_vm0, %v2398_v51  ;;  %v2583_v1 = vld [vmem:[#allocation4 + $0x39] sm:$0xff]  ;;  %v1738_v37 = vadd.f32 %v1674_v40, %v1598_v25  ;;  %v2091_v43 = vmul.f32 %v9005_v10, %v1187_v58 }
 0x1b7   : > { %v2993_v44 = vld [vmem:[#allocation4 + $0x32] sm:$0xff]  ;;  %v2510_v28 = vmax.f32 %v2453_v42, %v2485_v7  ;;  %v7148_v38 = vpack.c.bf16 %v5957_v9, %v5956_v5  ;;  %2431 = vst.msk [vmem:[#allocation3 + $0xb0] sm:$0xff] %vm250_vm0, %v2399_v46  ;;  %6556 = vmatmul.mubr.msk.f32.gmra.mrb[6].mxu1 %vm250_vm0, %v2583_v1  ;;  %v1398_v0 = vmul.f32 %v8903_v15, %v855_v20  ;;  %v1188_v5 = vld [vmem:[#allocation2 + $0x1ca] sm:$0xff] }
 0x1b8   : > { %6635 = vmatprep.mubr.msk.f32.mxu0 %vm250_vm0, %v2993_v44  ;;  %v2015_v14 = vadd.f32 %v1951_v41, %v1875_v8  ;;  %v2154_v16 = vadd.f32 %v2090_v61, %v2014_v4  ;;  %v1814_v35 = vmul.f32 %v8966_v2, %v855_v20  ;;  %v925_v58 = vmul.f32 %v8896_v11, %v854_v39  ;;  %v1189_v42 = vld [vmem:[#allocation2 + $0x1d2] sm:$0xff]  ;;  %v857_v8 = vld [vmem:[#allocation2 + $0x1e8] sm:$0xff] }
 0x1b9   : > { %2526 = vst.msk [vmem:[#allocation4 + $0x41] sm:$0xff] %vm250_vm0, %v2510_v28  ;;  %7149 = vmatprep.subr.bf16.mxu0 %v7148_v38  ;;  %v1060_v24 = vmul.f32 %v8909_v60, %v988_v23  ;;  %v1061_v50 = vmul.f32 %v8909_v60, %v989_v31  ;;  %v1460_v26 = vadd.f32 %v1396_v27, %v9208_v59 }
 0x1ba   : > { %v1876_v45 = vadd.f32 %v1812_v22, %v9216_v52  ;;  %v2155_v54 = vadd.f32 %v2091_v43, %v2015_v14  ;;  %v2225_v25 = vmul.f32 %v9021_v34, %v2154_v16  ;;  %7151 = vmatpush3.bf16.msra.mxu0 %v7148_v38  ;;  %v9278_v29 = vadd.f32 %v1259_v17, %v1123_v47  ;;  %v856_v43 = vld [vmem:[#allocation2 + $0x1e0] sm:$0xff] }
 0x1bb   : > { %v9280_v40 = vadd.f32 %v1675_v48, %v1599_v57  ;;  %v926_v36 = vmul.f32 %v8896_v11, %v855_v20  ;;  %v1124_v21 = vadd.f32 %v1060_v24, %v9225_v19  ;;  %v1397_v52 = vmul.f32 %v8903_v15, %v854_v39  ;;  %v990_v38 = vld [vmem:[#allocation2 + $0x1d9] sm:$0xff] }
 0x1bc   : > { %v2226_v7 = vmul.f32 %v9021_v34, %v2155_v54  ;;  %v2296_v59 = vadd.f32 %v9033_v33, %v2225_v25  ;;  %v1536_v27 = vmul.f32 %v8920_v49, %v988_v23  ;;  %v9288_v22 = vadd.f32 %v1398_v0, %v1322_v63 }
 0x1bd   : > { %v9290_v9 = vadd.f32 %v1814_v35, %v1738_v37  ;;  %v1125_v47 = vadd.f32 %v1061_v50, %v925_v58  ;;  %v1260_v17 = vmul.f32 %v8868_v30, %v1188_v5  ;;  %v1261_v57 = vmul.f32 %v8868_v30, %v1189_v42 }
 0x1be   : > { %v2360_v51 = vmax.f32 %v2296_v59, 0.0  ;;  %v1461_v19 = vadd.f32 %v1397_v52, %v9210_v12  ;;  %v1537_v48 = vmul.f32 %v8920_v49, %v989_v31  ;;  %v9297_v41 = vadd.f32 %v9033_v33, %v2226_v7  ;;  %v9304_v12 = vld [vmem:[#allocation4 + $0x10] sm:$0xff]  ;;  %v9329_v52 = vld [vmem:[#allocation4 + $0x20] sm:$0xff] }
 0x1bf   : > { %v1324_v20 = vadd.f32 %v1260_v17, %v1124_v21  ;;  %v1813_v46 = vmul.f32 %v8966_v2, %v854_v39  ;;  %v1952_v63 = vmul.f32 %v8997_v13, %v988_v23  ;;  %v1600_v44 = vadd.f32 %v1536_v27, %v1460_v26  ;;  %v9318_v26 = vld [vmem:[#allocation4 + $0x18] sm:$0xff] }
 0x1c0   : > { %v2400_v4 = vmax.f32 %v2356_v53, %v2360_v51  ;;  %v2584_v61 = vld [vmem:[#allocation4 + $0x41] sm:$0xff]  ;;  %v1601_v37 = vadd.f32 %v1537_v48, %v1461_v19  ;;  %v1953_v30 = vmul.f32 %v8997_v13, %v989_v31  ;;  %v2092_v23 = vmul.f32 %v9005_v10, %v1188_v5 }
 0x1c1   : > { %v2994_v1 = vld [vmem:[#allocation4 + $0x3a] sm:$0xff]  ;;  %6558 = vmatprep.mubr.msk.f32.mxu1 %vm250_vm0, %v2584_v61  ;;  %v1877_v28 = vadd.f32 %v1813_v46, %v9221_v55  ;;  %v2016_v39 = vadd.f32 %v1952_v63, %v1876_v45  ;;  %v9311_v31 = vadd.f32 %v1261_v57, %v1125_v47  ;;  %v1676_v14 = vmul.f32 %v8945_v56, %v1188_v5  ;;  %v9342_v46 = vld [vmem:[%s10537_s1 + $0x2] ss:$0 sm:$0xff]  ;;  %v9350_v61 = vld [vmem:[#allocation4 + $0x28] sm:$0xff] }
 0x1c2   : > { %6636 = vmatmul.mubr.msk.f32.gmra.mrb[6].mxu0 %vm250_vm0, %v2994_v1  ;;  %v991_v53 = vld [vmem:[#allocation2 + $0x1e1] sm:$0xff]  ;;  %2432 = vst.msk [vmem:[#allocation3 + $0xb8] sm:$0xff] %vm250_vm0, %v2400_v4  ;;  %v1677_v16 = vmul.f32 %v8945_v56, %v1189_v42  ;;  %v2093_v0 = vmul.f32 %v9005_v10, %v1189_v42  ;;  %v1400_v58 = vmul.f32 %v8903_v15, %v857_v8  ;;  %v2361_v21 = vmax.f32 %v9297_v41, 0.0 }
 0x1c3   : > { %6666 = vmatprep.mubr.msk.f32.mxu0 %vm250_vm0, %v9304_v12  ;;  %v2017_v35 = vadd.f32 %v1953_v30, %v1877_v28  ;;  %v2156_v55 = vadd.f32 %v2092_v23, %v2016_v39  ;;  %v927_v24 = vmul.f32 %v8896_v11, %v856_v43  ;;  %v1740_v50 = vadd.f32 %v1676_v14, %v1600_v44  ;;  %v1190_v5 = vld [vmem:[#allocation2 + $0x1da] sm:$0xff]  ;;  %v992_v23 = vld [vmem:[#allocation2 + $0x1e9] sm:$0xff] }
 0x1c4   : > { %v1816_v45 = vmul.f32 %v8966_v2, %v857_v8  ;;  %v1062_v54 = vmul.f32 %v8909_v60, %v990_v38  ;;  %v1063_v25 = vmul.f32 %v8909_v60, %v991_v53  ;;  %v9324_v7 = vadd.f32 %v1677_v16, %v1601_v37  ;;  %v1191_v60 = vld [vmem:[#allocation2 + $0x1e2] sm:$0xff]  ;;  %v859_v30 = vld [vmem:[#allocation2 + $0x1f8] sm:$0xff] }
 0x1c5   : > { %v2157_v42 = vadd.f32 %v2093_v0, %v2017_v35  ;;  %v2227_v59 = vmul.f32 %v9021_v34, %v2156_v55  ;;  %v928_v27 = vmul.f32 %v8896_v11, %v857_v8  ;;  %v1399_v17 = vmul.f32 %v8903_v15, %v856_v43 }
 0x1c6   : > { %6667 = vmatmul.mubr.msk.f32.vlgmr.msra.gmra.mrb[0].mxu0 %vm250_vm0, %v9318_v26  ;;  %v1126_v47 = vadd.f32 %v1062_v54, %v926_v36  ;;  %v1538_v51 = vmul.f32 %v8920_v49, %v990_v38  ;;  %v9337_v19 = vadd.f32 %v1400_v58, %v1324_v20  ;;  %v1127_v48 = vadd.f32 %v1063_v25, %v927_v24 }
 0x1c7   : > { %6669 = vmatprep.mubr.msk.f32.mxu0 %vm250_vm0, %v9329_v52  ;;  %v2228_v57 = vmul.f32 %v9021_v34, %v2157_v42  ;;  %v1262_v11 = vmul.f32 %v9342_v46, %v1190_v5  ;;  %v9345_v63 = vadd.f32 %v1816_v45, %v1740_v50  ;;  %v1463_v36 = vadd.f32 %v1399_v17, %v9278_v29  ;;  %v9360_v29 = vld [vmem:[#allocation4 + $0x30] sm:$0xff]  ;;  %v9376_v45 = vld [vmem:[#allocation4 + $0x38] sm:$0xff] }
 0x1c8   : > { %v1539_v8 = vmul.f32 %v8920_v49, %v991_v53  ;;  %v1602_v4 = vadd.f32 %v1538_v51, %v9288_v22  ;;  %v9353_v20 = vadd.f32 %v9033_v33, %v2227_v59  ;;  %v1263_v1 = vmul.f32 %v9342_v46, %v1191_v60  ;;  %v993_v50 = vld [vmem:[#allocation2 + $0x1f1] sm:$0xff]  ;;  %v7621_v51 = vld [vmem:[%s10537_s1] ss:$0 sm:$0xff] }
 0x1c9   : > { %v1678_v44 = vmul.f32 %v8945_v56, %v1190_v5  ;;  %v1815_v37 = vmul.f32 %v8966_v2, %v856_v43  ;;  %v9363_v49 = vadd.f32 %v9033_v33, %v2228_v57  ;;  %v1326_v22 = vadd.f32 %v1262_v11, %v1126_v47  ;;  %v1192_v47 = vld [vmem:[#allocation2 + $0x1ea] sm:$0xff] }
 0x1ca   : > { %6670 = vmatmul.mubr.msk.f32.gmra.mrb[2].mxu0 %vm250_vm0, %v9350_v61  ;;  %v1603_v28 = vadd.f32 %v1539_v8, %v1463_v36  ;;  %v1954_v39 = vmul.f32 %v8997_v13, %v990_v38  ;;  %v9368_v14 = vadd.f32 %v1263_v1, %v1127_v48  ;;  %v1679_v43 = vmul.f32 %v8945_v56, %v1191_v60  ;;  %v858_v38 = vld [vmem:[#allocation2 + $0x1f0] sm:$0xff] }
 0x1cb   : > { %6672 = vmatprep.mubr.msk.f32.mxu0 %vm250_vm0, %v9360_v29  ;;  %v1879_v16 = vadd.f32 %v1815_v37, %v9280_v40  ;;  %v1955_v0 = vmul.f32 %v8997_v13, %v991_v53  ;;  %v1742_v35 = vadd.f32 %v1678_v44, %v1602_v4  ;;  %v2094_v58 = vmul.f32 %v9005_v10, %v1190_v5  ;;  %v7620_v40 = vld [vmem:[%s10537_s1 + $0x1] ss:$0 sm:$0xff]  ;;  %v9401_v4 = vld [vmem:[%s10537_s1 + $0x3] ss:$0 sm:$0xff]  ;;  %v9407_v44 = vld [vmem:[%s10537_s1 + $0x4] ss:$0 sm:$0xff] }
 0x1cc   : > { %v2018_v55 = vadd.f32 %v1954_v39, %v9290_v9  ;;  %v1402_v24 = vmul.f32 %v8903_v15, %v859_v30  ;;  %v2095_v25 = vmul.f32 %v9005_v10, %v1191_v60  ;;  %v1818_v56 = vmul.f32 %v8966_v2, %v859_v30  ;;  %v9385_v9 = vld [vmem:[#allocation4 + $0x40] sm:$0xff]  ;;  %v1193_v60 = vld [vmem:[#allocation2 + $0x1f2] sm:$0xff] }
 0x1cd   : > { %v2019_v54 = vadd.f32 %v1955_v0, %v1879_v16  ;;  %v1064_v53 = vmul.f32 %v7620_v40, %v992_v23  ;;  %v2362_v15 = vmax.f32 %v9353_v20, 0.0  ;;  %v2363_v5 = vmax.f32 %v9363_v49, 0.0  ;;  %v1473_v20 = vld [vmem:[#allocation2 + $0x211] sm:$0xff] }
 0x1ce   : > { %6673 = vmatmul.mubr.msk.f32.gmra.mrb[4].mxu0 %vm250_vm0, %v9376_v45  ;;  %v9389_v42 = vadd.f32 %v1679_v43, %v1603_v28  ;;  %v2158_v59 = vadd.f32 %v2094_v58, %v2018_v55  ;;  %v930_v57 = vmul.f32 %v7621_v51, %v859_v30  ;;  %v929_v48 = vmul.f32 %v7621_v51, %v858_v38 }
 0x1cf   : > { %6675 = vmatprep.mubr.msk.f32.mxu0 %vm250_vm0, %v9385_v9  ;;  %v2159_v17 = vadd.f32 %v2095_v25, %v2019_v54  ;;  %v1065_v11 = vmul.f32 %v7620_v40, %v993_v50  ;;  %v9396_v36 = vadd.f32 %v1402_v24, %v1326_v22  ;;  %v1128_v8 = vadd.f32 %v1064_v53, %v928_v27  ;;  %v2455_v54 = vld [vmem:[#allocation3 + $0x70] ss:$2 sm:$0xff]  ;;  %v2487_v25 = vld [vmem:[#allocation3 + $0x71] ss:$2 sm:$0xff] }
 0x1d0   : > { %v1401_v1 = vmul.f32 %v9401_v4, %v858_v38  ;;  %v1540_v37 = vmul.f32 %v9407_v44, %v992_v23  ;;  %v9411_v28 = vadd.f32 %v1818_v56, %v1742_v35  ;;  %v1264_v27 = vmul.f32 %v9342_v46, %v1192_v47  ;;  %v1332_v56 = vld [vmem:[#allocation2 + $0x208] sm:$0xff] }
 0x1d1   : > { %v2230_v30 = vmul.f32 %v9021_v34, %v2159_v17  ;;  %v1265_v22 = vmul.f32 %v9342_v46, %v1193_v60  ;;  %v2229_v39 = vmul.f32 %v9021_v34, %v2158_v59  ;;  %v1541_v16 = vmul.f32 %v9407_v44, %v993_v50 }
 0x1d2   : > { %v1465_v43 = vadd.f32 %v1401_v1, %v9311_v31  ;;  %v1604_v0 = vadd.f32 %v1540_v37, %v9337_v19  ;;  %v1129_v58 = vadd.f32 %v1065_v11, %v929_v48  ;;  %v1817_v24 = vmul.f32 %v8966_v2, %v858_v38  ;;  %v9425_v31 = vld [vmem:[%s10537_s1 + $0x5] ss:$0 sm:$0xff]  ;;  %v994_v11 = vld [vmem:[#allocation2 + $0x1f9] sm:$0xff] }
 0x1d3   : > { %v2301_v55 = vadd.f32 %v9033_v33, %v2230_v30  ;;  %v1956_v35 = vmul.f32 %v8997_v13, %v992_v23  ;;  %v1328_v53 = vadd.f32 %v1264_v27, %v1128_v8  ;;  %v1680_v59 = vmul.f32 %v9425_v31, %v1192_v47  ;;  %v1331_v1 = vld [vmem:[#allocation2 + $0x200] sm:$0xff] }
 0x1d4   : > { %v1605_v17 = vadd.f32 %v1541_v16, %v1465_v43  ;;  %v1957_v19 = vmul.f32 %v8997_v13, %v993_v50  ;;  %v1881_v48 = vadd.f32 %v1817_v24, %v9324_v7  ;;  %v2096_v23 = vmul.f32 %v9005_v10, %v1192_v47  ;;  %v1194_v7 = vld [vmem:[#allocation2 + $0x1fa] sm:$0xff] }
 0x1d5   : > { %v2365_v51 = vmax.f32 %v2301_v55, 0.0  ;;  %v2020_v38 = vadd.f32 %v1956_v35, %v9345_v63  ;;  %v1744_v8 = vadd.f32 %v1680_v59, %v1604_v0  ;;  %v2097_v37 = vmul.f32 %v9005_v10, %v1193_v60 }
 0x1d6   : > { %v2511_v30 = vmax.f32 %v2455_v54, %v2487_v25  ;;  %v1404_v27 = vmul.f32 %v9401_v4, %v1332_v56  ;;  %v2021_v16 = vadd.f32 %v1957_v19, %v1881_v48  ;;  %v1820_v55 = vmul.f32 %v8966_v2, %v1332_v56  ;;  %v1471_v2 = vld [vmem:[#allocation2 + $0x201] sm:$0xff] }
 0x1d7   : > { %v2401_v43 = vmax.f32 %v2361_v21, %v2365_v51  ;;  %v2160_v50 = vadd.f32 %v2096_v23, %v2020_v38  ;;  %v9438_v63 = vadd.f32 %v9033_v33, %v2229_v39  ;;  %v1681_v47 = vmul.f32 %v9425_v31, %v1193_v60  ;;  %v1611_v51 = vld [vmem:[#allocation2 + $0x202] sm:$0xff] }
 0x1d8   : > { %2527 = vst.msk [vmem:[#allocation4 + $0x49] sm:$0xff] %vm250_vm0, %v2511_v30  ;;  %v1066_v0 = vmul.f32 %v7620_v40, %v994_v11  ;;  %v1403_v24 = vmul.f32 %v9401_v4, %v1331_v1  ;;  %v1329_v35 = vadd.f32 %v1265_v22, %v1129_v58  ;;  %v2161_v41 = vadd.f32 %v2097_v37, %v2021_v16  ;;  %v1333_v37 = vld [vmem:[#allocation2 + $0x210] sm:$0xff] }
 0x1d9   : > { %2433 = vst.msk [vmem:[#allocation3 + $0xc0] sm:$0xff] %vm250_vm0, %v2401_v43  ;;  %v2231_v21 = vmul.f32 %v9021_v34, %v2160_v50  ;;  %v1542_v60 = vmul.f32 %v9407_v44, %v994_v11  ;;  %v9450_v39 = vadd.f32 %v1681_v47, %v1605_v17  ;;  %v1468_v40 = vadd.f32 %v1404_v27, %v1328_v53  ;;  %v9463_v53 = vld [vmem:[%s10537_s1 + $0x6] ss:$0 sm:$0xff]  ;;  %v1472_v50 = vld [vmem:[#allocation2 + $0x209] sm:$0xff] }
 0x1da   : > { %2539 = vst.msk [vmem:[#allocation4 + $0x49] sm:$0x1] %vm253_vm1, %v10547_v3  ;;  %2547 = vst.msk [vmem:[#allocation4 + $0x50] sm:$0x1] %vm253_vm1, %v10547_v3  ;;  %v1130_v54 = vadd.f32 %v1066_v0, %v930_v57  ;;  %v1266_v25 = vmul.f32 %v9342_v46, %v1194_v7  ;;  %v2232_v22 = vmul.f32 %v9021_v34, %v2161_v41 }
 0x1db   : > { %v2302_v58 = vadd.f32 %v9033_v33, %v2231_v21  ;;  %v9455_v56 = vadd.f32 %v1820_v55, %v1744_v8  ;;  %v1467_v59 = vadd.f32 %v1403_v24, %v9368_v14  ;;  %v1543_v19 = vmul.f32 %v9407_v44, %v1471_v2  ;;  %v1334_v8 = vld [vmem:[#allocation2 + $0x218] sm:$0xff] }
 0x1dc   : > { %v1682_v48 = vmul.f32 %v9425_v31, %v1194_v7  ;;  %v1819_v46 = vmul.f32 %v9463_v53, %v1331_v1  ;;  %v1958_v57 = vmul.f32 %v8997_v13, %v994_v11  ;;  %v2303_v17 = vadd.f32 %v9033_v33, %v2232_v22 }
 0x1dd   : > { %v2366_v38 = vmax.f32 %v2302_v58, 0.0  ;;  %v1330_v23 = vadd.f32 %v1266_v25, %v1130_v54  ;;  %v1606_v14 = vadd.f32 %v1542_v60, %v9396_v36  ;;  %v1959_v27 = vmul.f32 %v8997_v13, %v1471_v2  ;;  %v9478_v36 = vld [vmem:[%s10537_s1 + $0x8] ss:$0 sm:$0xff]  ;;  %v1612_v54 = vld [vmem:[#allocation2 + $0x20a] sm:$0xff] }
 0x1de   : > { %v1883_v30 = vadd.f32 %v1819_v46, %v9389_v42  ;;  %v2022_v43 = vadd.f32 %v1958_v57, %v9411_v28  ;;  %v2098_v16 = vmul.f32 %v9005_v10, %v1194_v7  ;;  %v2367_v1 = vmax.f32 %v2303_v17, 0.0  ;;  %v2489_v46 = vld [vmem:[#allocation3 + $0x81] ss:$2 sm:$0xff]  ;;  %v9512_v57 = vld [vmem:[%s10540_s4] ss:$0 sm:$0xff] }
 0x1df   : > { %v2402_v11 = vmax.f32 %v2362_v15, %v2366_v38  ;;  %v1607_v55 = vadd.f32 %v1543_v19, %v1467_v59  ;;  %v2099_v47 = vmul.f32 %v9478_v36, %v1611_v51  ;;  %v1406_v10 = vmul.f32 %v9401_v4, %v1334_v8  ;;  %v1613_v19 = vld [vmem:[#allocation2 + $0x212] sm:$0xff] }
 0x1e0   : > { %v2023_v13 = vadd.f32 %v1959_v27, %v1883_v30  ;;  %v2162_v0 = vadd.f32 %v2098_v16, %v2022_v43  ;;  %v1405_v7 = vmul.f32 %v9401_v4, %v1333_v37  ;;  %v2364_v15 = vmax.f32 %v9438_v63, 0.0  ;;  %v1752_v30 = vld [vmem:[#allocation2 + $0x228] sm:$0xff]  ;;  %v1474_v27 = vld [vmem:[#allocation2 + $0x219] sm:$0xff] }
 0x1e1   : > { %v9481_v42 = vld [vmem:[#allocation4 + $0x49] sm:$0xff]  ;;  %v2403_v24 = vmax.f32 %v2363_v5, %v2367_v1  ;;  %2434 = vst.msk [vmem:[#allocation3 + $0xc8] sm:$0xff] %vm250_vm0, %v2402_v11  ;;  %v1683_v41 = vmul.f32 %v9425_v31, %v1611_v51  ;;  %v1544_v21 = vmul.f32 %v9407_v44, %v1472_v50  ;;  %v1746_v2 = vadd.f32 %v1682_v48, %v1606_v14  ;;  %v1751_v43 = vld [vmem:[#allocation2 + $0x220] sm:$0xff] }
 0x1e2   : > { %v9483_v28 = vld [vmem:[#allocation4 + $0x48] sm:$0xff]  ;;  %6559 = vmatmul.mubr.msk.f32.gmra.mrb[8].mxu1 %vm250_vm0, %v9481_v42  ;;  %v2163_v4 = vadd.f32 %v2099_v47, %v2023_v13  ;;  %v2233_v60 = vmul.f32 %v9021_v34, %v2162_v0  ;;  %v1469_v63 = vadd.f32 %v1405_v7, %v1329_v35  ;;  %v1822_v5 = vmul.f32 %v9463_v53, %v1334_v8  ;;  %v9506_v34 = vld [vmem:[%s10537_s1 + $0x7] ss:$0 sm:$0xff] }
 0x1e3   : > { %6676 = vmatmul.mubr.msk.f32.gmra.mrb[6].mxu0 %vm250_vm0, %v9483_v28  ;;  %2435 = vst.msk [vmem:[#allocation3 + $0xd0] sm:$0xff] %vm250_vm0, %v2403_v24  ;;  %v1747_v49 = vadd.f32 %v1683_v41, %v1607_v55  ;;  %v1545_v25 = vmul.f32 %v9407_v44, %v1473_v20  ;;  %v1608_v22 = vadd.f32 %v1544_v21, %v1468_v40  ;;  %v2457_v48 = vld [vmem:[#allocation3 + $0x80] ss:$2 sm:$0xff]  ;;  %v2459_v41 = vld [vmem:[#allocation3 + $0x90] ss:$2 sm:$0xff] }
 0x1e4   : > { %v2304_v58 = vadd.f32 %v9033_v33, %v2233_v60  ;;  %v1470_v59 = vadd.f32 %v1406_v10, %v1330_v23  ;;  %v1821_v51 = vmul.f32 %v9463_v53, %v1333_v37  ;;  %v1960_v35 = vmul.f32 %v9506_v34, %v1472_v50  ;;  %v1614_v55 = vld [vmem:[#allocation2 + $0x21a] sm:$0xff] }
 0x1e5   : > { %v2234_v33 = vmul.f32 %v9512_v57, %v2163_v4  ;;  %v1609_v40 = vadd.f32 %v1545_v25, %v1469_v63  ;;  %v1684_v17 = vmul.f32 %v9425_v31, %v1612_v54  ;;  %v1961_v38 = vmul.f32 %v9506_v34, %v1473_v20  ;;  %v1891_v7 = vld [vmem:[#allocation2 + $0x221] sm:$0xff]  ;;  %v2491_v21 = vld [vmem:[#allocation3 + $0x91] ss:$2 sm:$0xff] }
 0x1e6   : > { %v2368_v23 = vmax.f32 %v2304_v58, 0.0  ;;  %v1885_v14 = vadd.f32 %v1821_v51, %v9450_v39  ;;  %v2024_v8 = vadd.f32 %v1960_v35, %v9455_v56  ;;  %v2100_v37 = vmul.f32 %v9478_v36, %v1612_v54  ;;  %v9525_v39 = vld [vmem:[%s10541_s5] ss:$0 sm:$0xff]  ;;  %v2031_v54 = vld [vmem:[#allocation2 + $0x222] sm:$0xff] }
 0x1e7   : > { %v1886_v16 = vadd.f32 %v1822_v5, %v1746_v2  ;;  %v1685_v50 = vmul.f32 %v9425_v31, %v1613_v19  ;;  %v1748_v1 = vadd.f32 %v1684_v17, %v1608_v22  ;;  %v2512_v11 = vmax.f32 %v2457_v48, %v2489_v46  ;;  %v1753_v5 = vld [vmem:[#allocation2 + $0x230] sm:$0xff] }
 0x1e8   : > { %v2404_v47 = vmax.f32 %v2364_v15, %v2368_v23  ;;  %v2025_v13 = vadd.f32 %v1961_v38, %v1885_v14  ;;  %v2101_v0 = vmul.f32 %v9478_v36, %v1613_v19  ;;  %v2164_v10 = vadd.f32 %v2100_v37, %v2024_v8  ;;  %v1754_v19 = vld [vmem:[#allocation2 + $0x238] sm:$0xff]  ;;  %v1892_v51 = vld [vmem:[#allocation2 + $0x229] sm:$0xff] }
 0x1e9   : > { %v9528_v56 = vadd.f32 %v9525_v39, %v2234_v33  ;;  %2528 = vst.msk [vmem:[#allocation4 + $0x51] sm:$0xff] %vm250_vm0, %v2512_v11  ;;  %v1824_v20 = vmul.f32 %v9463_v53, %v1752_v30  ;;  %v1546_v24 = vmul.f32 %v9407_v44, %v1474_v27  ;;  %v1823_v15 = vmul.f32 %v9463_v53, %v1751_v43  ;;  %v2032_v14 = vld [vmem:[#allocation2 + $0x22a] sm:$0xff]  ;;  %v2033_v30 = vld [vmem:[#allocation2 + $0x232] sm:$0xff] }
 0x1ea   : > { %2436 = vst.msk [vmem:[#allocation3 + $0xd8] sm:$0xff] %vm250_vm0, %v2404_v47  ;;  %v1749_v2 = vadd.f32 %v1685_v50, %v1609_v40  ;;  %v2165_v4 = vadd.f32 %v2101_v0, %v2025_v13  ;;  %v1686_v60 = vmul.f32 %v9425_v31, %v1614_v55  ;;  %v1962_v63 = vmul.f32 %v9506_v34, %v1474_v27  ;;  %v1893_v40 = vld [vmem:[#allocation2 + $0x231] sm:$0xff]  ;;  %v1894_v27 = vld [vmem:[#allocation2 + $0x239] sm:$0xff]  ;;  %v2493_v11 = vld [vmem:[#allocation3 + $0xa1] ss:$2 sm:$0xff] }
 0x1eb   : > { %v2235_v25 = vmul.f32 %v9512_v57, %v2164_v10  ;;  %v1610_v22 = vadd.f32 %v1546_v24, %v1470_v59  ;;  %v1887_v58 = vadd.f32 %v1823_v15, %v1747_v49  ;;  %v1963_v44 = vmul.f32 %v9506_v34, %v1891_v7  ;;  %v5975_v47 = vld [vmem:[%s10538_s2 + $0x108] sm:$0xff]  ;;  %v2495_v15 = vld [vmem:[#allocation3 + $0xb1] ss:$2 sm:$0xff] }
 0x1ec   : > { %v2236_v35 = vmul.f32 %v9512_v57, %v2165_v4  ;;  %v2026_v48 = vadd.f32 %v1962_v63, %v1886_v16  ;;  %v2102_v46 = vmul.f32 %v9478_v36, %v1614_v55  ;;  %v2513_v33 = vmax.f32 %v2459_v41, %v2491_v21  ;;  %v2463_v55 = vld [vmem:[#allocation3 + $0xb0] ss:$2 sm:$0xff]  ;;  %v2568_v63 = vld [vmem:[%s10538_s2] sm:$0xff] }
 0x1ed   : > { %v1888_v31 = vadd.f32 %v1824_v20, %v1748_v1  ;;  %v2027_v17 = vadd.f32 %v1963_v44, %v1887_v58  ;;  %v2103_v38 = vmul.f32 %v9478_v36, %v2031_v54  ;;  %v1825_v23 = vmul.f32 %v9463_v53, %v1753_v5  ;;  %v2461_v1 = vld [vmem:[#allocation3 + $0xa0] ss:$2 sm:$0xff]  ;;  %v2570_v58 = vld [vmem:[%s10538_s2 + $0x10] sm:$0xff]  ;;  %v2571_v44 = vld [vmem:[%s10538_s2 + $0x18] sm:$0xff] }
 0x1ee   : > { %v1750_v59 = vadd.f32 %v1686_v60, %v1610_v22  ;;  %v2166_v49 = vadd.f32 %v2102_v46, %v2026_v48  ;;  %2529 = vst.msk [vmem:[#allocation4 + $0x59] sm:$0xff] %vm250_vm0, %v2513_v33  ;;  %v1826_v8 = vmul.f32 %v9463_v53, %v1754_v19  ;;  %v1964_v37 = vmul.f32 %v9506_v34, %v1892_v51  ;;  %v5974_v53 = vld [vmem:[%s10538_s2 + $0x100] sm:$0xff]  ;;  %v5976_v19 = vld [vmem:[%s10538_s2 + $0x110] sm:$0xff] }
 0x1ef   : > { %v2167_v43 = vadd.f32 %v2103_v38, %v2027_v17  ;;  %2540 = vst.msk [vmem:[#allocation4 + $0x59] sm:$0x1] %vm253_vm1, %v10547_v3  ;;  %2548 = vst.msk [vmem:[#allocation4 + $0x60] sm:$0x1] %vm253_vm1, %v10547_v3  ;;  %v1889_v16 = vadd.f32 %v1825_v23, %v1749_v2  ;;  %v1965_v50 = vmul.f32 %v9506_v34, %v1893_v40  ;;  %v2369_v41 = vmax.f32 %v9528_v56, 0.0  ;;  %v2034_v60 = vld [vmem:[#allocation2 + $0x23a] sm:$0xff] }
 0x1f0   : > { %v9558_v13 = vadd.f32 %v9525_v39, %v2235_v25  ;;  %v9561_v0 = vadd.f32 %v9525_v39, %v2236_v35  ;;  %v9563_v10 = vld [vmem:[#allocation4 + $0x51] sm:$0xff]  ;;  %v2028_v20 = vadd.f32 %v1964_v37, %v1888_v31  ;;  %v2104_v24 = vmul.f32 %v9478_v36, %v2032_v14  ;;  %v2569_v56 = vld [vmem:[%s10538_s2 + $0x8] sm:$0xff] }
 0x1f1   : > { %v9565_v7 = vld [vmem:[#allocation4 + $0x50] sm:$0xff]  ;;  %6561 = vmatprep.mubr.msk.f32.mxu1 %vm250_vm0, %v9563_v10  ;;  %v2238_v21 = vmul.f32 %v9512_v57, %v2167_v43  ;;  %v2029_v2 = vadd.f32 %v1965_v50, %v1889_v16  ;;  %v2105_v4 = vmul.f32 %v9478_v36, %v2033_v30  ;;  %v2237_v54 = vmul.f32 %v9512_v57, %v2166_v49  ;;  %v2465_v33 = vld [vmem:[#allocation3 + $0xc0] ss:$2 sm:$0xff]  ;;  %v2497_v40 = vld [vmem:[#allocation3 + $0xc1] ss:$2 sm:$0xff] }
 0x1f2   : > { %6678 = vmatprep.mubr.msk.f32.mxu0 %vm250_vm0, %v9565_v7  ;;  %v1890_v5 = vadd.f32 %v1826_v8, %v1750_v59  ;;  %v2168_v25 = vadd.f32 %v2104_v24, %v2028_v20  ;;  %v1966_v22 = vmul.f32 %v9506_v34, %v1894_v27  ;;  %v2514_v48 = vmax.f32 %v2461_v1, %v2493_v11  ;;  %v5977_v34 = vld [vmem:[%s10538_s2 + $0x118] sm:$0xff] }
 0x1f3   : > { %v2309_v51 = vadd.f32 %v9525_v39, %v2238_v21  ;;  %v2169_v35 = vadd.f32 %v2105_v4, %v2029_v2  ;;  %v2515_v46 = vmax.f32 %v2463_v55, %v2495_v15  ;;  %v2106_v38 = vmul.f32 %v9478_v36, %v2034_v60  ;;  %v2467_v37 = vld [vmem:[#allocation3 + $0xd0] ss:$2 sm:$0xff]  ;;  %v2499_v30 = vld [vmem:[#allocation3 + $0xd1] ss:$2 sm:$0xff]  ;;  %v2572_v60 = vld [vmem:[%s10538_s2 + $0x20] sm:$0xff] }
 0x1f4   : > { %v2239_v31 = vmul.f32 %v9512_v57, %v2168_v25  ;;  %v2030_v17 = vadd.f32 %v1966_v22, %v1890_v5  ;;  %v7152_v23 = vpack.c.bf16 %v5975_v47, %v5974_v53  ;;  %2530 = vst.msk [vmem:[#allocation4 + $0x61] sm:$0xff] %vm250_vm0, %v2514_v48  ;;  %v7104_v49 = vpack.c.bf16 %v2569_v56, %v2568_v63  ;;  %v2573_v63 = vld [vmem:[%s10538_s2 + $0x28] sm:$0xff]  ;;  %v2575_v48 = vld [vmem:[%s10538_s2 + $0x38] sm:$0xff] }
 0x1f5   : > { %v2373_v14 = vmax.f32 %v2309_v51, 0.0  ;;  %v2240_v59 = vmul.f32 %v9512_v57, %v2169_v35  ;;  %2531 = vst.msk [vmem:[#allocation4 + $0x69] sm:$0xff] %vm250_vm0, %v2515_v46  ;;  %v7108_v8 = vpack.c.bf16 %v2571_v44, %v2570_v58  ;;  %v2516_v36 = vmax.f32 %v2465_v33, %v2497_v40  ;;  %v2574_v44 = vld [vmem:[%s10538_s2 + $0x30] sm:$0xff]  ;;  %v5998_v40 = vld [vmem:[%s10538_s2 + $0x140] sm:$0xff] }
 0x1f6   : > { %v9601_v27 = vld [vmem:[#allocation4 + $0x59] sm:$0xff]  ;;  %v2310_v16 = vadd.f32 %v9525_v39, %v2239_v31  ;;  %v2170_v50 = vadd.f32 %v2106_v38, %v2030_v17  ;;  %2541 = vst.msk [vmem:[#allocation4 + $0x69] sm:$0x1] %vm253_vm1, %v10547_v3  ;;  %2549 = vst.msk [vmem:[#allocation4 + $0x70] sm:$0x1] %vm253_vm1, %v10547_v3  ;;  %7153 = vmatprep.subr.bf16.mxu0 %v7152_v23  ;;  %v7156_v1 = vpack.c.bf16 %v5977_v34, %v5976_v19  ;;  %v5999_v17 = vld [vmem:[%s10538_s2 + $0x148] sm:$0xff] }
 0x1f7   : > { %v9603_v43 = vld [vmem:[#allocation4 + $0x58] sm:$0xff]  ;;  %v2370_v11 = vmax.f32 %v9558_v13, 0.0  ;;  %v2405_v55 = vmax.f32 %v2369_v41, %v2373_v14  ;;  %6562 = vmatmul.mubr.msk.f32.gmra.mrb[10].mxu1 %vm250_vm0, %v9601_v27  ;;  %v2311_v53 = vadd.f32 %v9525_v39, %v2240_v59  ;;  %v2308_v47 = vadd.f32 %v9525_v39, %v2237_v54  ;;  %7105 = vmatprep.subr.bf16.mxu1 %v7104_v49  ;;  %v5978_v13 = vld [vmem:[%s10538_s2 + $0x120] sm:$0xff]  ;;  %v5979_v41 = vld [vmem:[%s10538_s2 + $0x128] sm:$0xff] }
 0x1f8   : > { %6679 = vmatmul.mubr.msk.f32.gmra.mrb[8].mxu0 %vm250_vm0, %v9603_v43  ;;  %v2374_v20 = vmax.f32 %v2310_v16, 0.0  ;;  %v2241_v24 = vmul.f32 %v9512_v57, %v2170_v50  ;;  %2532 = vst.msk [vmem:[#allocation4 + $0x71] sm:$0xff] %vm250_vm0, %v2516_v36  ;;  %v2517_v15 = vmax.f32 %v2467_v37, %v2499_v30  ;;  %v2371_v21 = vmax.f32 %v9561_v0, 0.0  ;;  %7107 = vmatpush3.bf16.msra.mxu1 %v7104_v49  ;;  %v5981_v54 = vld [vmem:[%s10538_s2 + $0x138] sm:$0xff]  ;;  %v2552_v59 = vld [vmem:[#allocation4] sm:$0xff]  ;;  %v2553_v16 = vld [vmem:[#allocation4 + $0x8] sm:$0xff] }
 0x1f9   : > { %7155 = vmatpush3.bf16.msra.mxu0 %v7152_v23  ;;  %2437 = vst.msk [vmem:[#allocation3 + $0xe0] sm:$0xff] %vm250_vm0, %v2405_v55  ;;  %v2375_v2 = vmax.f32 %v2311_v53, 0.0  ;;  %7109 = vmatprep.subr.bf16.mxu1 %v7108_v8  ;;  %v7160_v56 = vpack.c.bf16 %v5979_v41, %v5978_v13  ;;  %v2372_v5 = vmax.f32 %v2308_v47, 0.0  ;;  %v7112_v35 = vpack.c.bf16 %v2573_v63, %v2572_v60  ;;  %v6002_v55 = vld [vmem:[%s10538_s2 + $0x160] sm:$0xff]  ;;  %v6003_v53 = vld [vmem:[%s10538_s2 + $0x168] sm:$0xff]  ;;  %v9806_v63 = vld [vmem:[#allocation4 + $0x52] sm:$0xff] }
 0x1fa   : > { %7157 = vmatprep.subr.bf16.mxu0 %v7156_v1  ;;  %v2406_v57 = vmax.f32 %v2370_v11, %v2374_v20  ;;  %v2312_v4 = vadd.f32 %v9525_v39, %v2241_v24  ;;  %2533 = vst.msk [vmem:[#allocation4 + $0x79] sm:$0xff] %vm250_vm0, %v2517_v15  ;;  %v5980_v39 = vld [vmem:[%s10538_s2 + $0x130] sm:$0xff]  ;;  %v7116_v38 = vpack.c.bf16 %v2575_v48, %v2574_v44  ;;  %v6005_v15 = vld [vmem:[%s10538_s2 + $0x178] sm:$0xff]  ;;  %v9794_v60 = vld [vmem:[#allocation4 + $0x42] sm:$0xff] }
 0x1fb   : > { %v2407_v0 = vmax.f32 %v2371_v21, %v2375_v2  ;;  %2542 = vst.msk [vmem:[#allocation4 + $0x79] sm:$0x1] %vm253_vm1, %v10547_v3  ;;  %2550 = vst.msk [vmem:[#allocation4 + $0x80] sm:$0x1] %vm253_vm1, %v10547_v3  ;;  %v9646_v22 = vld [vmem:[#allocation4 + $0x61] sm:$0xff]  ;;  %v7164_v33 = vpack.c.bf16 %v5981_v54, %v5980_v39  ;;  %v7168_v49 = vpack.c.bf16 %v5999_v17, %v5998_v40  ;;  %v9750_v20 = vld [vmem:[#allocation4 + $0x29] sm:$0xff] }
 0x1fc   : > { %2438 = vst.msk [vmem:[#allocation3 + $0xe8] sm:$0xff] %vm250_vm0, %v2406_v57  ;;  %v2376_v25 = vmax.f32 %v2312_v4, 0.0  ;;  %v9648_v58 = vld [vmem:[#allocation4 + $0x60] sm:$0xff]  ;;  %6564 = vmatprep.mubr.msk.f32.mxu1 %vm250_vm0, %v9646_v22  ;;  %7111 = vmatpush3.bf16.msra.mxu1 %v7108_v8  ;;  %v7176_v47 = vpack.c.bf16 %v6003_v53, %v6002_v55  ;;  %v6004_v24 = vld [vmem:[%s10538_s2 + $0x170] sm:$0xff]  ;;  %v6023_v2 = vld [vmem:[%s10538_s2 + $0x188] sm:$0xff] }
 0x1fd   : > { %7159 = vmatpush3.bf16.msra.mxu0 %v7156_v1  ;;  %2439 = vst.msk [vmem:[#allocation3 + $0xf0] sm:$0xff] %vm250_vm0, %v2407_v0  ;;  %6681 = vmatprep.mubr.msk.f32.mxu0 %vm250_vm0, %v9648_v58  ;;  %v9658_v19 = vld [vmem:[#allocation4 + $0x69] sm:$0xff]  ;;  %v7180_v13 = vpack.c.bf16 %v6005_v15, %v6004_v24  ;;  %v9768_v41 = vld [vmem:[#allocation4 + $0x39] sm:$0xff]  ;;  %v9780_v57 = vld [vmem:[#allocation4 + $0x41] sm:$0xff] }
 0x1fe   : > { %v9660_v51 = vld [vmem:[#allocation4 + $0x68] sm:$0xff]  ;;  %v2408_v46 = vmax.f32 %v2372_v5, %v2376_v25  ;;  %6565 = vmatmul.mubr.msk.f32.gmra.mrb[12].mxu1 %vm250_vm0, %v9658_v19  ;;  %7161 = vmatprep.subr.bf16.mxu0 %v7160_v56  ;;  %v6022_v21 = vld [vmem:[%s10538_s2 + $0x180] sm:$0xff]  ;;  %v6024_v5 = vld [vmem:[%s10538_s2 + $0x190] sm:$0xff] }
 0x1ff   : > { %6682 = vmatmul.mubr.msk.f32.gmra.mrb[10].mxu0 %vm250_vm0, %v9660_v51  ;;  %v9672_v34 = vld [vmem:[#allocation4 + $0x71] sm:$0xff]  ;;  %7113 = vmatprep.subr.bf16.mxu1 %v7112_v35  ;;  %v7184_v4 = vpack.c.bf16 %v6023_v2, %v6022_v21  ;;  %v9814_v0 = vld [vmem:[#allocation4 + $0x5a] sm:$0xff]  ;;  %v3924_v24 = vld [vmem:[#allocation4 + $0x28] sm:$0xff] }
 0x200   : > { %v9674_v31 = vld [vmem:[#allocation4 + $0x70] sm:$0xff]  ;;  %2440 = vst.msk [vmem:[#allocation3 + $0xf8] sm:$0xff] %vm250_vm0, %v2408_v46  ;;  %6567 = vmatprep.mubr.msk.f32.mxu1 %vm250_vm0, %v9672_v34  ;;  %7115 = vmatpush3.bf16.msra.mxu1 %v7112_v35  ;;  %v6025_v35 = vld [vmem:[%s10538_s2 + $0x198] sm:$0xff]  ;;  %v6026_v17 = vld [vmem:[%s10538_s2 + $0x1a0] sm:$0xff] }
 0x201   : > { %6684 = vmatprep.mubr.msk.f32.mxu0 %vm250_vm0, %v9674_v31  ;;  %7163 = vmatpush3.bf16.msra.mxu0 %v7160_v56  ;;  %v9818_v56 = vld [vmem:[#allocation4 + $0x62] sm:$0xff]  ;;  %v9828_v54 = vld [vmem:[#allocation4 + $0x6a] sm:$0xff]  ;;  %v3689_v48 = vld [vmem:[#allocation4 + $0x12] sm:$0xff] }
 0x202   : > { %v9684_v23 = vld [vmem:[#allocation4 + $0x79] sm:$0xff]  ;;  %7165 = vmatprep.subr.bf16.mxu0 %v7164_v33  ;;  %7117 = vmatprep.subr.bf16.mxu1 %v7116_v38  ;;  %v6052_v2 = vld [vmem:[%s10538_s2 + $0x1f0] sm:$0xff] }
 0x203   : > { %v9686_v14 = vld [vmem:[#allocation4 + $0x78] sm:$0xff]  ;;  %v2469_v8 = vld [vmem:[#allocation3 + $0xe0] ss:$2 sm:$0xff]  ;;  %v2501_v37 = vld [vmem:[#allocation3 + $0xe1] ss:$2 sm:$0xff]  ;;  %6568 = vmatmul.mubr.msk.f32.gmra.mrb[14].mxu1 %vm250_vm0, %v9684_v23 }
 0x204   : > { %6685 = vmatmul.mubr.msk.f32.gmra.mrb[12].mxu0 %vm250_vm0, %v9686_v14  ;;  %v2518_v30 = vmax.f32 %v2469_v8, %v2501_v37  ;;  %6586 = vmatprep.mubr.msk.f32.mxu1 %vm250_vm0, %v2552_v59  ;;  %v9835_v25 = vld [vmem:[#allocation4 + $0x72] sm:$0xff]  ;;  %v3690_v40 = vld [vmem:[#allocation4 + $0x1a] sm:$0xff]  ;;  %v9858_v59 = vld [vmem:[#allocation4 + $0x22] sm:$0xff] }
 0x205   : > { %7167 = vmatpush3.bf16.msra.mxu0 %v7164_v33  ;;  %7119 = vmatpush3.bf16.msra.mxu1 %v7116_v38  ;;  %v7188_v33 = vpack.c.bf16 %v6025_v35, %v6024_v5  ;;  %v6027_v38 = vld [vmem:[%s10538_s2 + $0x1a8] sm:$0xff]  ;;  %v6028_v37 = vld [vmem:[%s10538_s2 + $0x1b0] sm:$0xff]  ;;  %v6049_v55 = vld [vmem:[%s10538_s2 + $0x1d8] sm:$0xff] }
 0x206   : > { %2534 = vst.msk [vmem:[#allocation4 + $0x81] sm:$0xff] %vm250_vm0, %v2518_v30  ;;  %7169 = vmatprep.subr.bf16.mxu0 %v7168_v49  ;;  %7376 = vmatprep.subr.bf16.mxu1 %v7856_v62  ;;  %v9862_v8 = vld [vmem:[#allocation4 + $0x2a] sm:$0xff]  ;;  %v6029_v30 = vld [vmem:[%s10538_s2 + $0x1b8] sm:$0xff]  ;;  %v3923_v53 = vld [vmem:[#allocation4 + $0x20] sm:$0xff] }
 0x207   : > { %v2471_v50 = vld [vmem:[#allocation3 + $0xf0] ss:$2 sm:$0xff]  ;;  %v2503_v36 = vld [vmem:[#allocation3 + $0xf1] ss:$2 sm:$0xff]  ;;  %v6050_v15 = vld [vmem:[%s10538_s2 + $0x1e0] sm:$0xff] }
 0x208   : > { %v2519_v1 = vmax.f32 %v2471_v50, %v2503_v36  ;;  %6587 = vmatmul.mubr.msk.f32.vlgmr.msra.gmra.mrb[0].mxu1 %vm250_vm0, %v2553_v16  ;;  %v9872_v16 = vld [vmem:[#allocation4 + $0x32] sm:$0xff]  ;;  %v7196_v50 = vpack.c.bf16 %v6029_v30, %v6028_v37  ;;  %v9876_v36 = vld [vmem:[#allocation4 + $0x3a] sm:$0xff]  ;;  %v6071_v35 = vld [vmem:[%s10538_s2 + $0x208] sm:$0xff] }
 0x209   : > { %6589 = vmatprep.mubr.msk.f32.mxu1 %vm250_vm0, %v9304_v12  ;;  %7380 = vmatpush3.bf16.msra.mxu1 %v7856_v62  ;;  %v6000_v12 = vld [vmem:[%s10538_s2 + $0x150] sm:$0xff]  ;;  %v6103_v37 = vld [vmem:[%s10539_s3 + $0x68] sm:$0xff] }
 0x20a   : > { %2535 = vst.msk [vmem:[#allocation4 + $0x89] sm:$0xff] %vm250_vm0, %v2519_v1  ;;  %7377 = vmatprep.subr.bf16.mxu1 %v7874_v6  ;;  %v6046_v1 = vld [vmem:[%s10538_s2 + $0x1c0] sm:$0xff] }
 0x20b   : > { %2543 = vst.msk [vmem:[#allocation4 + $0x89] sm:$0x1] %vm253_vm1, %v10547_v3  ;;  %2551 = vst.msk [vmem:[#allocation4 + $0x90] sm:$0x1] %vm253_vm1, %v10547_v3 }
 0x20c   : > { %6590 = vmatmul.mubr.msk.f32.gmra.mrb[2].mxu1 %vm250_vm0, %v9318_v26  ;;  %v6001_v26 = vld [vmem:[%s10538_s2 + $0x158] sm:$0xff] }
 0x20d   : > { %v9705_v11 = vld [vmem:[#allocation4 + $0x80] sm:$0xff]  ;;  %6592 = vmatprep.mubr.msk.f32.mxu1 %vm250_vm0, %v9329_v52  ;;  %7381 = vmatpush3.bf16.msra.mxu1 %v7874_v6  ;;  %v3455_v6 = vld [vmem:[#allocation4 + $0x11] sm:$0xff]  ;;  %v7172_v52 = vpack.c.bf16 %v6001_v26, %v6000_v12  ;;  %v6047_v12 = vld [vmem:[%s10538_s2 + $0x1c8] sm:$0xff] }
 0x20e   : > { %6687 = vmatprep.mubr.msk.f32.mxu0 %vm250_vm0, %v9705_v11  ;;  %7378 = vmatprep.subr.bf16.mxu1 %v7896_v18  ;;  %v9824_v39 = vld [vmem:[#allocation4 + $0x81] sm:$0xff]  ;;  %v7200_v26 = vpack.c.bf16 %v6047_v12, %v6046_v1 }
 0x20f   : > { %v9847_v46 = vld [vmem:[#allocation4 + $0x7a] sm:$0xff] }
 0x210   : > { %6593 = vmatmul.mubr.msk.f32.gmra.mrb[4].mxu1 %vm250_vm0, %v9350_v61  ;;  %v3456_v61 = vld [vmem:[#allocation4 + $0x19] sm:$0xff] }
 0x211   : > { %6595 = vmatprep.mubr.msk.f32.mxu1 %vm250_vm0, %v9360_v29  ;;  %7382 = vmatpush3.bf16.msra.mxu1 %v7896_v18  ;;  %v9743_v18 = vld [vmem:[#allocation4 + $0x21] sm:$0xff] }
 0x212   : > { %v9717_v62 = vld [vmem:[#allocation4 + $0x88] sm:$0xff]  ;;  %7379 = vmatprep.subr.bf16.mxu1 %v7920_v32  ;;  %v4733_v12 = vld [vmem:[%s10539_s3] sm:$0xff] }
 0x213   : > { %6688 = vmatmul.mubr.msk.f32.gmra.mrb[14].mxu0 %vm250_vm0, %v9717_v62  ;;  %v9837_v44 = vld [vmem:[#allocation4 + $0x89] sm:$0xff] }
 0x214   : > { %6706 = vmatprep.mubr.msk.f32.mxu0 %vm250_vm0, %v3455_v6  ;;  %6596 = vmatmul.mubr.msk.f32.gmra.mrb[6].mxu1 %vm250_vm0, %v9376_v45  ;;  %v9902_v6 = vld [vmem:[#allocation4 + $0x82] sm:$0xff] }
 0x215   : > { %6598 = vmatprep.mubr.msk.f32.mxu1 %vm250_vm0, %v9385_v9  ;;  %7383 = vmatpush3.bf16.msra.mxu1 %v7920_v32  ;;  %v9762_v32 = vld [vmem:[#allocation4 + $0x31] sm:$0xff] }
 0x217   : > { %6707 = vmatmul.mubr.msk.f32.vlgmr.msra.gmra.mrb[0].mxu0 %vm250_vm0, %v3456_v61  ;;  %v6048_v61 = vld [vmem:[%s10538_s2 + $0x1d0] sm:$0xff] }
 0x218   : > { %7171 = vmatpush3.bf16.msra.mxu0 %v7168_v49  ;;  %6709 = vmatprep.mubr.msk.f32.mxu0 %vm250_vm0, %v9743_v18  ;;  %v7192_v49 = vpack.c.bf16 %v6027_v38, %v6026_v17  ;;  %v6100_v38 = vld [vmem:[%s10539_s3 + $0x50] sm:$0xff] }
 0x219   : > { %7173 = vmatprep.subr.bf16.mxu0 %v7172_v52  ;;  %6599 = vmatmul.mubr.msk.f32.gmra.mrb[8].mxu1 %vm250_vm0, %v9483_v28 }
 0x21a   : > { %6601 = vmatprep.mubr.msk.f32.mxu1 %vm250_vm0, %v9565_v7 }
 0x21b   : > { %6710 = vmatmul.mubr.msk.f32.gmra.mrb[2].mxu0 %vm250_vm0, %v9750_v20 }
 0x21c   : > { %6712 = vmatprep.mubr.msk.f32.mxu0 %vm250_vm0, %v9762_v32  ;;  %7175 = vmatpush3.bf16.msra.mxu0 %v7172_v52  ;;  %v9906_v52 = vld [vmem:[#allocation4 + $0x8a] sm:$0xff] }
 0x21d   : > { %7177 = vmatprep.subr.bf16.mxu0 %v7176_v47  ;;  %6602 = vmatmul.mubr.msk.f32.gmra.mrb[10].mxu1 %vm250_vm0, %v9603_v43 }
 0x21e   : > { %6604 = vmatprep.mubr.msk.f32.mxu1 %vm250_vm0, %v9648_v58 }
 0x21f   : > { %6713 = vmatmul.mubr.msk.f32.gmra.mrb[4].mxu0 %vm250_vm0, %v9768_v41 }
 0x220   : > { %6715 = vmatprep.mubr.msk.f32.mxu0 %vm250_vm0, %v9780_v57  ;;  %7179 = vmatpush3.bf16.msra.mxu0 %v7176_v47  ;;  %v7204_v47 = vpack.c.bf16 %v6049_v55, %v6048_v61  ;;  %v6187_v61 = vld [vmem:[%s10539_s3 + $0x208] sm:$0xff] }
 0x221   : > { %7181 = vmatprep.subr.bf16.mxu0 %v7180_v13  ;;  %6605 = vmatmul.mubr.msk.f32.gmra.mrb[12].mxu1 %vm250_vm0, %v9660_v51 }
 0x222   : > { %6607 = vmatprep.mubr.msk.f32.mxu1 %vm250_vm0, %v9674_v31 }
 0x223   : > { %6716 = vmatmul.mubr.msk.f32.gmra.mrb[6].mxu0 %vm250_vm0, %v9481_v42  ;;  %v9802_v42 = vld [vmem:[#allocation4 + $0x4a] sm:$0xff] }
 0x224   : > { %6718 = vmatprep.mubr.msk.f32.mxu0 %vm250_vm0, %v9563_v10  ;;  %7183 = vmatpush3.bf16.msra.mxu0 %v7180_v13  ;;  %v6051_v13 = vld [vmem:[%s10538_s2 + $0x1e8] sm:$0xff] }
 0x225   : > { %7185 = vmatprep.subr.bf16.mxu0 %v7184_v4  ;;  %6608 = vmatmul.mubr.msk.f32.gmra.mrb[14].mxu1 %vm250_vm0, %v9686_v14  ;;  %v7208_v21 = vpack.c.bf16 %v6051_v13, %v6050_v15  ;;  %v6190_v15 = vld [vmem:[%s10539_s3 + $0x220] sm:$0xff]  ;;  %v6191_v13 = vld [vmem:[%s10539_s3 + $0x228] sm:$0xff] }
 0x226   : > { %6638 = vmatprep.mubr.msk.f32.mxu1 %vm250_vm0, %v9794_v60 }
 0x227   : > { %6719 = vmatmul.mubr.msk.f32.gmra.mrb[8].mxu0 %vm250_vm0, %v9601_v27 }
 0x228   : > { %6721 = vmatprep.mubr.msk.f32.mxu0 %vm250_vm0, %v9646_v22 }
 0x229   : > { %6639 = vmatmul.mubr.msk.f32.vlgmr.msra.gmra.mrb[8].mxu1 %vm250_vm0, %v9802_v42 }
 0x22a   : > { %6641 = vmatprep.mubr.msk.f32.mxu1 %vm250_vm0, %v9806_v63 }
 0x22b   : > { %6722 = vmatmul.mubr.msk.f32.gmra.mrb[10].mxu0 %vm250_vm0, %v9658_v19 }
 0x22c   : > { %6724 = vmatprep.mubr.msk.f32.mxu0 %vm250_vm0, %v9672_v34 }
 0x22d   : > { %6642 = vmatmul.mubr.msk.f32.gmra.mrb[10].mxu1 %vm250_vm0, %v9814_v0 }
 0x22e   : > { %6644 = vmatprep.mubr.msk.f32.mxu1 %vm250_vm0, %v9818_v56 }
 0x22f   : > { %6725 = vmatmul.mubr.msk.f32.gmra.mrb[12].mxu0 %vm250_vm0, %v9684_v23 }
 0x230   : > { %6727 = vmatprep.mubr.msk.f32.mxu0 %vm250_vm0, %v9824_v39 }
 0x231   : > { %6645 = vmatmul.mubr.msk.f32.gmra.mrb[12].mxu1 %vm250_vm0, %v9828_v54 }
 0x232   : > { %6647 = vmatprep.mubr.msk.f32.mxu1 %vm250_vm0, %v9835_v25 }
 0x233   : > { %6728 = vmatmul.mubr.msk.f32.gmra.mrb[14].mxu0 %vm250_vm0, %v9837_v44 }
 0x234   : > { %6746 = vmatprep.mubr.msk.f32.mxu0 %vm250_vm0, %v3689_v48 }
 0x235   : > { %6648 = vmatmul.mubr.msk.f32.gmra.mrb[14].mxu1 %vm250_vm0, %v9847_v46 }
 0x237   : > { %6747 = vmatmul.mubr.msk.f32.vlgmr.msra.gmra.mrb[0].mxu0 %vm250_vm0, %v3690_v40 }
 0x238   : > { %7187 = vmatpush3.bf16.msra.mxu0 %v7184_v4  ;;  %6749 = vmatprep.mubr.msk.f32.mxu0 %vm250_vm0, %v9858_v59  ;;  %v6053_v4 = vld [vmem:[%s10538_s2 + $0x1f8] sm:$0xff] }
 0x239   : > { %7189 = vmatprep.subr.bf16.mxu0 %v7188_v33  ;;  %v7212_v5 = vpack.c.bf16 %v6053_v4, %v6052_v2  ;;  %v6192_v2 = vld [vmem:[%s10539_s3 + $0x230] sm:$0xff]  ;;  %v6193_v4 = vld [vmem:[%s10539_s3 + $0x238] sm:$0xff] }
 0x23b   : > { %6750 = vmatmul.mubr.msk.f32.gmra.mrb[2].mxu0 %vm250_vm0, %v9862_v8 }
 0x23c   : > { %6752 = vmatprep.mubr.msk.f32.mxu0 %vm250_vm0, %v9872_v16  ;;  %7191 = vmatpush3.bf16.msra.mxu0 %v7188_v33 }
 0x23d   : > { %7193 = vmatprep.subr.bf16.mxu0 %v7192_v49 }
 0x23f   : > { %6753 = vmatmul.mubr.msk.f32.gmra.mrb[4].mxu0 %vm250_vm0, %v9876_v36 }
 0x240   : > { %6755 = vmatprep.mubr.msk.f32.mxu0 %vm250_vm0, %v9794_v60  ;;  %7195 = vmatpush3.bf16.msra.mxu0 %v7192_v49  ;;  %v6102_v49 = vld [vmem:[%s10539_s3 + $0x60] sm:$0xff] }
 0x241   : > { %7197 = vmatprep.subr.bf16.mxu0 %v7196_v50  ;;  %v7240_v30 = vpack.c.bf16 %v6103_v37, %v6102_v49 }
 0x243   : > { %6756 = vmatmul.mubr.msk.f32.gmra.mrb[6].mxu0 %vm250_vm0, %v9802_v42 }
 0x244   : > { %6758 = vmatprep.mubr.msk.f32.mxu0 %vm250_vm0, %v9806_v63  ;;  %7199 = vmatpush3.bf16.msra.mxu0 %v7196_v50  ;;  %v6105_v50 = vld [vmem:[%s10539_s3 + $0x78] sm:$0xff] }
 0x245   : > { %7201 = vmatprep.subr.bf16.mxu0 %v7200_v26 }
 0x247   : > { %6759 = vmatmul.mubr.msk.f32.gmra.mrb[8].mxu0 %vm250_vm0, %v9814_v0 }
 0x248   : > { %6761 = vmatprep.mubr.msk.f32.mxu0 %vm250_vm0, %v9818_v56 }
 0x24b   : > { %6762 = vmatmul.mubr.msk.f32.gmra.mrb[10].mxu0 %vm250_vm0, %v9828_v54 }
 0x24c   : > { %6764 = vmatprep.mubr.msk.f32.mxu0 %vm250_vm0, %v9835_v25 }
 0x24f   : > { %6765 = vmatmul.mubr.msk.f32.gmra.mrb[12].mxu0 %vm250_vm0, %v9847_v46 }
 0x250   : > { %6767 = vmatprep.mubr.msk.f32.mxu0 %vm250_vm0, %v9902_v6 }
 0x253   : > { %6768 = vmatmul.mubr.msk.f32.gmra.mrb[14].mxu0 %vm250_vm0, %v9906_v52 }
 0x254   : > { %6786 = vmatprep.mubr.msk.f32.mxu0 %vm250_vm0, %v3923_v53  ;;  %v6188_v53 = vld [vmem:[%s10539_s3 + $0x210] sm:$0xff] }
 0x257   : > { %6787 = vmatmul.mubr.msk.f32.vlgmr.msra.gmra.mrb[0].mxu0 %vm250_vm0, %v3924_v24 }
 0x258   : > { %7203 = vmatpush3.bf16.msra.mxu0 %v7200_v26  ;;  %6789 = vmatprep.mubr.msk.f32.mxu0 %vm250_vm0, %v9360_v29  ;;  %v6070_v29 = vld [vmem:[%s10538_s2 + $0x200] sm:$0xff]  ;;  %v4734_v26 = vld [vmem:[%s10539_s3 + $0x8] sm:$0xff] }
 0x259   : > { %7205 = vmatprep.subr.bf16.mxu0 %v7204_v47 }
 0x25b   : > { %6790 = vmatmul.mubr.msk.f32.gmra.mrb[2].mxu0 %vm250_vm0, %v9376_v45  ;;  %v7216_v45 = vpack.c.bf16 %v6071_v35, %v6070_v29  ;;  %v10148_v35 = vld [vmem:[%s10540_s4 + $0x1] ss:$0 sm:$0xff] }
 0x25c   : > { %6792 = vmatprep.mubr.msk.f32.mxu0 %vm250_vm0, %v9385_v9  ;;  %7207 = vmatpush3.bf16.msra.mxu0 %v7204_v47  ;;  %v3937_v9 = vld [vmem:[#allocation4 + $0x90] sm:$0xff]  ;;  %v6189_v47 = vld [vmem:[%s10539_s3 + $0x218] sm:$0xff] }
 0x25d   : > { %7209 = vmatprep.subr.bf16.mxu0 %v7208_v21  ;;  %v10120_v24 = vpack.c.bf16 %v6189_v47, %v6188_v53 }
 0x25f   : > { %6793 = vmatmul.mubr.msk.f32.gmra.mrb[4].mxu0 %vm250_vm0, %v9483_v28  ;;  %v3938_v28 = vld [vmem:[#allocation4 + $0x98] sm:$0xff] }
 0x260   : > { %6795 = vmatprep.mubr.msk.f32.mxu0 %vm250_vm0, %v9565_v7  ;;  %7211 = vmatpush3.bf16.msra.mxu0 %v7208_v21  ;;  %v6072_v7 = vld [vmem:[%s10538_s2 + $0x210] sm:$0xff]  ;;  %v10130_v21 = vpack.c.bf16 %v6191_v13, %v6190_v15 }
 0x261   : > { %7213 = vmatprep.subr.bf16.mxu0 %v7212_v5 }
 0x263   : > { %6796 = vmatmul.mubr.msk.f32.gmra.mrb[6].mxu0 %vm250_vm0, %v9603_v43  ;;  %v6073_v43 = vld [vmem:[%s10538_s2 + $0x218] sm:$0xff] }
 0x264   : > { %6798 = vmatprep.mubr.msk.f32.mxu0 %vm250_vm0, %v9648_v58  ;;  %7215 = vmatpush3.bf16.msra.mxu0 %v7212_v5  ;;  %v7220_v58 = vpack.c.bf16 %v6073_v43, %v6072_v7  ;;  %v10141_v5 = vpack.c.bf16 %v6193_v4, %v6192_v2  ;;  %v10156_v43 = vld [vmem:[%s10541_s5 + $0x1] ss:$0 sm:$0xff] }
 0x265   : > { %7217 = vmatprep.subr.bf16.mxu0 %v7216_v45 }
 0x267   : > { %6799 = vmatmul.mubr.msk.f32.gmra.mrb[8].mxu0 %vm250_vm0, %v9660_v51  ;;  %v6074_v51 = vld [vmem:[%s10538_s2 + $0x220] sm:$0xff] }
 0x268   : > { %6801 = vmatprep.mubr.msk.f32.mxu0 %vm250_vm0, %v9674_v31  ;;  %v6075_v31 = vld [vmem:[%s10538_s2 + $0x228] sm:$0xff] }
 0x26b   : > { %6802 = vmatmul.mubr.msk.f32.gmra.mrb[10].mxu0 %vm250_vm0, %v9686_v14  ;;  %v7224_v14 = vpack.c.bf16 %v6075_v31, %v6074_v51 }
 0x26c   : > { %6804 = vmatprep.mubr.msk.f32.mxu0 %vm250_vm0, %v9705_v11  ;;  %v6076_v11 = vld [vmem:[%s10538_s2 + $0x230] sm:$0xff] }
 0x26f   : > { %6805 = vmatmul.mubr.msk.f32.gmra.mrb[12].mxu0 %vm250_vm0, %v9717_v62  ;;  %v6077_v62 = vld [vmem:[%s10538_s2 + $0x238] sm:$0xff] }
 0x270   : > { %6807 = vmatprep.mubr.msk.f32.mxu0 %vm250_vm0, %v3937_v9 }
 0x273   : > { %6808 = vmatmul.mubr.msk.f32.gmra.mrb[14].mxu0 %vm250_vm0, %v3938_v28 }
 0x274   : > { %6826 = vmatprep.mubr.msk.f32.mxu0 %vm250_vm0, %v9743_v18  ;;  %v7228_v18 = vpack.c.bf16 %v6077_v62, %v6076_v11 }
 0x277   : > { %6827 = vmatmul.mubr.msk.f32.vlgmr.msra.gmra.mrb[0].mxu0 %vm250_vm0, %v9750_v20  ;;  %v4162_v20 = vld [vmem:[#allocation4 + $0x49] sm:$0xff] }
 0x278   : > { %7219 = vmatpush3.bf16.msra.mxu0 %v7216_v45  ;;  %6829 = vmatprep.mubr.msk.f32.mxu0 %vm250_vm0, %v9762_v32 }
 0x279   : > { %7221 = vmatprep.subr.bf16.mxu0 %v7220_v58 }
 0x27b   : > { %6830 = vmatmul.mubr.msk.f32.gmra.mrb[2].mxu0 %vm250_vm0, %v9768_v41 }
 0x27c   : > { %6832 = vmatprep.mubr.msk.f32.mxu0 %vm250_vm0, %v9780_v57  ;;  %7223 = vmatpush3.bf16.msra.mxu0 %v7220_v58 }
 0x27d   : > { %7225 = vmatprep.subr.bf16.mxu0 %v7224_v14 }
 0x27f   : > { %6833 = vmatmul.mubr.msk.f32.gmra.mrb[4].mxu0 %vm250_vm0, %v4162_v20 }
 0x280   : > { %6835 = vmatprep.mubr.msk.f32.mxu0 %vm250_vm0, %v9563_v10  ;;  %7227 = vmatpush3.bf16.msra.mxu0 %v7224_v14  ;;  %v4171_v10 = vld [vmem:[#allocation4 + $0x91] sm:$0xff] }
 0x281   : > { %7229 = vmatprep.subr.bf16.mxu0 %v7228_v18 }
 0x283   : > { %6836 = vmatmul.mubr.msk.f32.gmra.mrb[6].mxu0 %vm250_vm0, %v9601_v27  ;;  %v4172_v27 = vld [vmem:[#allocation4 + $0x99] sm:$0xff] }
 0x284   : > { %6838 = vmatprep.mubr.msk.f32.mxu0 %vm250_vm0, %v9646_v22  ;;  %7231 = vmatpush3.bf16.msra.mxu0 %v7228_v18  ;;  %v4405_v22 = vld [vmem:[#allocation4 + $0x92] sm:$0xff] }
 0x287   : > { %6839 = vmatmul.mubr.msk.f32.gmra.mrb[8].mxu0 %vm250_vm0, %v9658_v19  ;;  %v4406_v19 = vld [vmem:[#allocation4 + $0x9a] sm:$0xff] }
 0x288   : > { %6841 = vmatprep.mubr.msk.f32.mxu0 %vm250_vm0, %v9672_v34 }
 0x28b   : > { %6842 = vmatmul.mubr.msk.f32.gmra.mrb[10].mxu0 %vm250_vm0, %v9684_v23 }
 0x28c   : > { %6844 = vmatprep.mubr.msk.f32.mxu0 %vm250_vm0, %v9824_v39 }
 0x28f   : > { %6845 = vmatmul.mubr.msk.f32.gmra.mrb[12].mxu0 %vm250_vm0, %v9837_v44  ;;  %v6099_v44 = vld [vmem:[%s10539_s3 + $0x48] sm:$0xff] }
 0x290   : > { %6847 = vmatprep.mubr.msk.f32.mxu0 %vm250_vm0, %v4171_v10 }
 0x293   : > { %6848 = vmatmul.mubr.msk.f32.gmra.mrb[14].mxu0 %vm250_vm0, %v4172_v27 }
 0x294   : > { %6866 = vmatprep.mubr.msk.f32.mxu0 %vm250_vm0, %v9858_v59  ;;  %v6101_v59 = vld [vmem:[%s10539_s3 + $0x58] sm:$0xff] }
 0x297   : > { %6867 = vmatmul.mubr.msk.f32.vlgmr.msra.gmra.mrb[0].mxu0 %vm250_vm0, %v9862_v8  ;;  %v7236_v8 = vpack.c.bf16 %v6101_v59, %v6100_v38 }
 0x298   : > { %6869 = vmatprep.mubr.msk.f32.mxu0 %vm250_vm0, %v9872_v16  ;;  %v6104_v16 = vld [vmem:[%s10539_s3 + $0x70] sm:$0xff] }
 0x299   : > { %v7244_v1 = vpack.c.bf16 %v6105_v50, %v6104_v16 }
 0x29b   : > { %6870 = vmatmul.mubr.msk.f32.gmra.mrb[2].mxu0 %vm250_vm0, %v9876_v36  ;;  %v4741_v36 = vld [vmem:[#allocation5 + $0x1] sm:$0xff] }
 0x29c   : > { %6872 = vmatprep.mubr.msk.f32.mxu0 %vm250_vm0, %v9794_v60  ;;  %6906 = vmatprep.mubr.msk.f32.mxu1 %vm250_vm0, %v4741_v36 }
 0x29f   : > { %6873 = vmatmul.mubr.msk.f32.gmra.mrb[4].mxu0 %vm250_vm0, %v9802_v42 }
 0x2a0   : > { %6875 = vmatprep.mubr.msk.f32.mxu0 %vm250_vm0, %v9806_v63 }
 0x2a3   : > { %6876 = vmatmul.mubr.msk.f32.gmra.mrb[6].mxu0 %vm250_vm0, %v9814_v0 }
 0x2a4   : > { %6878 = vmatprep.mubr.msk.f32.mxu0 %vm250_vm0, %v9818_v56 }
 0x2a7   : > { %6879 = vmatmul.mubr.msk.f32.gmra.mrb[8].mxu0 %vm250_vm0, %v9828_v54 }
 0x2a8   : > { %6881 = vmatprep.mubr.msk.f32.mxu0 %vm250_vm0, %v9835_v25  ;;  %v6098_v25 = vld [vmem:[%s10539_s3 + $0x40] sm:$0xff] }
 0x2a9   : > { %v7232_v48 = vpack.c.bf16 %v6099_v44, %v6098_v25 }
 0x2ab   : > { %6882 = vmatmul.mubr.msk.f32.gmra.mrb[10].mxu0 %vm250_vm0, %v9847_v46  ;;  %7233 = vmatprep.subr.bf16.mxu1 %v7232_v48 }
 0x2ac   : > { %6884 = vmatprep.mubr.msk.f32.mxu0 %vm250_vm0, %v9902_v6  ;;  %7235 = vmatpush3.bf16.msra.mxu1 %v7232_v48  ;;  %v10102_v6 = vpack.c.bf16 %v4734_v26, %v4733_v12 }
 0x2ad   : > { %7237 = vmatprep.subr.bf16.mxu1 %v7236_v8 }
 0x2af   : > { %6885 = vmatmul.mubr.msk.f32.gmra.mrb[12].mxu0 %vm250_vm0, %v9906_v52  ;;  %v6186_v52 = vld [vmem:[%s10539_s3 + $0x200] sm:$0xff] }
 0x2b0   : > { %6887 = vmatprep.mubr.msk.f32.mxu0 %vm250_vm0, %v4405_v22  ;;  %7239 = vmatpush3.bf16.msra.mxu1 %v7236_v8  ;;  %v10110_v55 = vpack.c.bf16 %v6187_v61, %v6186_v52 }
 0x2b1   : > { %7241 = vmatprep.subr.bf16.mxu1 %v7240_v30 }
 0x2b2   : > { %7361 = vmatprep.subr.bf16.mxu0 %v10110_v55 }
 0x2b3   : > { %6888 = vmatmul.mubr.msk.f32.gmra.mrb[14].mxu0 %vm250_vm0, %v4406_v19 }
 0x2b4   : > { %7243 = vmatpush3.bf16.msra.mxu1 %v7240_v30  ;;  %7363 = vmatpush3.bf16.msra.mxu0 %v10110_v55 }
 0x2b5   : > { %7245 = vmatprep.subr.bf16.mxu1 %v7244_v1  ;;  %7365 = vmatprep.subr.bf16.mxu0 %v10120_v24 }
 0x2b8   : > { %7247 = vmatpush3.bf16.msra.mxu1 %v7244_v1  ;;  %7367 = vmatpush3.bf16.msra.mxu0 %v10120_v24 }
 0x2b9   : > { %7249 = vmatprep.subr.bf16.mxu1 %v10102_v6  ;;  %7369 = vmatprep.subr.bf16.mxu0 %v10130_v21 }
 0x2bc   : > { %7371 = vmatpush3.bf16.msra.mxu0 %v10130_v21 }
 0x2bd   : > { %7373 = vmatprep.subr.bf16.mxu0 %v10141_v5 }
 0x2c0   : > { %7375 = vmatpush3.bf16.msra.mxu0 %v10141_v5 }
 0x2db   : > { %v10039_v34 = vpop.f32.mrb[0].mxu1 }
 0x2dc   : > { %v10041_v23 = vpop.f32.mrb[1].mxu1 }
 0x2df   : > { %v10043_v32 = vpop.f32.mrb[2].mxu1 }
 0x2e0   : > { %v10045_v41 = vpop.f32.mrb[3].mxu1 }
 0x2e3   : > { %v10047_v57 = vpop.f32.mrb[4].mxu1 }
 0x2e4   : > { %v10049_v60 = vpop.f32.mrb[5].mxu1 }
 0x2e7   : > { %v10051_v42 = vpop.f32.mrb[6].mxu1 }
 0x2e8   : > { %v10053_v63 = vpop.f32.mrb[7].mxu1 }
 0x2fc   : > { %v10055_v0 = vpop.f32.mrb[8].mxu1 }
 0x2fd   : > { %v10057_v56 = vpop.f32.mrb[9].mxu1 }
 0x300   : > { %v10059_v39 = vpop.f32.mrb[10].mxu1 }
 0x301   : > { %v10061_v54 = vpop.f32.mrb[11].mxu1 }
 0x304   : > { %v10069_v46 = vpop.f32.mrb[12].mxu1 }
 0x305   : > { %v10071_v33 = vpop.f32.mrb[13].mxu1 }
 0x308   : > { %v10073_v40 = vpop.f32.mrb[14].mxu1 }
 0x309   : > { %v10075_v17 = vpop.f32.mrb[15].mxu1 }
 0x36a   : > { %v6868_v29 = vpop.f32.mrb[0].mxu0 }
 0x36b   : > { %v7392_v45 = vadd.f32 %v6868_v29, %v10039_v34  ;;  %v4530_v9 = vpop.f32.mrb[1].mxu0 }
 0x36c   : > { %v7393_v28 = vadd.f32 %v4530_v9, %v10041_v23 }
 0x36d   : > { %v4634_v7 = vmul.f32 %v7392_v45, %v10148_v35 }
 0x36e   : > { %v4633_v58 = vmul.f32 %v7393_v28, %v10148_v35  ;;  %v6871_v51 = vpop.f32.mrb[2].mxu0 }
 0x36f   : > { %v7394_v31 = vadd.f32 %v6871_v51, %v10043_v32  ;;  %v4540_v14 = vpop.f32.mrb[3].mxu0  ;;  %v4658_v62 = vadd.f32 %v10156_v43, %v4634_v7 }
 0x370   : > { %v7395_v11 = vadd.f32 %v4540_v14, %v10045_v41  ;;  %v4657_v20 = vadd.f32 %v10156_v43, %v4633_v58 }
 0x371   : > { %v4636_v18 = vmul.f32 %v7394_v31, %v10148_v35  ;;  %v4674_v25 = vmax.f32 %v4658_v62, 0.0 }
 0x372   : > { %v4635_v10 = vmul.f32 %v7395_v11, %v10148_v35  ;;  %v6874_v27 = vpop.f32.mrb[4].mxu0  ;;  %v4673_v48 = vmax.f32 %v4657_v20, 0.0 }
 0x373   : > { %v4660_v22 = vadd.f32 %v10156_v43, %v4636_v18  ;;  %v7396_v19 = vadd.f32 %v6874_v27, %v10047_v57  ;;  %v4550_v34 = vpop.f32.mrb[5].mxu0 }
 0x374   : > { %v4659_v23 = vadd.f32 %v10156_v43, %v4635_v10  ;;  %v7397_v32 = vadd.f32 %v4550_v34, %v10049_v60 }
 0x375   : > { %v4676_v41 = vmax.f32 %v4660_v22, 0.0  ;;  %v4638_v44 = vmul.f32 %v7396_v19, %v10148_v35 }
 0x376   : > { %v4675_v38 = vmax.f32 %v4659_v23, 0.0  ;;  %v4637_v59 = vmul.f32 %v7397_v32, %v10148_v35  ;;  %v6877_v49 = vpop.f32.mrb[6].mxu0 }
 0x377   : > { %v4690_v8 = vmax.f32 %v4674_v25, %v4676_v41  ;;  %v7398_v37 = vadd.f32 %v6877_v49, %v10051_v42  ;;  %v4560_v30 = vpop.f32.mrb[7].mxu0  ;;  %v4662_v60 = vadd.f32 %v10156_v43, %v4638_v44  ;;  %v4736_v49 = vld [vmem:[%s10539_s3 + $0x18] sm:$0xff] }
 0x378   : > { %v4689_v16 = vmax.f32 %v4673_v48, %v4675_v38  ;;  %v7399_v57 = vadd.f32 %v4560_v30, %v10053_v63  ;;  %v4661_v36 = vadd.f32 %v10156_v43, %v4637_v59  ;;  %v4735_v59 = vld [vmem:[%s10539_s3 + $0x10] sm:$0xff] }
 0x379   : > { %4698 = vst.msk [vmem:[#allocation3 + $0x8] sm:$0xff] %vm250_vm0, %v4690_v8  ;;  %v4640_v50 = vmul.f32 %v7398_v37, %v10148_v35  ;;  %v4678_v53 = vmax.f32 %v4662_v60, 0.0 }
 0x37a   : > { %4697 = vst.msk [vmem:[#allocation3] sm:$0xff] %vm250_vm0, %v4689_v16  ;;  %v4639_v1 = vmul.f32 %v7399_v57, %v10148_v35  ;;  %v6880_v12 = vpop.f32.mrb[8].mxu0  ;;  %v4677_v13 = vmax.f32 %v4661_v36, 0.0 }
 0x37b   : > { %v4664_v26 = vadd.f32 %v10156_v43, %v4640_v50  ;;  %v7400_v42 = vadd.f32 %v6880_v12, %v10055_v0  ;;  %v4570_v52 = vpop.f32.mrb[9].mxu0  ;;  %v7252_v50 = vpack.c.bf16 %v4736_v49, %v4735_v59  ;;  %v4737_v12 = vld [vmem:[%s10539_s3 + $0x20] sm:$0xff]  ;;  %v6131_v59 = vld [vmem:[%s10539_s3 + $0xe8] sm:$0xff] }
 0x37c   : > { %v4663_v63 = vadd.f32 %v10156_v43, %v4639_v1  ;;  %v7401_v61 = vadd.f32 %v4570_v52, %v10057_v56 }
 0x37d   : > { %v4680_v47 = vmax.f32 %v4664_v26, 0.0  ;;  %v4642_v15 = vmul.f32 %v7400_v42, %v10148_v35  ;;  %v4738_v26 = vld [vmem:[%s10539_s3 + $0x28] sm:$0xff] }
 0x37e   : > { %v4679_v2 = vmax.f32 %v4663_v63, 0.0  ;;  %v4641_v4 = vmul.f32 %v7401_v61, %v10148_v35  ;;  %v6883_v29 = vpop.f32.mrb[10].mxu0  ;;  %v7256_v61 = vpack.c.bf16 %v4738_v26, %v4737_v12  ;;  %v6143_v12 = vld [vmem:[%s10539_s3 + $0x128] sm:$0xff] }
 0x37f   : > { %v4692_v45 = vmax.f32 %v4678_v53, %v4680_v47  ;;  %v7402_v9 = vadd.f32 %v6883_v29, %v10059_v39  ;;  %v4580_v28 = vpop.f32.mrb[11].mxu0  ;;  %v4666_v56 = vadd.f32 %v10156_v43, %v4642_v15  ;;  %v4739_v47 = vld [vmem:[%s10539_s3 + $0x30] sm:$0xff]  ;;  %v4740_v15 = vld [vmem:[%s10539_s3 + $0x38] sm:$0xff] }
 0x380   : > { %v4691_v7 = vmax.f32 %v4677_v13, %v4679_v2  ;;  %v7403_v0 = vadd.f32 %v4580_v28, %v10061_v54  ;;  %v4665_v14 = vadd.f32 %v10156_v43, %v4641_v4  ;;  %v7260_v4 = vpack.c.bf16 %v4740_v15, %v4739_v47  ;;  %v6152_v47 = vld [vmem:[%s10539_s3 + $0x150] sm:$0xff] }
 0x381   : > { %4700 = vst.msk [vmem:[#allocation3 + $0x18] sm:$0xff] %vm250_vm0, %v4692_v45  ;;  %v4644_v58 = vmul.f32 %v7402_v9, %v10148_v35  ;;  %v4705_v51 = vld [vmem:[#allocation3] ss:$2 sm:$0xff]  ;;  %v4709_v31 = vld [vmem:[#allocation3 + $0x1] ss:$2 sm:$0xff]  ;;  %v4682_v22 = vmax.f32 %v4666_v56, 0.0 }
 0x382   : > { %4699 = vst.msk [vmem:[#allocation3 + $0x10] sm:$0xff] %vm250_vm0, %v4691_v7  ;;  %v4643_v11 = vmul.f32 %v7403_v0, %v10148_v35  ;;  %v6886_v62 = vpop.f32.mrb[12].mxu0  ;;  %v4713_v39 = vmax.f32 %v4705_v51, %v4709_v31  ;;  %v4681_v23 = vmax.f32 %v4665_v14, 0.0  ;;  %v6114_v45 = vld [vmem:[%s10539_s3 + $0x80] sm:$0xff]  ;;  %v6115_v9 = vld [vmem:[%s10539_s3 + $0x88] sm:$0xff]  ;;  %v4729_v51 = vld [vmem:[#allocation5] sm:$0xff] }
 0x383   : > { %v4668_v18 = vadd.f32 %v10156_v43, %v4644_v58  ;;  %v7404_v54 = vadd.f32 %v6886_v62, %v10069_v46  ;;  %v4590_v20 = vpop.f32.mrb[13].mxu0  ;;  %v7264_v28 = vpack.c.bf16 %v6115_v9, %v6114_v45  ;;  %v6116_v14 = vld [vmem:[%s10539_s3 + $0x90] sm:$0xff]  ;;  %v6157_v9 = vld [vmem:[%s10539_s3 + $0x178] sm:$0xff] }
 0x384   : > { %v4667_v10 = vadd.f32 %v10156_v43, %v4643_v11  ;;  %v7405_v27 = vadd.f32 %v4590_v20, %v10071_v33  ;;  %4717 = vst.msk [vmem:[#allocation5 + $0x9] sm:$0xff] %vm250_vm0, %v4713_v39  ;;  %v6117_v11 = vld [vmem:[%s10539_s3 + $0x98] sm:$0xff]  ;;  %v6156_v45 = vld [vmem:[%s10539_s3 + $0x170] sm:$0xff] }
 0x385   : > { %v4684_v19 = vmax.f32 %v4668_v18, 0.0  ;;  %v4646_v34 = vmul.f32 %v7404_v54, %v10148_v35  ;;  %4721 = vst.msk [vmem:[#allocation5 + $0xd] sm:$0x1] %vm253_vm1, %v10547_v3  ;;  %4725 = vst.msk [vmem:[#allocation5 + $0x10] sm:$0x1] %vm253_vm1, %v10547_v3  ;;  %v7268_v62 = vpack.c.bf16 %v6117_v11, %v6116_v14  ;;  %v6118_v18 = vld [vmem:[%s10539_s3 + $0xa0] sm:$0xff] }
 0x386   : > { %v4683_v32 = vmax.f32 %v4667_v10, 0.0  ;;  %v4645_v46 = vmul.f32 %v7405_v27, %v10148_v35  ;;  %v6889_v25 = vpop.f32.mrb[14].mxu0  ;;  %v6119_v54 = vld [vmem:[%s10539_s3 + $0xa8] sm:$0xff]  ;;  %v6165_v14 = vld [vmem:[%s10539_s3 + $0x198] sm:$0xff] }
 0x387   : > { %v4694_v41 = vmax.f32 %v4682_v22, %v4684_v19  ;;  %v7406_v33 = vadd.f32 %v6889_v25, %v10073_v40  ;;  %v4600_v44 = vpop.f32.mrb[15].mxu0  ;;  %v4670_v8 = vadd.f32 %v10156_v43, %v4646_v34  ;;  %v7272_v10 = vpack.c.bf16 %v6119_v54, %v6118_v18  ;;  %v6120_v22 = vld [vmem:[%s10539_s3 + $0xb0] sm:$0xff]  ;;  %v6121_v19 = vld [vmem:[%s10539_s3 + $0xb8] sm:$0xff] }
 0x388   : > { %v4693_v48 = vmax.f32 %v4681_v23, %v4683_v32  ;;  %v7407_v38 = vadd.f32 %v4600_v44, %v10075_v17  ;;  %v4669_v17 = vadd.f32 %v10156_v43, %v4645_v46  ;;  %v7276_v23 = vpack.c.bf16 %v6121_v19, %v6120_v22  ;;  %v6126_v32 = vld [vmem:[%s10539_s3 + $0xc0] sm:$0xff]  ;;  %v6127_v46 = vld [vmem:[%s10539_s3 + $0xc8] sm:$0xff]  ;;  %v6169_v22 = vld [vmem:[%s10539_s3 + $0x1b8] sm:$0xff] }
 0x389   : > { %4702 = vst.msk [vmem:[#allocation3 + $0x28] sm:$0xff] %vm250_vm0, %v4694_v41  ;;  %v4648_v37 = vmul.f32 %v7406_v33, %v10148_v35  ;;  %v4706_v30 = vld [vmem:[#allocation3 + $0x10] ss:$2 sm:$0xff]  ;;  %v4710_v40 = vld [vmem:[#allocation3 + $0x11] ss:$2 sm:$0xff]  ;;  %v4686_v42 = vmax.f32 %v4670_v8, 0.0  ;;  %v7280_v25 = vpack.c.bf16 %v6127_v46, %v6126_v32 }
 0x38a   : > { %4701 = vst.msk [vmem:[#allocation3 + $0x20] sm:$0xff] %vm250_vm0, %v4693_v48  ;;  %v4647_v16 = vmul.f32 %v7407_v38, %v10148_v35  ;;  %v4714_v57 = vmax.f32 %v4706_v30, %v4710_v40  ;;  %v6128_v41 = vld [vmem:[%s10539_s3 + $0xd0] sm:$0xff]  ;;  %v6129_v33 = vld [vmem:[%s10539_s3 + $0xd8] sm:$0xff]  ;;  %v6130_v38 = vld [vmem:[%s10539_s3 + $0xe0] sm:$0xff] }
 0x38b   : > { %v4672_v60 = vadd.f32 %v10156_v43, %v4648_v37  ;;  %v4948_v34 = vld [vmem:[#allocation5 + $0x2] sm:$0xff]  ;;  %v7284_v44 = vpack.c.bf16 %v6129_v33, %v6128_v41  ;;  %v7288_v49 = vpack.c.bf16 %v6131_v59, %v6130_v38  ;;  %v6138_v40 = vld [vmem:[%s10539_s3 + $0x100] sm:$0xff]  ;;  %v6175_v19 = vld [vmem:[%s10539_s3 + $0x1c8] sm:$0xff] }
 0x38c   : > { %v4671_v36 = vadd.f32 %v10156_v43, %v4647_v16  ;;  %v10220_v1 = vld [vmem:[#allocation5 + $0x9] sm:$0xff]  ;;  %4718 = vst.msk [vmem:[#allocation5 + $0x11] sm:$0xff] %vm250_vm0, %v4714_v57  ;;  %v4685_v43 = vmax.f32 %v4669_v17, 0.0  ;;  %v6132_v8 = vld [vmem:[%s10539_s3 + $0xf0] sm:$0xff]  ;;  %v6139_v17 = vld [vmem:[%s10539_s3 + $0x108] sm:$0xff] }
 0x38d   : > { %v4688_v35 = vmax.f32 %v4672_v60, 0.0  ;;  %6907 = vmatmul.mubr.msk.f32.vlgmr.msra.gmra.mrb[16].mxu1 %vm250_vm0, %v10220_v1  ;;  %4722 = vst.msk [vmem:[#allocation5 + $0x15] sm:$0x1] %vm253_vm1, %v10547_v3  ;;  %4726 = vst.msk [vmem:[#allocation5 + $0x18] sm:$0x1] %vm253_vm1, %v10547_v3  ;;  %v4730_v39 = vld [vmem:[#allocation5 + $0x8] sm:$0xff]  ;;  %v7296_v16 = vpack.c.bf16 %v6139_v17, %v6138_v40 }
 0x38e   : > { %v4687_v52 = vmax.f32 %v4671_v36, 0.0  ;;  %7251 = vmatpush3.bf16.msra.mxu1 %v10102_v6  ;;  %v6133_v37 = vld [vmem:[%s10539_s3 + $0xf8] sm:$0xff]  ;;  %v6140_v57 = vld [vmem:[%s10539_s3 + $0x110] sm:$0xff]  ;;  %v6142_v36 = vld [vmem:[%s10539_s3 + $0x120] sm:$0xff] }
 0x38f   : > { %v4696_v63 = vmax.f32 %v4686_v42, %v4688_v35  ;;  %7253 = vmatprep.subr.bf16.mxu1 %v7252_v50  ;;  %v7292_v30 = vpack.c.bf16 %v6133_v37, %v6132_v8  ;;  %v6141_v60 = vld [vmem:[%s10539_s3 + $0x118] sm:$0xff]  ;;  %v7304_v26 = vpack.c.bf16 %v6143_v12, %v6142_v36  ;;  %v6144_v35 = vld [vmem:[%s10539_s3 + $0x130] sm:$0xff]  ;;  %v6178_v46 = vld [vmem:[%s10539_s3 + $0x1e0] sm:$0xff] }
 0x390   : > { %v4695_v53 = vmax.f32 %v4685_v43, %v4687_v52  ;;  %v6145_v43 = vld [vmem:[%s10539_s3 + $0x138] sm:$0xff] }
 0x391   : > { %4704 = vst.msk [vmem:[#allocation3 + $0x38] sm:$0xff] %vm250_vm0, %v4696_v63  ;;  %v4707_v13 = vld [vmem:[#allocation3 + $0x20] ss:$2 sm:$0xff]  ;;  %v4711_v2 = vld [vmem:[#allocation3 + $0x21] ss:$2 sm:$0xff]  ;;  %v7308_v52 = vpack.c.bf16 %v6145_v43, %v6144_v35 }
 0x392   : > { %4703 = vst.msk [vmem:[#allocation3 + $0x30] sm:$0xff] %vm250_vm0, %v4695_v53  ;;  %7255 = vmatpush3.bf16.msra.mxu1 %v7252_v50  ;;  %v4715_v6 = vmax.f32 %v4707_v13, %v4711_v2  ;;  %v7300_v50 = vpack.c.bf16 %v6141_v60, %v6140_v57  ;;  %v6150_v63 = vld [vmem:[%s10539_s3 + $0x140] sm:$0xff]  ;;  %v6155_v2 = vld [vmem:[%s10539_s3 + $0x168] sm:$0xff] }
 0x393   : > { %7257 = vmatprep.subr.bf16.mxu1 %v7256_v61  ;;  %v4949_v48 = vld [vmem:[#allocation5 + $0xa] sm:$0xff] }
 0x394   : > { %v10245_v29 = vld [vmem:[#allocation5 + $0x11] sm:$0xff]  ;;  %4719 = vst.msk [vmem:[#allocation5 + $0x19] sm:$0xff] %vm250_vm0, %v4715_v6  ;;  %v5521_v38 = vld [vmem:[#allocation5 + $0x29] sm:$0xff] }
 0x395   : > { %6909 = vmatprep.mubr.msk.f32.mxu1 %vm250_vm0, %v10245_v29  ;;  %4723 = vst.msk [vmem:[#allocation5 + $0x1d] sm:$0x1] %vm253_vm1, %v10547_v3  ;;  %4727 = vst.msk [vmem:[#allocation5 + $0x20] sm:$0x1] %vm253_vm1, %v10547_v3  ;;  %v10287_v20 = vld [vmem:[#allocation5 + $0x10] sm:$0xff] }
 0x396   : > { %7259 = vmatpush3.bf16.msra.mxu1 %v7256_v61  ;;  %v6151_v61 = vld [vmem:[%s10539_s3 + $0x148] sm:$0xff]  ;;  %v6154_v13 = vld [vmem:[%s10539_s3 + $0x160] sm:$0xff] }
 0x397   : > { %7261 = vmatprep.subr.bf16.mxu1 %v7260_v4  ;;  %v7312_v53 = vpack.c.bf16 %v6151_v61, %v6150_v63  ;;  %v7320_v6 = vpack.c.bf16 %v6155_v2, %v6154_v13 }
 0x399   : > { %v4708_v7 = vld [vmem:[#allocation3 + $0x30] ss:$2 sm:$0xff]  ;;  %v4712_v0 = vld [vmem:[#allocation3 + $0x31] ss:$2 sm:$0xff] }
 0x39a   : > { %7263 = vmatpush3.bf16.msra.mxu1 %v7260_v4  ;;  %v4716_v56 = vmax.f32 %v4708_v7, %v4712_v0  ;;  %v6162_v7 = vld [vmem:[%s10539_s3 + $0x180] sm:$0xff]  ;;  %v6163_v0 = vld [vmem:[%s10539_s3 + $0x188] sm:$0xff] }
 0x39b   : > { %v10260_v58 = vld [vmem:[#allocation5 + $0x12] sm:$0xff]  ;;  %7265 = vmatprep.subr.bf16.mxu1 %v7264_v28 }
 0x39c   : > { %7082 = vmatprep.mubr.msk.f32.mxu0 %vm250_vm0, %v10260_v58  ;;  %v10264_v31 = vld [vmem:[#allocation5 + $0x19] sm:$0xff]  ;;  %4720 = vst.msk [vmem:[#allocation5 + $0x21] sm:$0xff] %vm250_vm0, %v4716_v56  ;;  %v7328_v56 = vpack.c.bf16 %v6163_v0, %v6162_v7 }
 0x39d   : > { %6910 = vmatmul.mubr.msk.f32.gmra.mrb[18].mxu1 %vm250_vm0, %v10264_v31  ;;  %4724 = vst.msk [vmem:[#allocation5 + $0x25] sm:$0x1] %vm253_vm1, %v10547_v3  ;;  %4728 = vst.msk [vmem:[#allocation5 + $0x28] sm:$0x1] %vm253_vm1, %v10547_v3  ;;  %v10295_v27 = vld [vmem:[#allocation5 + $0x18] sm:$0xff] }
 0x39e   : > { %6928 = vmatprep.mubr.msk.f32.mxu1 %vm250_vm0, %v4729_v51  ;;  %v6164_v51 = vld [vmem:[%s10539_s3 + $0x190] sm:$0xff] }
 0x39f   : > { %v7332_v11 = vpack.c.bf16 %v6165_v14, %v6164_v51 }
 0x3a1   : > { %6929 = vmatmul.mubr.msk.f32.vlgmr.msra.gmra.mrb[16].mxu1 %vm250_vm0, %v4730_v39 }
 0x3a2   : > { %7267 = vmatpush3.bf16.msra.mxu1 %v7264_v28  ;;  %6931 = vmatprep.mubr.msk.f32.mxu1 %vm250_vm0, %v10287_v20  ;;  %v7324_v28 = vpack.c.bf16 %v6157_v9, %v6156_v45 }
 0x3a3   : > { %7269 = vmatprep.subr.bf16.mxu1 %v7268_v62  ;;  %v10291_v3 = vld [vmem:[#allocation5 + $0x1a] sm:$0xff] }
 0x3a4   : > { %7083 = vmatmul.mubr.msk.f32.vlgmr.msra.gmra.mrb[16].mxu0 %vm250_vm0, %v10291_v3  ;;  %v10358_v42 = vld [vmem:[#allocation5 + $0x20] sm:$0xff]  ;;  %v5407_v41 = vld [vmem:[#allocation5 + $0x28] sm:$0xff] }
 0x3a5   : > { %6932 = vmatmul.mubr.msk.f32.gmra.mrb[18].mxu1 %vm250_vm0, %v10295_v27  ;;  %v10392_v4 = vld [vmem:[#allocation5 + $0x21] sm:$0xff] }
 0x3a6   : > { %7271 = vmatpush3.bf16.msra.mxu1 %v7268_v62  ;;  %6950 = vmatprep.mubr.msk.f32.mxu1 %vm250_vm0, %v4948_v34  ;;  %v6166_v62 = vld [vmem:[%s10539_s3 + $0x1a0] sm:$0xff]  ;;  %v5293_v54 = vld [vmem:[#allocation5 + $0x22] sm:$0xff] }
 0x3a7   : > { %7273 = vmatprep.subr.bf16.mxu1 %v7272_v10 }
 0x3aa   : > { %7275 = vmatpush3.bf16.msra.mxu1 %v7272_v10  ;;  %v6168_v10 = vld [vmem:[%s10539_s3 + $0x1b0] sm:$0xff] }
 0x3ab   : > { %7277 = vmatprep.subr.bf16.mxu1 %v7276_v23 }
 0x3ae   : > { %7279 = vmatpush3.bf16.msra.mxu1 %v7276_v23  ;;  %v6176_v23 = vld [vmem:[%s10539_s3 + $0x1d0] sm:$0xff] }
 0x3af   : > { %7281 = vmatprep.subr.bf16.mxu1 %v7280_v25 }
 0x3b1   : > { %6951 = vmatmul.mubr.msk.f32.vlgmr.msra.gmra.mrb[16].mxu1 %vm250_vm0, %v4949_v48 }
 0x3b2   : > { %6953 = vmatprep.mubr.msk.f32.mxu1 %vm250_vm0, %v10260_v58  ;;  %7283 = vmatpush3.bf16.msra.mxu1 %v7280_v25  ;;  %v6179_v25 = vld [vmem:[%s10539_s3 + $0x1e8] sm:$0xff] }
 0x3b3   : > { %7285 = vmatprep.subr.bf16.mxu1 %v7284_v44  ;;  %v7352_v33 = vpack.c.bf16 %v6179_v25, %v6178_v46 }
 0x3b5   : > { %6954 = vmatmul.mubr.msk.f32.gmra.mrb[18].mxu1 %vm250_vm0, %v10291_v3 }
 0x3b6   : > { %7287 = vmatpush3.bf16.msra.mxu1 %v7284_v44  ;;  %6972 = vmatprep.mubr.msk.f32.mxu1 %vm250_vm0, %v4730_v39  ;;  %v6167_v39 = vld [vmem:[%s10539_s3 + $0x1a8] sm:$0xff]  ;;  %v6180_v44 = vld [vmem:[%s10539_s3 + $0x1f0] sm:$0xff] }
 0x3b7   : > { %7289 = vmatprep.subr.bf16.mxu1 %v7288_v49  ;;  %v7336_v18 = vpack.c.bf16 %v6167_v39, %v6166_v62 }
 0x3ba   : > { %7291 = vmatpush3.bf16.msra.mxu1 %v7288_v49 }
 0x3bb   : > { %7293 = vmatprep.subr.bf16.mxu1 %v7292_v30 }
 0x3be   : > { %7295 = vmatpush3.bf16.msra.mxu1 %v7292_v30 }
 0x3bf   : > { %7297 = vmatprep.subr.bf16.mxu1 %v7296_v16 }
 0x3c1   : > { %6973 = vmatmul.mubr.msk.f32.vlgmr.msra.gmra.mrb[16].mxu1 %vm250_vm0, %v10287_v20 }
 0x3c2   : > { %6975 = vmatprep.mubr.msk.f32.mxu1 %vm250_vm0, %v10295_v27  ;;  %7299 = vmatpush3.bf16.msra.mxu1 %v7296_v16 }
 0x3c3   : > { %7301 = vmatprep.subr.bf16.mxu1 %v7300_v50 }
 0x3c5   : > { %6976 = vmatmul.mubr.msk.f32.gmra.mrb[18].mxu1 %vm250_vm0, %v10358_v42 }
 0x3c6   : > { %7303 = vmatpush3.bf16.msra.mxu1 %v7300_v50  ;;  %6994 = vmatprep.mubr.msk.f32.mxu1 %vm250_vm0, %v10220_v1  ;;  %v6153_v1 = vld [vmem:[%s10539_s3 + $0x158] sm:$0xff] }
 0x3c7   : > { %7305 = vmatprep.subr.bf16.mxu1 %v7304_v26  ;;  %v7316_v15 = vpack.c.bf16 %v6153_v1, %v6152_v47 }
 0x3ca   : > { %7307 = vmatpush3.bf16.msra.mxu1 %v7304_v26 }
 0x3cb   : > { %7309 = vmatprep.subr.bf16.mxu1 %v7308_v52 }
 0x3ce   : > { %7311 = vmatpush3.bf16.msra.mxu1 %v7308_v52 }
 0x3cf   : > { %7313 = vmatprep.subr.bf16.mxu1 %v7312_v53 }
 0x3d1   : > { %6995 = vmatmul.mubr.msk.f32.vlgmr.msra.gmra.mrb[16].mxu1 %vm250_vm0, %v10245_v29 }
 0x3d2   : > { %6997 = vmatprep.mubr.msk.f32.mxu1 %vm250_vm0, %v10264_v31  ;;  %7315 = vmatpush3.bf16.msra.mxu1 %v7312_v53 }
 0x3d3   : > { %7317 = vmatprep.subr.bf16.mxu1 %v7316_v15 }
 0x3d5   : > { %6998 = vmatmul.mubr.msk.f32.gmra.mrb[18].mxu1 %vm250_vm0, %v10392_v4 }
 0x3d6   : > { %7319 = vmatpush3.bf16.msra.mxu1 %v7316_v15  ;;  %7016 = vmatprep.mubr.msk.f32.mxu1 %vm250_vm0, %v4949_v48  ;;  %v6181_v48 = vld [vmem:[%s10539_s3 + $0x1f8] sm:$0xff] }
 0x3d7   : > { %7321 = vmatprep.subr.bf16.mxu1 %v7320_v6 }
 0x3da   : > { %7323 = vmatpush3.bf16.msra.mxu1 %v7320_v6 }
 0x3db   : > { %7325 = vmatprep.subr.bf16.mxu1 %v7324_v28 }
 0x3de   : > { %7327 = vmatpush3.bf16.msra.mxu1 %v7324_v28 }
 0x3df   : > { %7329 = vmatprep.subr.bf16.mxu1 %v7328_v56 }
 0x3e1   : > { %7017 = vmatmul.mubr.msk.f32.vlgmr.msra.gmra.mrb[16].mxu1 %vm250_vm0, %v10260_v58  ;;  %v7340_v58 = vpack.c.bf16 %v6169_v22, %v6168_v10 }
 0x3e2   : > { %7019 = vmatprep.mubr.msk.f32.mxu1 %vm250_vm0, %v10291_v3  ;;  %7331 = vmatpush3.bf16.msra.mxu1 %v7328_v56  ;;  %v6174_v3 = vld [vmem:[%s10539_s3 + $0x1c0] sm:$0xff] }
 0x3e3   : > { %7333 = vmatprep.subr.bf16.mxu1 %v7332_v11  ;;  %v7344_v34 = vpack.c.bf16 %v6175_v19, %v6174_v3 }
 0x3e5   : > { %7020 = vmatmul.mubr.msk.f32.gmra.mrb[18].mxu1 %vm250_vm0, %v5293_v54 }
 0x3e6   : > { %7335 = vmatpush3.bf16.msra.mxu1 %v7332_v11  ;;  %7038 = vmatprep.mubr.msk.f32.mxu1 %vm250_vm0, %v10287_v20  ;;  %v6177_v20 = vld [vmem:[%s10539_s3 + $0x1d8] sm:$0xff] }
 0x3e7   : > { %7337 = vmatprep.subr.bf16.mxu1 %v7336_v18  ;;  %v7348_v32 = vpack.c.bf16 %v6177_v20, %v6176_v23 }
 0x3ea   : > { %7339 = vmatpush3.bf16.msra.mxu1 %v7336_v18 }
 0x3eb   : > { %7341 = vmatprep.subr.bf16.mxu1 %v7340_v58 }
 0x3ee   : > { %7343 = vmatpush3.bf16.msra.mxu1 %v7340_v58 }
 0x3ef   : > { %7345 = vmatprep.subr.bf16.mxu1 %v7344_v34 }
 0x3f1   : > { %7039 = vmatmul.mubr.msk.f32.vlgmr.msra.gmra.mrb[16].mxu1 %vm250_vm0, %v10295_v27  ;;  %v7356_v27 = vpack.c.bf16 %v6181_v48, %v6180_v44 }
 0x3f2   : > { %7041 = vmatprep.mubr.msk.f32.mxu1 %vm250_vm0, %v10358_v42  ;;  %7347 = vmatpush3.bf16.msra.mxu1 %v7344_v34 }
 0x3f3   : > { %7349 = vmatprep.subr.bf16.mxu1 %v7348_v32 }
 0x3f5   : > { %7042 = vmatmul.mubr.msk.f32.gmra.mrb[18].mxu1 %vm250_vm0, %v5407_v41 }
 0x3f6   : > { %7351 = vmatpush3.bf16.msra.mxu1 %v7348_v32  ;;  %7060 = vmatprep.mubr.msk.f32.mxu1 %vm250_vm0, %v10245_v29  ;;  %v5635_v29 = vld [vmem:[#allocation5 + $0x2a] sm:$0xff] }
 0x3f7   : > { %7353 = vmatprep.subr.bf16.mxu1 %v7352_v33 }
 0x3fa   : > { %7355 = vmatpush3.bf16.msra.mxu1 %v7352_v33 }
 0x3fb   : > { %7357 = vmatprep.subr.bf16.mxu1 %v7356_v27 }
 0x3fe   : > { %7359 = vmatpush3.bf16.msra.mxu1 %v7356_v27 }
 0x3ff   : > { %7384 = vmatprep.subr.bf16.mxu1 %v10110_v55 }
 0x401   : > { %7061 = vmatmul.mubr.msk.f32.vlgmr.msra.gmra.mrb[16].mxu1 %vm250_vm0, %v10264_v31 }
 0x402   : > { %7063 = vmatprep.mubr.msk.f32.mxu1 %vm250_vm0, %v10392_v4  ;;  %7388 = vmatpush3.bf16.msra.mxu1 %v10110_v55 }
 0x403   : > { %7385 = vmatprep.subr.bf16.mxu1 %v10120_v24 }
 0x405   : > { %7064 = vmatmul.mubr.msk.f32.gmra.mrb[18].mxu1 %vm250_vm0, %v5521_v38 }
 0x406   : > { %7389 = vmatpush3.bf16.msra.mxu1 %v10120_v24  ;;  %7085 = vmatprep.mubr.msk.f32.mxu1 %vm250_vm0, %v5293_v54  ;;  %v6199_v24 = vld [vmem:[%s10540_s4 + $0x2] ss:$0 sm:$0xff] }
 0x407   : > { %7386 = vmatprep.subr.bf16.mxu1 %v10130_v21 }
 0x40a   : > { %7390 = vmatpush3.bf16.msra.mxu1 %v10130_v21  ;;  %v6201_v21 = vld [vmem:[%s10541_s5 + $0x2] ss:$0 sm:$0xff] }
 0x40b   : > { %7387 = vmatprep.subr.bf16.mxu1 %v10141_v5 }
 0x40e   : > { %7391 = vmatpush3.bf16.msra.mxu1 %v10141_v5 }
 0x411   : > { %7086 = vmatmul.mubr.msk.f32.vlgmr.msra.gmra.mrb[18].mxu1 %vm250_vm0, %v5635_v29 }
 0x477   : > { %v7084_v55 = vpop.f32.mrb[16].mxu0 }
 0x478   : > { %v5723_v31 = vpop.f32.mrb[17].mxu0 }
 0x4d4   : > { %v7062_v59 = vpop.f32.mrb[16].mxu1 }
 0x4d5   : > { %v7408_v49 = vadd.f32 %v7084_v55, %v7062_v59  ;;  %v5609_v8 = vpop.f32.mrb[17].mxu1 }
 0x4d6   : > { %v7409_v37 = vadd.f32 %v5723_v31, %v5609_v8 }
 0x4d7   : > { %v5755_v30 = vmul.f32 %v7408_v49, %v6199_v24 }
 0x4d8   : > { %v5754_v40 = vmul.f32 %v7409_v37, %v6199_v24 }
 0x4d9   : > { %v5767_v5 = vadd.f32 %v6201_v21, %v5755_v30 }
 0x4da   : > { %v5766_v17 = vadd.f32 %v6201_v21, %v5754_v40 }
 0x4db   : > { %v5771_v16 = vmax.f32 %v5767_v5, 0.0 }
 0x4dc   : > { %v5770_v57 = vmax.f32 %v5766_v17, 0.0 }
 0x4de   : > { %v5774_v60 = vmax.f32 %v5770_v57, %v5771_v16 }
 0x4e0   : > { %5776 = vst.msk [vmem:[#allocation3] sm:$0xff] %vm250_vm0, %v5774_v60 }
 0x4e4   : > { %v7087_v50 = vpop.f32.mrb[18].mxu1 }
 0x4e5   : > { %v5757_v36 = vmul.f32 %v7087_v50, %v6199_v24  ;;  %v5733_v12 = vpop.f32.mrb[19].mxu1 }
 0x4e6   : > { %v5756_v26 = vmul.f32 %v6199_v24, %v5733_v12 }
 0x4e7   : > { %v5769_v42 = vadd.f32 %v6201_v21, %v5757_v36 }
 0x4e8   : > { %v5768_v35 = vadd.f32 %v6201_v21, %v5756_v26 }
 0x4e9   : > { %v5773_v43 = vmax.f32 %v5769_v42, 0.0 }
 0x4ea   : > { %v5772_v52 = vmax.f32 %v5768_v35, 0.0 }
 0x4ec   : > { %v5775_v63 = vmax.f32 %v5772_v52, %v5773_v43 }
 0x4ee   : > { %5777 = vst.msk [vmem:[#allocation3 + $0x8] sm:$0xff] %vm250_vm0, %v5775_v63 }
 0x4f5   : > { %v5778_v61 = vld [vmem:[#allocation3] ss:$2 sm:$0xff]  ;;  %v5779_v53 = vld [vmem:[#allocation3 + $0x1] ss:$2 sm:$0xff] }
 0x4f6   : > { %v5780_v47 = vmax.f32 %v5778_v61, %v5779_v53 }
 0x4f8   : > { %v5782_v1 = vrot.slane %v5780_v47, 4 }
 0x4fa   : > { %5783 = vrot.lane.b32.xlu0 %v5782_v1, %s7696_s10 }
 0x56c   : > { %v5784_v15 = vpop.permute.xlu0 %5783 }
 0x56d   : > { %v5786_v13 = vsel %vm250_vm0, %v5780_v47, %v5784_v15 }
 0x56e   : > { %5787 = vst [vmem:[%s244_s15] sm:$0x3] %v5786_v13 }
 0x56f   : > { %7643 = shalt.err (!%p7640_p3)
}
 0x570   : > { %s7644_s29 = scalar_lea.hbm %s10493_s18, 32  ;;  %s7648_s11 = scalar_lea.hbm %s10542_s6, 64 }
 0x571   : > { %p7645_p4 = scmp.ne.s32.totalorder %s10493_s18, %s7644_s29  ;;  %p7649_p9 = scmp.lt.u32.totalorder %s10493_s18, %s10542_s6 }
 0x572   : > { %p7650_p10 = scmp.lt.u32.totalorder %s7648_s11, %s7644_s29  ;;  %p7652_p12 = scmp.lt.u32.totalorder %s7644_s29, %s10493_s18 }
 0x573   : > { %p7646_p7 = pnand %p7645_p4, %p7771_p5 }
 0x574   : > { %p7651_p11 = por %p7650_p10, %p7649_p9 }
 0x575   : > { %p7647_p8 = pneg %p7646_p7 }
 0x576   : > { %p7653_p13 = por %p7652_p12, %p7651_p11 }
 0x578   : > { %p7654_p0 = pnand %p7653_p13, %p7647_p8 }
 0x57a   : > { %7657 = shalt.err (!%p7654_p0)
}
 0x57b   : > { %7553 = dma.vmem_to_hbm [thread:$0]  (%p7771_p5), %s10495_s13, 32, %s10493_s18, %s5789_s19  }
 0x57c PF: > { %p7559_p1 = scmp.ge.s32.totalorder %s7692_s24, 2  ;;  %s5814_s15 = sand.u32 1, %s7680_s21  }
 0x57d   : > { %s5815_s16 = scalar_lea.sflag [#allocation7], %s5814_s15 }
 0x57e   : > { %p7556_p2 = pnand %p7559_p1, %p7775_p6 }
 0x580   : > { %7675 = dma.done.wait (!%p7556_p2), %s5815_s16, 32  }
 0x581   : > { %7677 = vsyncadd (!%p7556_p2), %s5815_s16, 4294967264  ;;  %p16_p3 = scmp.ge.s32.totalorder %s7758_s27, 4   ;;  %s10548_s21 = smov %s7684_s22 }
 0x582   : > { %s10549_s22 = smov %s7688_s23  ;;  %s10550_s23 = smov %s7769_s30 }
 0x583   : > { %s10551_s24 = smov %s7758_s27  ;;  %18 = sbr.rel (!%p16_p3) target bundleno = 3 (0x3), region = 138 }
 0x58a   :  { %5820 = vsyncpa [#allocation7], 1 }
 0x58b   :  { %5822 = vsyncpa [#allocation7 + $0x1], 1 }

</bundles_post_ra>
